<compile_context>
chip_gen: v5e
topology: v5e:2x2
jax: 0.10.0
libtpu: 0.0.40
codegen_flags: <defaults>
</compile_context>

<pallas_src>
import functools

import jax
import jax.numpy as jnp
from jax.experimental import pallas as pl
from jax.experimental.pallas import tpu as pltpu

_VMEM = pl.BlockSpec(memory_space=pltpu.MemorySpace.VMEM)

# MXU operand dtype at the pallas_call BOUNDARY (in-kernel astype would only
# change MXU cadence, not DMA bytes).  Default f32 preserves reference
# numerics; set to jnp.bfloat16 on v6e/v7x once shapes are non-trivial.
_MXU_OPERAND_DTYPE = jnp.float32


def _mxu(x):
    return x.astype(_MXU_OPERAND_DTYPE)


def _dot(a, b):
    return jnp.dot(a, b, preferred_element_type=jnp.float32)


# ----------------------------- Pallas kernels -------------------------------

def _conv_pool_kernel(x00_ref, x01_ref, x10_ref, x11_ref, w_ref, b_ref, o_ref,
                      *, H2, W2, Cin, Cout):
    # Fused 3x3 'same' conv + bias + 2x2 max-pool for ONE image.
    # Inputs: padded image parity-deinterleaved into 4 components (row parity,
    # col parity), each a 2-D slab (H2+1, (W2+1)*Cin) with lanes = (w, cin).
    # Every conv tap of every pool quadrant is a contiguous 2-D slice of one
    # component; per-tap weight is block-diagonal kron(I_W2, W[dh,dw]) so the
    # (w, c) lane flattening is preserved.  max over the 4 quadrants IS the
    # MaxPool2d(2) result; bias is quadrant-invariant so it is added after.
    par = ((x00_ref, x01_ref), (x10_ref, x11_ref))
    quad = None
    for ph in (0, 1):
        for pw in (0, 1):
            q = None
            for dh in range(3):
                for dw in range(3):
                    a, bb = ph + dh, pw + dw
                    src = par[a % 2][bb % 2]
                    tap = src[a // 2:a // 2 + H2,
                              (bb // 2) * Cin:(bb // 2 + W2) * Cin]
                    contrib = _dot(tap, w_ref[dh * 3 + dw])
                    q = contrib if q is None else q + contrib
            quad = q if quad is None else jnp.maximum(quad, q)
    o_ref[...] = (quad + b_ref[...]).astype(o_ref.dtype)


def _blstm_stack_kernel(*refs, n_layers, hid):
    # Whole bidirectional n_layers ConvLSTM stack in ONE kernel (T == 1).
    # gates = Conv_x(x) + b  (Conv_h(h0=0) term is exactly zero),
    # c1 = sigmoid(i) * tanh(g)  (f-gate * c0 == 0 is skipped),
    # h1 = sigmoid(o) * tanh(c1).  At the 1x1 spatial map the 3x3 'same' conv
    # reduces exactly to its centre tap (all other taps read zero padding).
    # Per-gate weights are indexed on the leading dim -> no misaligned lane
    # slicing of a (B, 4*hid) gate slab.  Epilogue math stays f32.
    # TODO(synk): gate order (i, f, o, g) is an assumption about the external
    # ConvBLSTM reference implementation.
    xf_ref, xr_ref = refs[0], refs[1]
    o_ref = refs[-1]
    wb = refs[2:-1]

    def run(x, base):
        h = x
        for l in range(n_layers):
            w_ref = wb[base + 2 * l]
            b_ref = wb[base + 2 * l + 1]
            i = jax.nn.sigmoid(_dot(h, w_ref[0]) + b_ref[0])
            # f-gate (index 1) multiplies c0 == 0 -> exactly zero; skipped.
            og = jax.nn.sigmoid(_dot(h, w_ref[2]) + b_ref[2])
            g = jnp.tanh(_dot(h, w_ref[3]) + b_ref[3])
            c = i * g
            h = og * jnp.tanh(c)
        return h

    hf = run(xf_ref[...], 0)
    hr = run(xr_ref[...], 2 * n_layers)
    # channel concat [fwd | rev]; the reverse stream keeps the flipped patch
    # order (the reference ConvBLSTM only un-flips time, and T == 1).
    o_ref[:, 0:hid] = hf.astype(o_ref.dtype)
    o_ref[:, hid:2 * hid] = hr.astype(o_ref.dtype)


def _gcn_tail_kernel(pos_ref, cond_ref, a_ref,
                     m0w, m0b, m1w, m1b, m2w, m2b, m3w, m3b,
                     w1p, w1c, b1, w1w, b1w,
                     w2p, w2c, b2, w2w, b2w,
                     wcls, bcls, o_ref):
    # pos_encoder MLP + GCN block 1 + GCN block 2 + classifier, fused.
    # concat([pos, cond]) @ W is done as two split matmuls (no concat / HBM
    # intermediate).  Gconv(A, x) = A @ x @ W + b assumed (external class).
    # TODO(synk): for wide conditions add a K grid axis over the cond matmul
    # with an f32 accumulator ('arbitrary') to stay inside v7x's 64 MiB VMEM.
    h = pos_ref[...]
    for w_ref, b_ref in ((m0w, m0b), (m1w, m1b), (m2w, m2b), (m3w, m3b)):
        h = jnp.maximum(_dot(h, w_ref[...]) + b_ref[...], 0.0)
    cond = cond_ref[...]
    adj = a_ref[...]

    def gcn_block(p, wp, wc, b, ww, bw):
        xw = _dot(p, wp[...]) + _dot(cond, wc[...])
        t = _dot(adj, xw) + b[...]                       # Gconv: A @ x @ W + b
        feats = jnp.maximum(_dot(t, ww[...]) + bw[...], 0.0)
        return feats + p                                 # residual

    p1 = gcn_block(h, w1p, w1c, b1, w1w, b1w)
    p2 = gcn_block(p1, w2p, w2c, b2, w2w, b2w)
    # TODO(synk): pad out_features to a lane-dense 128 (and slice in the
    # wrapper) once n_node is large; masked stores are fine at toy size.
    o_ref[...] = (_dot(p2, wcls[...]) + bcls[...]).astype(o_ref.dtype)


# --------------------------- wrapper building blocks -------------------------

def conv3x3_maxpool(x, w, b):
    # 3x3 'same' Conv2d + bias + MaxPool2d(2) as one Pallas kernel per stage.
    # HBM traffic into the kernel is the padded input exactly once (the four
    # parity components partition it) -- no im2col expansion.
    N, H, W, Cin = x.shape
    Cout = w.shape[-1]
    assert H % 2 == 0 and W % 2 == 0, "MaxPool2d(2) with odd dims unsupported"
    H2, W2 = H // 2, W // 2
    xp = jnp.pad(x, ((0, 0), (1, 1), (1, 1), (0, 0)))
    comps = [xp[:, r::2, s::2, :].reshape(N, H2 + 1, (W2 + 1) * Cin)
             for r in (0, 1) for s in (0, 1)]
    eye = jnp.eye(W2, dtype=w.dtype)
    wbd = jnp.stack([jnp.kron(eye, w[dh, dw])
                     for dh in range(3) for dw in range(3)])   # (9, W2*Cin, W2*Cout)
    bbd = jnp.tile(b, (W2,)).reshape(1, W2 * Cout)

    # One image per grid step: always >= 2 "parallel" blocks (both v7x TCs),
    # auto double-buffering pipelines the per-image DMA.
    # TODO(synk): at large H2/C also block output rows (fixed block + pl.cdiv
    # grid) and mark the constant-index weight spec pl.Buffered(1).
    kernel = functools.partial(_conv_pool_kernel, H2=H2, W2=W2, Cin=Cin, Cout=Cout)
    out = pl.pallas_call(
        kernel,
        out_shape=jax.ShapeDtypeStruct((N, H2, W2 * Cout), jnp.float32),
        grid_spec=pltpu.PrefetchScalarGridSpec(
            num_scalar_prefetch=0,
            grid=(N,),
            in_specs=[pl.BlockSpec((None, H2 + 1, (W2 + 1) * Cin),
                                   lambda n: (n, 0, 0))] * 4
                     + [pl.BlockSpec((9, W2 * Cin, W2 * Cout), lambda n: (0, 0, 0)),
                        pl.BlockSpec((1, W2 * Cout), lambda n: (0, 0))],
            out_specs=pl.BlockSpec((None, H2, W2 * Cout), lambda n: (n, 0, 0)),
        ),
        compiler_params=pltpu.CompilerParams(
            dimension_semantics=("parallel",),
            vmem_limit_bytes=32 * 1024 * 1024),
    )(*[_mxu(c) for c in comps], _mxu(wbd), bbd)
    return out.reshape(N, H2, W2, Cout)


def conv_blstm_fused(x_fwd, x_rev, params_fwd, params_rev, hid):
    # x_*: (B, Cin) rows (1x1 spatial).  One kernel for the whole fwd+rev stack.
    B, c0 = x_fwd.shape
    n_layers = len(params_fwd)

    def prep(layer_params):
        refs, cin = [], c0
        for (w, b) in layer_params:
            # centre tap, x-channel rows of the (3,3,cin+hid,4*hid) conv weight
            # (h rows multiply h0 == 0; off-centre taps read zero padding).
            wc = w[1, 1, :cin, :]
            wg = jnp.stack([wc[:, k * hid:(k + 1) * hid] for k in range(4)])
            bg = b.reshape(4, 1, hid)
            refs += [_mxu(wg), bg]
            cin = hid
        return refs

    args = [_mxu(x_fwd), _mxu(x_rev)] + prep(params_fwd) + prep(params_rev)
    # Whole-array VMEM blocks: B = n_node*P rows is tiny here.
    # TODO(synk): at large B add a row grid ("parallel") so v7x's 2nd TC is used.
    return pl.pallas_call(
        functools.partial(_blstm_stack_kernel, n_layers=n_layers, hid=hid),
        out_shape=jax.ShapeDtypeStruct((B, 2 * hid), jnp.float32),
        in_specs=[_VMEM] * len(args),
        out_specs=_VMEM,
    )(*args)


def gcn_tail(pos_features, conditions, A, params):
    n = pos_features.shape[0]
    pd = params['pos_mlp'][-1][0].shape[1]
    (w1, b1), (w1w, b1w) = params['gcn1'], params['gcn1_w']
    (w2, b2), (w2w, b2w) = params['gcn2'], params['gcn2_w']
    (wcls, bcls) = params['classifier']
    args = [_mxu(pos_features), _mxu(conditions), _mxu(A)]
    for (w, b) in params['pos_mlp']:
        args += [_mxu(w), b.reshape(1, -1)]
    args += [_mxu(w1[:pd]), _mxu(w1[pd:]), b1.reshape(1, -1),
             _mxu(w1w), b1w.reshape(1, -1),
             _mxu(w2[:pd]), _mxu(w2[pd:]), b2.reshape(1, -1),
             _mxu(w2w), b2w.reshape(1, -1),
             _mxu(wcls), bcls.reshape(1, -1)]
    return pl.pallas_call(
        _gcn_tail_kernel,
        out_shape=jax.ShapeDtypeStruct((n, wcls.shape[1]), jnp.float32),
        in_specs=[_VMEM] * len(args),
        out_specs=_VMEM,
    )(*args)


# ------------------------------ parameters -----------------------------------

def init_params(key, pos_feat_dim, cnn_feat_dim, mlp_hidden, lstm_hidden,
                out_features, gcn_features):
    keys = iter(jax.random.split(key, 64))

    def dense(i, o):
        return (jax.random.normal(next(keys), (i, o), jnp.float32) / jnp.sqrt(i),
                0.01 * jax.random.normal(next(keys), (o,), jnp.float32))

    def conv(cin, cout):
        return (jax.random.normal(next(keys), (3, 3, cin, cout), jnp.float32)
                / jnp.sqrt(9.0 * cin),
                0.01 * jax.random.normal(next(keys), (cout,), jnp.float32))

    p = {}
    p['pos_mlp'] = [dense(pos_feat_dim, mlp_hidden),
                    dense(mlp_hidden, mlp_hidden // 2),
                    dense(mlp_hidden // 2, mlp_hidden // 4),
                    dense(mlp_hidden // 4, mlp_hidden // 8)]
    p['pix'] = [conv(1, cnn_feat_dim),
                conv(cnn_feat_dim, cnn_feat_dim * 2),
                conv(cnn_feat_dim * 2, cnn_feat_dim * 4)]

    hid_half = lstm_hidden // 2
    in_ch = cnn_feat_dim * 4

    def lstm_stack():
        layers, cin = [], in_ch
        for _ in range(4):
            layers.append(conv(cin + hid_half, 4 * hid_half))
            cin = hid_half
        return layers

    p['blstm_fwd'] = lstm_stack()
    p['blstm_rev'] = lstm_stack()

    fused_dim = mlp_hidden // 8 + lstm_hidden
    p['gcn1'] = dense(fused_dim, gcn_features)
    p['gcn1_w'] = dense(gcn_features, mlp_hidden // 8)
    p['gcn2'] = dense(fused_dim, gcn_features)
    p['gcn2_w'] = dense(gcn_features, mlp_hidden // 8)
    p['classifier'] = dense(mlp_hidden // 8, out_features)
    return p


# ------------------------------ forward pass ----------------------------------

def gpr_gcn_forward(params, pos_features, im_patches_nchw, A,
                    splitter, n_node, lstm_hidden):
    # pix_encoder: 3 fused (Conv3x3 'same' + bias + MaxPool2d(2)) kernels
    im = jnp.transpose(im_patches_nchw, (0, 2, 3, 1))       # NCHW -> NHWC once
    for (w, b) in params['pix']:
        im = conv3x3_maxpool(im, w, b)
    P_total, Hs, Ws, C = im.shape

    # splitter uniform & contiguous -> a free reshape (no per-node python stack)
    P = splitter[0][1] - splitter[0][0]
    assert all(s1 - s0 == P for (s0, s1) in splitter), "non-uniform splitter"
    assert all(s0 == i * P for i, (s0, _) in enumerate(splitter)), \
        "non-contiguous splitter"
    # TODO(synk): non-uniform / non-contiguous splitter would need a gather path.
    assert P_total == n_node * P

    # TODO(synk): the fused ConvBLSTM kernel assumes the post-encoder spatial
    # map is 1x1 (true for patch=8, the only configuration under which the
    # reference module's Gconv in_features is dimensionally consistent).
    assert Hs == 1 and Ws == 1, "fused ConvBLSTM kernel assumes 1x1 spatial map"

    hid_half = lstm_hidden // 2
    node_im = im.reshape(n_node, P, C)
    node_rev = node_im[:, ::-1]   # torch.flip(dims=[0]) per node; no-op for P == 1
    B = n_node * P
    x_fwd = node_im.reshape(B, C)
    x_rev = node_rev.reshape(B, C)

    # ConvBLSTM: whole 4-layer fwd + rev stack in ONE kernel
    y = conv_blstm_fused(x_fwd, x_rev, params['blstm_fwd'], params['blstm_rev'],
                         hid_half)                            # (B, lstm_hidden)
    # per-node NCHW flatten of (P, lstm_hidden, 1, 1) == row-major reshape
    conditions = y.reshape(n_node, P * lstm_hidden)

    # dimensional consistency of the external Gconv in_features vs. conditions
    pd = params['pos_mlp'][-1][0].shape[1]
    assert conditions.shape[1] == params['gcn1'][0].shape[0] - pd, \
        "conditions width does not match Gconv in_features"

    # pos_encoder MLP + both GCN blocks + classifier in ONE kernel
    return gcn_tail(pos_features, conditions, A, params)


# ---------------------------------- main --------------------------------------

if __name__ == "__main__":
    pos_feat_dim, cnn_feat_dim = 4, 4
    mlp_hidden, lstm_hidden = 32, 16
    out_features, gcn_features = 4, 16
    n_node, patch = 6, 8

    key = jax.random.PRNGKey(0)
    kp, k1, k2, k3 = jax.random.split(key, 4)
    params = init_params(kp, pos_feat_dim, cnn_feat_dim, mlp_hidden,
                         lstm_hidden, out_features, gcn_features)

    pos_features = jax.random.normal(k1, (n_node, pos_feat_dim), jnp.float32)
    im_patches = jax.random.normal(k2, (n_node, 1, patch, patch), jnp.float32)  # NCHW
    splitter = tuple((i, i + 1) for i in range(n_node))   # one 8x8 patch per node
    A = jax.random.uniform(k3, (n_node, n_node), jnp.float32)

    fwd = jax.jit(functools.partial(gpr_gcn_forward, splitter=splitter,
                                    n_node=n_node, lstm_hidden=lstm_hidden))
    logits = fwd(params, pos_features, im_patches, A)
    jax.block_until_ready(logits)
    assert logits.shape == (n_node, out_features)
    assert bool(jnp.all(jnp.isfinite(logits)))
    print("KERNEL_OK")
</pallas_src>

<mosaic_0001>
module attributes {stable_mosaic.version = 11 : i64} {
  func.func @_conv_pool_kernel(%arg0: i32, %arg1: memref<1x5x5xf32, #tpu.memory_space<vmem>>, %arg2: memref<1x5x5xf32, #tpu.memory_space<vmem>>, %arg3: memref<1x5x5xf32, #tpu.memory_space<vmem>>, %arg4: memref<1x5x5xf32, #tpu.memory_space<vmem>>, %arg5: memref<9x4x16xf32, #tpu.memory_space<vmem>>, %arg6: memref<1x16xf32, #tpu.memory_space<vmem>>, %arg7: memref<1x4x16xf32, #tpu.memory_space<vmem>>) attributes {dimension_semantics = [#tpu.dimension_semantics<parallel>], iteration_bounds = array<i64: 6>, scalar_prefetch = 0 : i64, scratch_operands = 0 : i64, tpu.core_type = #tpu.core_type<tc>, window_params = [{transform_indices = @transform_0, window_bounds = array<i64: 1, 5, 5>}, {transform_indices = @transform_1, window_bounds = array<i64: 1, 5, 5>}, {transform_indices = @transform_2, window_bounds = array<i64: 1, 5, 5>}, {transform_indices = @transform_3, window_bounds = array<i64: 1, 5, 5>}, {pipeline_mode = #tpu.pipeline_mode<synchronous>, transform_indices = @transform_4, window_bounds = array<i64: 9, 4, 16>}, {pipeline_mode = #tpu.pipeline_mode<synchronous>, transform_indices = @transform_5, window_bounds = array<i64: 1, 16>}, {transform_indices = @transform_6, window_bounds = array<i64: 1, 4, 16>}]} {
    %c0 = arith.constant 0 : index
    %c0_0 = arith.constant 0 : index
    %c0_1 = arith.constant 0 : index
    %0 = vector.load %arg1[%c0, %c0_0, %c0_1] : memref<1x5x5xf32, #tpu.memory_space<vmem>>, vector<1x4x4xf32>
    %1 = vector.shape_cast %0 : vector<1x4x4xf32> to vector<4x4xf32>
    %c0_2 = arith.constant 0 : index
    %c0_3 = arith.constant 0 : index
    %c0_4 = arith.constant 0 : index
    %2 = vector.load %arg5[%c0_2, %c0_3, %c0_4] : memref<9x4x16xf32, #tpu.memory_space<vmem>>, vector<1x4x16xf32>
    %3 = vector.shape_cast %2 : vector<1x4x16xf32> to vector<4x16xf32>
    %cst = arith.constant dense<0.000000e+00> : vector<4x16xf32>
    %4 = tpu.matmul %1, %3, %cst {dimension_numbers = #tpu.dot_dimension_numbers<[1], [0], [0], [1], [0, 0, 1, 1], [], []>} : vector<4x4xf32>, vector<4x16xf32>, vector<4x16xf32> -> vector<4x16xf32>
    %c0_5 = arith.constant 0 : index
    %c0_6 = arith.constant 0 : index
    %c0_7 = arith.constant 0 : index
    %5 = vector.load %arg2[%c0_5, %c0_6, %c0_7] : memref<1x5x5xf32, #tpu.memory_space<vmem>>, vector<1x4x4xf32>
    %6 = vector.shape_cast %5 : vector<1x4x4xf32> to vector<4x4xf32>
    %c1 = arith.constant 1 : index
    %c0_8 = arith.constant 0 : index
    %c0_9 = arith.constant 0 : index
    %7 = vector.load %arg5[%c1, %c0_8, %c0_9] : memref<9x4x16xf32, #tpu.memory_space<vmem>>, vector<1x4x16xf32>
    %8 = vector.shape_cast %7 : vector<1x4x16xf32> to vector<4x16xf32>
    %cst_10 = arith.constant dense<0.000000e+00> : vector<4x16xf32>
    %9 = tpu.matmul %6, %8, %cst_10 {dimension_numbers = #tpu.dot_dimension_numbers<[1], [0], [0], [1], [0, 0, 1, 1], [], []>} : vector<4x4xf32>, vector<4x16xf32>, vector<4x16xf32> -> vector<4x16xf32>
    %10 = arith.addf %4, %9 : vector<4x16xf32>
    %c0_11 = arith.constant 0 : index
    %c0_12 = arith.constant 0 : index
    %c1_13 = arith.constant 1 : index
    %11 = vector.load %arg1[%c0_11, %c0_12, %c1_13] : memref<1x5x5xf32, #tpu.memory_space<vmem>>, vector<1x4x4xf32>
    %12 = vector.shape_cast %11 : vector<1x4x4xf32> to vector<4x4xf32>
    %c2 = arith.constant 2 : index
    %c0_14 = arith.constant 0 : index
    %c0_15 = arith.constant 0 : index
    %13 = vector.load %arg5[%c2, %c0_14, %c0_15] : memref<9x4x16xf32, #tpu.memory_space<vmem>>, vector<1x4x16xf32>
    %14 = vector.shape_cast %13 : vector<1x4x16xf32> to vector<4x16xf32>
    %cst_16 = arith.constant dense<0.000000e+00> : vector<4x16xf32>
    %15 = tpu.matmul %12, %14, %cst_16 {dimension_numbers = #tpu.dot_dimension_numbers<[1], [0], [0], [1], [0, 0, 1, 1], [], []>} : vector<4x4xf32>, vector<4x16xf32>, vector<4x16xf32> -> vector<4x16xf32>
    %16 = arith.addf %10, %15 : vector<4x16xf32>
    %c0_17 = arith.constant 0 : index
    %c0_18 = arith.constant 0 : index
    %c0_19 = arith.constant 0 : index
    %17 = vector.load %arg3[%c0_17, %c0_18, %c0_19] : memref<1x5x5xf32, #tpu.memory_space<vmem>>, vector<1x4x4xf32>
    %18 = vector.shape_cast %17 : vector<1x4x4xf32> to vector<4x4xf32>
    %c3 = arith.constant 3 : index
    %c0_20 = arith.constant 0 : index
    %c0_21 = arith.constant 0 : index
    %19 = vector.load %arg5[%c3, %c0_20, %c0_21] : memref<9x4x16xf32, #tpu.memory_space<vmem>>, vector<1x4x16xf32>
    %20 = vector.shape_cast %19 : vector<1x4x16xf32> to vector<4x16xf32>
    %cst_22 = arith.constant dense<0.000000e+00> : vector<4x16xf32>
    %21 = tpu.matmul %18, %20, %cst_22 {dimension_numbers = #tpu.dot_dimension_numbers<[1], [0], [0], [1], [0, 0, 1, 1], [], []>} : vector<4x4xf32>, vector<4x16xf32>, vector<4x16xf32> -> vector<4x16xf32>
    %22 = arith.addf %16, %21 : vector<4x16xf32>
    %c0_23 = arith.constant 0 : index
    %c0_24 = arith.constant 0 : index
    %c0_25 = arith.constant 0 : index
    %23 = vector.load %arg4[%c0_23, %c0_24, %c0_25] : memref<1x5x5xf32, #tpu.memory_space<vmem>>, vector<1x4x4xf32>
    %24 = vector.shape_cast %23 : vector<1x4x4xf32> to vector<4x4xf32>
    %c4 = arith.constant 4 : index
    %c0_26 = arith.constant 0 : index
    %c0_27 = arith.constant 0 : index
    %25 = vector.load %arg5[%c4, %c0_26, %c0_27] : memref<9x4x16xf32, #tpu.memory_space<vmem>>, vector<1x4x16xf32>
    %26 = vector.shape_cast %25 : vector<1x4x16xf32> to vector<4x16xf32>
    %cst_28 = arith.constant dense<0.000000e+00> : vector<4x16xf32>
    %27 = tpu.matmul %24, %26, %cst_28 {dimension_numbers = #tpu.dot_dimension_numbers<[1], [0], [0], [1], [0, 0, 1, 1], [], []>} : vector<4x4xf32>, vector<4x16xf32>, vector<4x16xf32> -> vector<4x16xf32>
    %28 = arith.addf %22, %27 : vector<4x16xf32>
    %c0_29 = arith.constant 0 : index
    %c0_30 = arith.constant 0 : index
    %c1_31 = arith.constant 1 : index
    %29 = vector.load %arg3[%c0_29, %c0_30, %c1_31] : memref<1x5x5xf32, #tpu.memory_space<vmem>>, vector<1x4x4xf32>
    %30 = vector.shape_cast %29 : vector<1x4x4xf32> to vector<4x4xf32>
    %c5 = arith.constant 5 : index
    %c0_32 = arith.constant 0 : index
    %c0_33 = arith.constant 0 : index
    %31 = vector.load %arg5[%c5, %c0_32, %c0_33] : memref<9x4x16xf32, #tpu.memory_space<vmem>>, vector<1x4x16xf32>
    %32 = vector.shape_cast %31 : vector<1x4x16xf32> to vector<4x16xf32>
    %cst_34 = arith.constant dense<0.000000e+00> : vector<4x16xf32>
    %33 = tpu.matmul %30, %32, %cst_34 {dimension_numbers = #tpu.dot_dimension_numbers<[1], [0], [0], [1], [0, 0, 1, 1], [], []>} : vector<4x4xf32>, vector<4x16xf32>, vector<4x16xf32> -> vector<4x16xf32>
    %34 = arith.addf %28, %33 : vector<4x16xf32>
    %c0_35 = arith.constant 0 : index
    %c1_36 = arith.constant 1 : index
    %c0_37 = arith.constant 0 : index
    %35 = vector.load %arg1[%c0_35, %c1_36, %c0_37] : memref<1x5x5xf32, #tpu.memory_space<vmem>>, vector<1x4x4xf32>
    %36 = vector.shape_cast %35 : vector<1x4x4xf32> to vector<4x4xf32>
    %c6 = arith.constant 6 : index
    %c0_38 = arith.constant 0 : index
    %c0_39 = arith.constant 0 : index
    %37 = vector.load %arg5[%c6, %c0_38, %c0_39] : memref<9x4x16xf32, #tpu.memory_space<vmem>>, vector<1x4x16xf32>
    %38 = vector.shape_cast %37 : vector<1x4x16xf32> to vector<4x16xf32>
    %cst_40 = arith.constant dense<0.000000e+00> : vector<4x16xf32>
    %39 = tpu.matmul %36, %38, %cst_40 {dimension_numbers = #tpu.dot_dimension_numbers<[1], [0], [0], [1], [0, 0, 1, 1], [], []>} : vector<4x4xf32>, vector<4x16xf32>, vector<4x16xf32> -> vector<4x16xf32>
    %40 = arith.addf %34, %39 : vector<4x16xf32>
    %c0_41 = arith.constant 0 : index
    %c1_42 = arith.constant 1 : index
    %c0_43 = arith.constant 0 : index
    %41 = vector.load %arg2[%c0_41, %c1_42, %c0_43] : memref<1x5x5xf32, #tpu.memory_space<vmem>>, vector<1x4x4xf32>
    %42 = vector.shape_cast %41 : vector<1x4x4xf32> to vector<4x4xf32>
    %c7 = arith.constant 7 : index
    %c0_44 = arith.constant 0 : index
    %c0_45 = arith.constant 0 : index
    %43 = vector.load %arg5[%c7, %c0_44, %c0_45] : memref<9x4x16xf32, #tpu.memory_space<vmem>>, vector<1x4x16xf32>
    %44 = vector.shape_cast %43 : vector<1x4x16xf32> to vector<4x16xf32>
    %cst_46 = arith.constant dense<0.000000e+00> : vector<4x16xf32>
    %45 = tpu.matmul %42, %44, %cst_46 {dimension_numbers = #tpu.dot_dimension_numbers<[1], [0], [0], [1], [0, 0, 1, 1], [], []>} : vector<4x4xf32>, vector<4x16xf32>, vector<4x16xf32> -> vector<4x16xf32>
    %46 = arith.addf %40, %45 : vector<4x16xf32>
    %c0_47 = arith.constant 0 : index
    %c1_48 = arith.constant 1 : index
    %c1_49 = arith.constant 1 : index
    %47 = vector.load %arg1[%c0_47, %c1_48, %c1_49] : memref<1x5x5xf32, #tpu.memory_space<vmem>>, vector<1x4x4xf32>
    %48 = vector.shape_cast %47 : vector<1x4x4xf32> to vector<4x4xf32>
    %c8 = arith.constant 8 : index
    %c0_50 = arith.constant 0 : index
    %c0_51 = arith.constant 0 : index
    %49 = vector.load %arg5[%c8, %c0_50, %c0_51] : memref<9x4x16xf32, #tpu.memory_space<vmem>>, vector<1x4x16xf32>
    %50 = vector.shape_cast %49 : vector<1x4x16xf32> to vector<4x16xf32>
    %cst_52 = arith.constant dense<0.000000e+00> : vector<4x16xf32>
    %51 = tpu.matmul %48, %50, %cst_52 {dimension_numbers = #tpu.dot_dimension_numbers<[1], [0], [0], [1], [0, 0, 1, 1], [], []>} : vector<4x4xf32>, vector<4x16xf32>, vector<4x16xf32> -> vector<4x16xf32>
    %52 = arith.addf %46, %51 : vector<4x16xf32>
    %c0_53 = arith.constant 0 : index
    %c0_54 = arith.constant 0 : index
    %c0_55 = arith.constant 0 : index
    %53 = vector.load %arg2[%c0_53, %c0_54, %c0_55] : memref<1x5x5xf32, #tpu.memory_space<vmem>>, vector<1x4x4xf32>
    %54 = vector.shape_cast %53 : vector<1x4x4xf32> to vector<4x4xf32>
    %c0_56 = arith.constant 0 : index
    %c0_57 = arith.constant 0 : index
    %c0_58 = arith.constant 0 : index
    %55 = vector.load %arg5[%c0_56, %c0_57, %c0_58] : memref<9x4x16xf32, #tpu.memory_space<vmem>>, vector<1x4x16xf32>
    %56 = vector.shape_cast %55 : vector<1x4x16xf32> to vector<4x16xf32>
    %cst_59 = arith.constant dense<0.000000e+00> : vector<4x16xf32>
    %57 = tpu.matmul %54, %56, %cst_59 {dimension_numbers = #tpu.dot_dimension_numbers<[1], [0], [0], [1], [0, 0, 1, 1], [], []>} : vector<4x4xf32>, vector<4x16xf32>, vector<4x16xf32> -> vector<4x16xf32>
    %c0_60 = arith.constant 0 : index
    %c0_61 = arith.constant 0 : index
    %c1_62 = arith.constant 1 : index
    %58 = vector.load %arg1[%c0_60, %c0_61, %c1_62] : memref<1x5x5xf32, #tpu.memory_space<vmem>>, vector<1x4x4xf32>
    %59 = vector.shape_cast %58 : vector<1x4x4xf32> to vector<4x4xf32>
    %c1_63 = arith.constant 1 : index
    %c0_64 = arith.constant 0 : index
    %c0_65 = arith.constant 0 : index
    %60 = vector.load %arg5[%c1_63, %c0_64, %c0_65] : memref<9x4x16xf32, #tpu.memory_space<vmem>>, vector<1x4x16xf32>
    %61 = vector.shape_cast %60 : vector<1x4x16xf32> to vector<4x16xf32>
    %cst_66 = arith.constant dense<0.000000e+00> : vector<4x16xf32>
    %62 = tpu.matmul %59, %61, %cst_66 {dimension_numbers = #tpu.dot_dimension_numbers<[1], [0], [0], [1], [0, 0, 1, 1], [], []>} : vector<4x4xf32>, vector<4x16xf32>, vector<4x16xf32> -> vector<4x16xf32>
    %63 = arith.addf %57, %62 : vector<4x16xf32>
    %c0_67 = arith.constant 0 : index
    %c0_68 = arith.constant 0 : index
    %c1_69 = arith.constant 1 : index
    %64 = vector.load %arg2[%c0_67, %c0_68, %c1_69] : memref<1x5x5xf32, #tpu.memory_space<vmem>>, vector<1x4x4xf32>
    %65 = vector.shape_cast %64 : vector<1x4x4xf32> to vector<4x4xf32>
    %c2_70 = arith.constant 2 : index
    %c0_71 = arith.constant 0 : index
    %c0_72 = arith.constant 0 : index
    %66 = vector.load %arg5[%c2_70, %c0_71, %c0_72] : memref<9x4x16xf32, #tpu.memory_space<vmem>>, vector<1x4x16xf32>
    %67 = vector.shape_cast %66 : vector<1x4x16xf32> to vector<4x16xf32>
    %cst_73 = arith.constant dense<0.000000e+00> : vector<4x16xf32>
    %68 = tpu.matmul %65, %67, %cst_73 {dimension_numbers = #tpu.dot_dimension_numbers<[1], [0], [0], [1], [0, 0, 1, 1], [], []>} : vector<4x4xf32>, vector<4x16xf32>, vector<4x16xf32> -> vector<4x16xf32>
    %69 = arith.addf %63, %68 : vector<4x16xf32>
    %c0_74 = arith.constant 0 : index
    %c0_75 = arith.constant 0 : index
    %c0_76 = arith.constant 0 : index
    %70 = vector.load %arg4[%c0_74, %c0_75, %c0_76] : memref<1x5x5xf32, #tpu.memory_space<vmem>>, vector<1x4x4xf32>
    %71 = vector.shape_cast %70 : vector<1x4x4xf32> to vector<4x4xf32>
    %c3_77 = arith.constant 3 : index
    %c0_78 = arith.constant 0 : index
    %c0_79 = arith.constant 0 : index
    %72 = vector.load %arg5[%c3_77, %c0_78, %c0_79] : memref<9x4x16xf32, #tpu.memory_space<vmem>>, vector<1x4x16xf32>
    %73 = vector.shape_cast %72 : vector<1x4x16xf32> to vector<4x16xf32>
    %cst_80 = arith.constant dense<0.000000e+00> : vector<4x16xf32>
    %74 = tpu.matmul %71, %73, %cst_80 {dimension_numbers = #tpu.dot_dimension_numbers<[1], [0], [0], [1], [0, 0, 1, 1], [], []>} : vector<4x4xf32>, vector<4x16xf32>, vector<4x16xf32> -> vector<4x16xf32>
    %75 = arith.addf %69, %74 : vector<4x16xf32>
    %c0_81 = arith.constant 0 : index
    %c0_82 = arith.constant 0 : index
    %c1_83 = arith.constant 1 : index
    %76 = vector.load %arg3[%c0_81, %c0_82, %c1_83] : memref<1x5x5xf32, #tpu.memory_space<vmem>>, vector<1x4x4xf32>
    %77 = vector.shape_cast %76 : vector<1x4x4xf32> to vector<4x4xf32>
    %c4_84 = arith.constant 4 : index
    %c0_85 = arith.constant 0 : index
    %c0_86 = arith.constant 0 : index
    %78 = vector.load %arg5[%c4_84, %c0_85, %c0_86] : memref<9x4x16xf32, #tpu.memory_space<vmem>>, vector<1x4x16xf32>
    %79 = vector.shape_cast %78 : vector<1x4x16xf32> to vector<4x16xf32>
    %cst_87 = arith.constant dense<0.000000e+00> : vector<4x16xf32>
    %80 = tpu.matmul %77, %79, %cst_87 {dimension_numbers = #tpu.dot_dimension_numbers<[1], [0], [0], [1], [0, 0, 1, 1], [], []>} : vector<4x4xf32>, vector<4x16xf32>, vector<4x16xf32> -> vector<4x16xf32>
    %81 = arith.addf %75, %80 : vector<4x16xf32>
    %c0_88 = arith.constant 0 : index
    %c0_89 = arith.constant 0 : index
    %c1_90 = arith.constant 1 : index
    %82 = vector.load %arg4[%c0_88, %c0_89, %c1_90] : memref<1x5x5xf32, #tpu.memory_space<vmem>>, vector<1x4x4xf32>
    %83 = vector.shape_cast %82 : vector<1x4x4xf32> to vector<4x4xf32>
    %c5_91 = arith.constant 5 : index
    %c0_92 = arith.constant 0 : index
    %c0_93 = arith.constant 0 : index
    %84 = vector.load %arg5[%c5_91, %c0_92, %c0_93] : memref<9x4x16xf32, #tpu.memory_space<vmem>>, vector<1x4x16xf32>
    %85 = vector.shape_cast %84 : vector<1x4x16xf32> to vector<4x16xf32>
    %cst_94 = arith.constant dense<0.000000e+00> : vector<4x16xf32>
    %86 = tpu.matmul %83, %85, %cst_94 {dimension_numbers = #tpu.dot_dimension_numbers<[1], [0], [0], [1], [0, 0, 1, 1], [], []>} : vector<4x4xf32>, vector<4x16xf32>, vector<4x16xf32> -> vector<4x16xf32>
    %87 = arith.addf %81, %86 : vector<4x16xf32>
    %c0_95 = arith.constant 0 : index
    %c1_96 = arith.constant 1 : index
    %c0_97 = arith.constant 0 : index
    %88 = vector.load %arg2[%c0_95, %c1_96, %c0_97] : memref<1x5x5xf32, #tpu.memory_space<vmem>>, vector<1x4x4xf32>
    %89 = vector.shape_cast %88 : vector<1x4x4xf32> to vector<4x4xf32>
    %c6_98 = arith.constant 6 : index
    %c0_99 = arith.constant 0 : index
    %c0_100 = arith.constant 0 : index
    %90 = vector.load %arg5[%c6_98, %c0_99, %c0_100] : memref<9x4x16xf32, #tpu.memory_space<vmem>>, vector<1x4x16xf32>
    %91 = vector.shape_cast %90 : vector<1x4x16xf32> to vector<4x16xf32>
    %cst_101 = arith.constant dense<0.000000e+00> : vector<4x16xf32>
    %92 = tpu.matmul %89, %91, %cst_101 {dimension_numbers = #tpu.dot_dimension_numbers<[1], [0], [0], [1], [0, 0, 1, 1], [], []>} : vector<4x4xf32>, vector<4x16xf32>, vector<4x16xf32> -> vector<4x16xf32>
    %93 = arith.addf %87, %92 : vector<4x16xf32>
    %c0_102 = arith.constant 0 : index
    %c1_103 = arith.constant 1 : index
    %c1_104 = arith.constant 1 : index
    %94 = vector.load %arg1[%c0_102, %c1_103, %c1_104] : memref<1x5x5xf32, #tpu.memory_space<vmem>>, vector<1x4x4xf32>
    %95 = vector.shape_cast %94 : vector<1x4x4xf32> to vector<4x4xf32>
    %c7_105 = arith.constant 7 : index
    %c0_106 = arith.constant 0 : index
    %c0_107 = arith.constant 0 : index
    %96 = vector.load %arg5[%c7_105, %c0_106, %c0_107] : memref<9x4x16xf32, #tpu.memory_space<vmem>>, vector<1x4x16xf32>
    %97 = vector.shape_cast %96 : vector<1x4x16xf32> to vector<4x16xf32>
    %cst_108 = arith.constant dense<0.000000e+00> : vector<4x16xf32>
    %98 = tpu.matmul %95, %97, %cst_108 {dimension_numbers = #tpu.dot_dimension_numbers<[1], [0], [0], [1], [0, 0, 1, 1], [], []>} : vector<4x4xf32>, vector<4x16xf32>, vector<4x16xf32> -> vector<4x16xf32>
    %99 = arith.addf %93, %98 : vector<4x16xf32>
    %c0_109 = arith.constant 0 : index
    %c1_110 = arith.constant 1 : index
    %c1_111 = arith.constant 1 : index
    %100 = vector.load %arg2[%c0_109, %c1_110, %c1_111] : memref<1x5x5xf32, #tpu.memory_space<vmem>>, vector<1x4x4xf32>
    %101 = vector.shape_cast %100 : vector<1x4x4xf32> to vector<4x4xf32>
    %c8_112 = arith.constant 8 : index
    %c0_113 = arith.constant 0 : index
    %c0_114 = arith.constant 0 : index
    %102 = vector.load %arg5[%c8_112, %c0_113, %c0_114] : memref<9x4x16xf32, #tpu.memory_space<vmem>>, vector<1x4x16xf32>
    %103 = vector.shape_cast %102 : vector<1x4x16xf32> to vector<4x16xf32>
    %cst_115 = arith.constant dense<0.000000e+00> : vector<4x16xf32>
    %104 = tpu.matmul %101, %103, %cst_115 {dimension_numbers = #tpu.dot_dimension_numbers<[1], [0], [0], [1], [0, 0, 1, 1], [], []>} : vector<4x4xf32>, vector<4x16xf32>, vector<4x16xf32> -> vector<4x16xf32>
    %105 = arith.addf %99, %104 : vector<4x16xf32>
    %106 = arith.maximumf %52, %105 : vector<4x16xf32>
    %c0_116 = arith.constant 0 : index
    %c0_117 = arith.constant 0 : index
    %c0_118 = arith.constant 0 : index
    %107 = vector.load %arg3[%c0_116, %c0_117, %c0_118] : memref<1x5x5xf32, #tpu.memory_space<vmem>>, vector<1x4x4xf32>
    %108 = vector.shape_cast %107 : vector<1x4x4xf32> to vector<4x4xf32>
    %c0_119 = arith.constant 0 : index
    %c0_120 = arith.constant 0 : index
    %c0_121 = arith.constant 0 : index
    %109 = vector.load %arg5[%c0_119, %c0_120, %c0_121] : memref<9x4x16xf32, #tpu.memory_space<vmem>>, vector<1x4x16xf32>
    %110 = vector.shape_cast %109 : vector<1x4x16xf32> to vector<4x16xf32>
    %cst_122 = arith.constant dense<0.000000e+00> : vector<4x16xf32>
    %111 = tpu.matmul %108, %110, %cst_122 {dimension_numbers = #tpu.dot_dimension_numbers<[1], [0], [0], [1], [0, 0, 1, 1], [], []>} : vector<4x4xf32>, vector<4x16xf32>, vector<4x16xf32> -> vector<4x16xf32>
    %c0_123 = arith.constant 0 : index
    %c0_124 = arith.constant 0 : index
    %c0_125 = arith.constant 0 : index
    %112 = vector.load %arg4[%c0_123, %c0_124, %c0_125] : memref<1x5x5xf32, #tpu.memory_space<vmem>>, vector<1x4x4xf32>
    %113 = vector.shape_cast %112 : vector<1x4x4xf32> to vector<4x4xf32>
    %c1_126 = arith.constant 1 : index
    %c0_127 = arith.constant 0 : index
    %c0_128 = arith.constant 0 : index
    %114 = vector.load %arg5[%c1_126, %c0_127, %c0_128] : memref<9x4x16xf32, #tpu.memory_space<vmem>>, vector<1x4x16xf32>
    %115 = vector.shape_cast %114 : vector<1x4x16xf32> to vector<4x16xf32>
    %cst_129 = arith.constant dense<0.000000e+00> : vector<4x16xf32>
    %116 = tpu.matmul %113, %115, %cst_129 {dimension_numbers = #tpu.dot_dimension_numbers<[1], [0], [0], [1], [0, 0, 1, 1], [], []>} : vector<4x4xf32>, vector<4x16xf32>, vector<4x16xf32> -> vector<4x16xf32>
    %117 = arith.addf %111, %116 : vector<4x16xf32>
    %c0_130 = arith.constant 0 : index
    %c0_131 = arith.constant 0 : index
    %c1_132 = arith.constant 1 : index
    %118 = vector.load %arg3[%c0_130, %c0_131, %c1_132] : memref<1x5x5xf32, #tpu.memory_space<vmem>>, vector<1x4x4xf32>
    %119 = vector.shape_cast %118 : vector<1x4x4xf32> to vector<4x4xf32>
    %c2_133 = arith.constant 2 : index
    %c0_134 = arith.constant 0 : index
    %c0_135 = arith.constant 0 : index
    %120 = vector.load %arg5[%c2_133, %c0_134, %c0_135] : memref<9x4x16xf32, #tpu.memory_space<vmem>>, vector<1x4x16xf32>
    %121 = vector.shape_cast %120 : vector<1x4x16xf32> to vector<4x16xf32>
    %cst_136 = arith.constant dense<0.000000e+00> : vector<4x16xf32>
    %122 = tpu.matmul %119, %121, %cst_136 {dimension_numbers = #tpu.dot_dimension_numbers<[1], [0], [0], [1], [0, 0, 1, 1], [], []>} : vector<4x4xf32>, vector<4x16xf32>, vector<4x16xf32> -> vector<4x16xf32>
    %123 = arith.addf %117, %122 : vector<4x16xf32>
    %c0_137 = arith.constant 0 : index
    %c1_138 = arith.constant 1 : index
    %c0_139 = arith.constant 0 : index
    %124 = vector.load %arg1[%c0_137, %c1_138, %c0_139] : memref<1x5x5xf32, #tpu.memory_space<vmem>>, vector<1x4x4xf32>
    %125 = vector.shape_cast %124 : vector<1x4x4xf32> to vector<4x4xf32>
    %c3_140 = arith.constant 3 : index
    %c0_141 = arith.constant 0 : index
    %c0_142 = arith.constant 0 : index
    %126 = vector.load %arg5[%c3_140, %c0_141, %c0_142] : memref<9x4x16xf32, #tpu.memory_space<vmem>>, vector<1x4x16xf32>
    %127 = vector.shape_cast %126 : vector<1x4x16xf32> to vector<4x16xf32>
    %cst_143 = arith.constant dense<0.000000e+00> : vector<4x16xf32>
    %128 = tpu.matmul %125, %127, %cst_143 {dimension_numbers = #tpu.dot_dimension_numbers<[1], [0], [0], [1], [0, 0, 1, 1], [], []>} : vector<4x4xf32>, vector<4x16xf32>, vector<4x16xf32> -> vector<4x16xf32>
    %129 = arith.addf %123, %128 : vector<4x16xf32>
    %c0_144 = arith.constant 0 : index
    %c1_145 = arith.constant 1 : index
    %c0_146 = arith.constant 0 : index
    %130 = vector.load %arg2[%c0_144, %c1_145, %c0_146] : memref<1x5x5xf32, #tpu.memory_space<vmem>>, vector<1x4x4xf32>
    %131 = vector.shape_cast %130 : vector<1x4x4xf32> to vector<4x4xf32>
    %c4_147 = arith.constant 4 : index
    %c0_148 = arith.constant 0 : index
    %c0_149 = arith.constant 0 : index
    %132 = vector.load %arg5[%c4_147, %c0_148, %c0_149] : memref<9x4x16xf32, #tpu.memory_space<vmem>>, vector<1x4x16xf32>
    %133 = vector.shape_cast %132 : vector<1x4x16xf32> to vector<4x16xf32>
    %cst_150 = arith.constant dense<0.000000e+00> : vector<4x16xf32>
    %134 = tpu.matmul %131, %133, %cst_150 {dimension_numbers = #tpu.dot_dimension_numbers<[1], [0], [0], [1], [0, 0, 1, 1], [], []>} : vector<4x4xf32>, vector<4x16xf32>, vector<4x16xf32> -> vector<4x16xf32>
    %135 = arith.addf %129, %134 : vector<4x16xf32>
    %c0_151 = arith.constant 0 : index
    %c1_152 = arith.constant 1 : index
    %c1_153 = arith.constant 1 : index
    %136 = vector.load %arg1[%c0_151, %c1_152, %c1_153] : memref<1x5x5xf32, #tpu.memory_space<vmem>>, vector<1x4x4xf32>
    %137 = vector.shape_cast %136 : vector<1x4x4xf32> to vector<4x4xf32>
    %c5_154 = arith.constant 5 : index
    %c0_155 = arith.constant 0 : index
    %c0_156 = arith.constant 0 : index
    %138 = vector.load %arg5[%c5_154, %c0_155, %c0_156] : memref<9x4x16xf32, #tpu.memory_space<vmem>>, vector<1x4x16xf32>
    %139 = vector.shape_cast %138 : vector<1x4x16xf32> to vector<4x16xf32>
    %cst_157 = arith.constant dense<0.000000e+00> : vector<4x16xf32>
    %140 = tpu.matmul %137, %139, %cst_157 {dimension_numbers = #tpu.dot_dimension_numbers<[1], [0], [0], [1], [0, 0, 1, 1], [], []>} : vector<4x4xf32>, vector<4x16xf32>, vector<4x16xf32> -> vector<4x16xf32>
    %141 = arith.addf %135, %140 : vector<4x16xf32>
    %c0_158 = arith.constant 0 : index
    %c1_159 = arith.constant 1 : index
    %c0_160 = arith.constant 0 : index
    %142 = vector.load %arg3[%c0_158, %c1_159, %c0_160] : memref<1x5x5xf32, #tpu.memory_space<vmem>>, vector<1x4x4xf32>
    %143 = vector.shape_cast %142 : vector<1x4x4xf32> to vector<4x4xf32>
    %c6_161 = arith.constant 6 : index
    %c0_162 = arith.constant 0 : index
    %c0_163 = arith.constant 0 : index
    %144 = vector.load %arg5[%c6_161, %c0_162, %c0_163] : memref<9x4x16xf32, #tpu.memory_space<vmem>>, vector<1x4x16xf32>
    %145 = vector.shape_cast %144 : vector<1x4x16xf32> to vector<4x16xf32>
    %cst_164 = arith.constant dense<0.000000e+00> : vector<4x16xf32>
    %146 = tpu.matmul %143, %145, %cst_164 {dimension_numbers = #tpu.dot_dimension_numbers<[1], [0], [0], [1], [0, 0, 1, 1], [], []>} : vector<4x4xf32>, vector<4x16xf32>, vector<4x16xf32> -> vector<4x16xf32>
    %147 = arith.addf %141, %146 : vector<4x16xf32>
    %c0_165 = arith.constant 0 : index
    %c1_166 = arith.constant 1 : index
    %c0_167 = arith.constant 0 : index
    %148 = vector.load %arg4[%c0_165, %c1_166, %c0_167] : memref<1x5x5xf32, #tpu.memory_space<vmem>>, vector<1x4x4xf32>
    %149 = vector.shape_cast %148 : vector<1x4x4xf32> to vector<4x4xf32>
    %c7_168 = arith.constant 7 : index
    %c0_169 = arith.constant 0 : index
    %c0_170 = arith.constant 0 : index
    %150 = vector.load %arg5[%c7_168, %c0_169, %c0_170] : memref<9x4x16xf32, #tpu.memory_space<vmem>>, vector<1x4x16xf32>
    %151 = vector.shape_cast %150 : vector<1x4x16xf32> to vector<4x16xf32>
    %cst_171 = arith.constant dense<0.000000e+00> : vector<4x16xf32>
    %152 = tpu.matmul %149, %151, %cst_171 {dimension_numbers = #tpu.dot_dimension_numbers<[1], [0], [0], [1], [0, 0, 1, 1], [], []>} : vector<4x4xf32>, vector<4x16xf32>, vector<4x16xf32> -> vector<4x16xf32>
    %153 = arith.addf %147, %152 : vector<4x16xf32>
    %c0_172 = arith.constant 0 : index
    %c1_173 = arith.constant 1 : index
    %c1_174 = arith.constant 1 : index
    %154 = vector.load %arg3[%c0_172, %c1_173, %c1_174] : memref<1x5x5xf32, #tpu.memory_space<vmem>>, vector<1x4x4xf32>
    %155 = vector.shape_cast %154 : vector<1x4x4xf32> to vector<4x4xf32>
    %c8_175 = arith.constant 8 : index
    %c0_176 = arith.constant 0 : index
    %c0_177 = arith.constant 0 : index
    %156 = vector.load %arg5[%c8_175, %c0_176, %c0_177] : memref<9x4x16xf32, #tpu.memory_space<vmem>>, vector<1x4x16xf32>
    %157 = vector.shape_cast %156 : vector<1x4x16xf32> to vector<4x16xf32>
    %cst_178 = arith.constant dense<0.000000e+00> : vector<4x16xf32>
    %158 = tpu.matmul %155, %157, %cst_178 {dimension_numbers = #tpu.dot_dimension_numbers<[1], [0], [0], [1], [0, 0, 1, 1], [], []>} : vector<4x4xf32>, vector<4x16xf32>, vector<4x16xf32> -> vector<4x16xf32>
    %159 = arith.addf %153, %158 : vector<4x16xf32>
    %160 = arith.maximumf %106, %159 : vector<4x16xf32>
    %c0_179 = arith.constant 0 : index
    %c0_180 = arith.constant 0 : index
    %c0_181 = arith.constant 0 : index
    %161 = vector.load %arg4[%c0_179, %c0_180, %c0_181] : memref<1x5x5xf32, #tpu.memory_space<vmem>>, vector<1x4x4xf32>
    %162 = vector.shape_cast %161 : vector<1x4x4xf32> to vector<4x4xf32>
    %c0_182 = arith.constant 0 : index
    %c0_183 = arith.constant 0 : index
    %c0_184 = arith.constant 0 : index
    %163 = vector.load %arg5[%c0_182, %c0_183, %c0_184] : memref<9x4x16xf32, #tpu.memory_space<vmem>>, vector<1x4x16xf32>
    %164 = vector.shape_cast %163 : vector<1x4x16xf32> to vector<4x16xf32>
    %cst_185 = arith.constant dense<0.000000e+00> : vector<4x16xf32>
    %165 = tpu.matmul %162, %164, %cst_185 {dimension_numbers = #tpu.dot_dimension_numbers<[1], [0], [0], [1], [0, 0, 1, 1], [], []>} : vector<4x4xf32>, vector<4x16xf32>, vector<4x16xf32> -> vector<4x16xf32>
    %c0_186 = arith.constant 0 : index
    %c0_187 = arith.constant 0 : index
    %c1_188 = arith.constant 1 : index
    %166 = vector.load %arg3[%c0_186, %c0_187, %c1_188] : memref<1x5x5xf32, #tpu.memory_space<vmem>>, vector<1x4x4xf32>
    %167 = vector.shape_cast %166 : vector<1x4x4xf32> to vector<4x4xf32>
    %c1_189 = arith.constant 1 : index
    %c0_190 = arith.constant 0 : index
    %c0_191 = arith.constant 0 : index
    %168 = vector.load %arg5[%c1_189, %c0_190, %c0_191] : memref<9x4x16xf32, #tpu.memory_space<vmem>>, vector<1x4x16xf32>
    %169 = vector.shape_cast %168 : vector<1x4x16xf32> to vector<4x16xf32>
    %cst_192 = arith.constant dense<0.000000e+00> : vector<4x16xf32>
    %170 = tpu.matmul %167, %169, %cst_192 {dimension_numbers = #tpu.dot_dimension_numbers<[1], [0], [0], [1], [0, 0, 1, 1], [], []>} : vector<4x4xf32>, vector<4x16xf32>, vector<4x16xf32> -> vector<4x16xf32>
    %171 = arith.addf %165, %170 : vector<4x16xf32>
    %c0_193 = arith.constant 0 : index
    %c0_194 = arith.constant 0 : index
    %c1_195 = arith.constant 1 : index
    %172 = vector.load %arg4[%c0_193, %c0_194, %c1_195] : memref<1x5x5xf32, #tpu.memory_space<vmem>>, vector<1x4x4xf32>
    %173 = vector.shape_cast %172 : vector<1x4x4xf32> to vector<4x4xf32>
    %c2_196 = arith.constant 2 : index
    %c0_197 = arith.constant 0 : index
    %c0_198 = arith.constant 0 : index
    %174 = vector.load %arg5[%c2_196, %c0_197, %c0_198] : memref<9x4x16xf32, #tpu.memory_space<vmem>>, vector<1x4x16xf32>
    %175 = vector.shape_cast %174 : vector<1x4x16xf32> to vector<4x16xf32>
    %cst_199 = arith.constant dense<0.000000e+00> : vector<4x16xf32>
    %176 = tpu.matmul %173, %175, %cst_199 {dimension_numbers = #tpu.dot_dimension_numbers<[1], [0], [0], [1], [0, 0, 1, 1], [], []>} : vector<4x4xf32>, vector<4x16xf32>, vector<4x16xf32> -> vector<4x16xf32>
    %177 = arith.addf %171, %176 : vector<4x16xf32>
    %c0_200 = arith.constant 0 : index
    %c1_201 = arith.constant 1 : index
    %c0_202 = arith.constant 0 : index
    %178 = vector.load %arg2[%c0_200, %c1_201, %c0_202] : memref<1x5x5xf32, #tpu.memory_space<vmem>>, vector<1x4x4xf32>
    %179 = vector.shape_cast %178 : vector<1x4x4xf32> to vector<4x4xf32>
    %c3_203 = arith.constant 3 : index
    %c0_204 = arith.constant 0 : index
    %c0_205 = arith.constant 0 : index
    %180 = vector.load %arg5[%c3_203, %c0_204, %c0_205] : memref<9x4x16xf32, #tpu.memory_space<vmem>>, vector<1x4x16xf32>
    %181 = vector.shape_cast %180 : vector<1x4x16xf32> to vector<4x16xf32>
    %cst_206 = arith.constant dense<0.000000e+00> : vector<4x16xf32>
    %182 = tpu.matmul %179, %181, %cst_206 {dimension_numbers = #tpu.dot_dimension_numbers<[1], [0], [0], [1], [0, 0, 1, 1], [], []>} : vector<4x4xf32>, vector<4x16xf32>, vector<4x16xf32> -> vector<4x16xf32>
    %183 = arith.addf %177, %182 : vector<4x16xf32>
    %c0_207 = arith.constant 0 : index
    %c1_208 = arith.constant 1 : index
    %c1_209 = arith.constant 1 : index
    %184 = vector.load %arg1[%c0_207, %c1_208, %c1_209] : memref<1x5x5xf32, #tpu.memory_space<vmem>>, vector<1x4x4xf32>
    %185 = vector.shape_cast %184 : vector<1x4x4xf32> to vector<4x4xf32>
    %c4_210 = arith.constant 4 : index
    %c0_211 = arith.constant 0 : index
    %c0_212 = arith.constant 0 : index
    %186 = vector.load %arg5[%c4_210, %c0_211, %c0_212] : memref<9x4x16xf32, #tpu.memory_space<vmem>>, vector<1x4x16xf32>
    %187 = vector.shape_cast %186 : vector<1x4x16xf32> to vector<4x16xf32>
    %cst_213 = arith.constant dense<0.000000e+00> : vector<4x16xf32>
    %188 = tpu.matmul %185, %187, %cst_213 {dimension_numbers = #tpu.dot_dimension_numbers<[1], [0], [0], [1], [0, 0, 1, 1], [], []>} : vector<4x4xf32>, vector<4x16xf32>, vector<4x16xf32> -> vector<4x16xf32>
    %189 = arith.addf %183, %188 : vector<4x16xf32>
    %c0_214 = arith.constant 0 : index
    %c1_215 = arith.constant 1 : index
    %c1_216 = arith.constant 1 : index
    %190 = vector.load %arg2[%c0_214, %c1_215, %c1_216] : memref<1x5x5xf32, #tpu.memory_space<vmem>>, vector<1x4x4xf32>
    %191 = vector.shape_cast %190 : vector<1x4x4xf32> to vector<4x4xf32>
    %c5_217 = arith.constant 5 : index
    %c0_218 = arith.constant 0 : index
    %c0_219 = arith.constant 0 : index
    %192 = vector.load %arg5[%c5_217, %c0_218, %c0_219] : memref<9x4x16xf32, #tpu.memory_space<vmem>>, vector<1x4x16xf32>
    %193 = vector.shape_cast %192 : vector<1x4x16xf32> to vector<4x16xf32>
    %cst_220 = arith.constant dense<0.000000e+00> : vector<4x16xf32>
    %194 = tpu.matmul %191, %193, %cst_220 {dimension_numbers = #tpu.dot_dimension_numbers<[1], [0], [0], [1], [0, 0, 1, 1], [], []>} : vector<4x4xf32>, vector<4x16xf32>, vector<4x16xf32> -> vector<4x16xf32>
    %195 = arith.addf %189, %194 : vector<4x16xf32>
    %c0_221 = arith.constant 0 : index
    %c1_222 = arith.constant 1 : index
    %c0_223 = arith.constant 0 : index
    %196 = vector.load %arg4[%c0_221, %c1_222, %c0_223] : memref<1x5x5xf32, #tpu.memory_space<vmem>>, vector<1x4x4xf32>
    %197 = vector.shape_cast %196 : vector<1x4x4xf32> to vector<4x4xf32>
    %c6_224 = arith.constant 6 : index
    %c0_225 = arith.constant 0 : index
    %c0_226 = arith.constant 0 : index
    %198 = vector.load %arg5[%c6_224, %c0_225, %c0_226] : memref<9x4x16xf32, #tpu.memory_space<vmem>>, vector<1x4x16xf32>
    %199 = vector.shape_cast %198 : vector<1x4x16xf32> to vector<4x16xf32>
    %cst_227 = arith.constant dense<0.000000e+00> : vector<4x16xf32>
    %200 = tpu.matmul %197, %199, %cst_227 {dimension_numbers = #tpu.dot_dimension_numbers<[1], [0], [0], [1], [0, 0, 1, 1], [], []>} : vector<4x4xf32>, vector<4x16xf32>, vector<4x16xf32> -> vector<4x16xf32>
    %201 = arith.addf %195, %200 : vector<4x16xf32>
    %c0_228 = arith.constant 0 : index
    %c1_229 = arith.constant 1 : index
    %c1_230 = arith.constant 1 : index
    %202 = vector.load %arg3[%c0_228, %c1_229, %c1_230] : memref<1x5x5xf32, #tpu.memory_space<vmem>>, vector<1x4x4xf32>
    %203 = vector.shape_cast %202 : vector<1x4x4xf32> to vector<4x4xf32>
    %c7_231 = arith.constant 7 : index
    %c0_232 = arith.constant 0 : index
    %c0_233 = arith.constant 0 : index
    %204 = vector.load %arg5[%c7_231, %c0_232, %c0_233] : memref<9x4x16xf32, #tpu.memory_space<vmem>>, vector<1x4x16xf32>
    %205 = vector.shape_cast %204 : vector<1x4x16xf32> to vector<4x16xf32>
    %cst_234 = arith.constant dense<0.000000e+00> : vector<4x16xf32>
    %206 = tpu.matmul %203, %205, %cst_234 {dimension_numbers = #tpu.dot_dimension_numbers<[1], [0], [0], [1], [0, 0, 1, 1], [], []>} : vector<4x4xf32>, vector<4x16xf32>, vector<4x16xf32> -> vector<4x16xf32>
    %207 = arith.addf %201, %206 : vector<4x16xf32>
    %c0_235 = arith.constant 0 : index
    %c1_236 = arith.constant 1 : index
    %c1_237 = arith.constant 1 : index
    %208 = vector.load %arg4[%c0_235, %c1_236, %c1_237] : memref<1x5x5xf32, #tpu.memory_space<vmem>>, vector<1x4x4xf32>
    %209 = vector.shape_cast %208 : vector<1x4x4xf32> to vector<4x4xf32>
    %c8_238 = arith.constant 8 : index
    %c0_239 = arith.constant 0 : index
    %c0_240 = arith.constant 0 : index
    %210 = vector.load %arg5[%c8_238, %c0_239, %c0_240] : memref<9x4x16xf32, #tpu.memory_space<vmem>>, vector<1x4x16xf32>
    %211 = vector.shape_cast %210 : vector<1x4x16xf32> to vector<4x16xf32>
    %cst_241 = arith.constant dense<0.000000e+00> : vector<4x16xf32>
    %212 = tpu.matmul %209, %211, %cst_241 {dimension_numbers = #tpu.dot_dimension_numbers<[1], [0], [0], [1], [0, 0, 1, 1], [], []>} : vector<4x4xf32>, vector<4x16xf32>, vector<4x16xf32> -> vector<4x16xf32>
    %213 = arith.addf %207, %212 : vector<4x16xf32>
    %214 = arith.maximumf %160, %213 : vector<4x16xf32>
    %c0_242 = arith.constant 0 : index
    %c0_243 = arith.constant 0 : index
    %215 = vector.load %arg6[%c0_242, %c0_243] : memref<1x16xf32, #tpu.memory_space<vmem>>, vector<1x16xf32>
    %216 = vector.broadcast %215 : vector<1x16xf32> to vector<4x16xf32>
    %217 = arith.addf %214, %216 : vector<4x16xf32>
    %c0_244 = arith.constant 0 : index
    %c0_245 = arith.constant 0 : index
    %c0_246 = arith.constant 0 : index
    %218 = vector.load %arg7[%c0_244, %c0_245, %c0_246] : memref<1x4x16xf32, #tpu.memory_space<vmem>>, vector<1x4x16xf32>
    %219 = vector.shape_cast %218 : vector<1x4x16xf32> to vector<4x16xf32>
    %220 = vector.shape_cast %217 : vector<4x16xf32> to vector<1x4x16xf32>
    tpu.vector_store %arg7[%c0_244, %c0_245, %c0_246], %220 {strides = array<i32>} : memref<1x4x16xf32, #tpu.memory_space<vmem>>, vector<1x4x16xf32>,
    return
  }
  func.func @transform_0(%arg0: i32) -> (i32, i32, i32) {
    %c0_i32 = arith.constant 0 : i32
    %c0_i32_0 = arith.constant 0 : i32
    %c0_i32_1 = arith.constant 0 : i32
    return %arg0, %c0_i32, %c0_i32_0 : i32, i32, i32
  }
  func.func @transform_1(%arg0: i32) -> (i32, i32, i32) {
    %c0_i32 = arith.constant 0 : i32
    %c0_i32_0 = arith.constant 0 : i32
    %c0_i32_1 = arith.constant 0 : i32
    return %arg0, %c0_i32, %c0_i32_0 : i32, i32, i32
  }
  func.func @transform_2(%arg0: i32) -> (i32, i32, i32) {
    %c0_i32 = arith.constant 0 : i32
    %c0_i32_0 = arith.constant 0 : i32
    %c0_i32_1 = arith.constant 0 : i32
    return %arg0, %c0_i32, %c0_i32_0 : i32, i32, i32
  }
  func.func @transform_3(%arg0: i32) -> (i32, i32, i32) {
    %c0_i32 = arith.constant 0 : i32
    %c0_i32_0 = arith.constant 0 : i32
    %c0_i32_1 = arith.constant 0 : i32
    return %arg0, %c0_i32, %c0_i32_0 : i32, i32, i32
  }
  func.func @transform_4(%arg0: i32) -> (i32, i32, i32) {
    %c0_i32 = arith.constant 0 : i32
    %c0_i32_0 = arith.constant 0 : i32
    %c0_i32_1 = arith.constant 0 : i32
    %c0_i32_2 = arith.constant 0 : i32
    return %c0_i32, %c0_i32_0, %c0_i32_1 : i32, i32, i32
  }
  func.func @transform_5(%arg0: i32) -> (i32, i32) {
    %c0_i32 = arith.constant 0 : i32
    %c0_i32_0 = arith.constant 0 : i32
    %c0_i32_1 = arith.constant 0 : i32
    return %c0_i32, %c0_i32_0 : i32, i32
  }
  func.func @transform_6(%arg0: i32) -> (i32, i32, i32) {
    %c0_i32 = arith.constant 0 : i32
    %c0_i32_0 = arith.constant 0 : i32
    %c0_i32_1 = arith.constant 0 : i32
    return %arg0, %c0_i32, %c0_i32_0 : i32, i32, i32
  }
}

module attributes {stable_mosaic.version = 11 : i64} {
  func.func @_conv_pool_kernel(%arg0: i32, %arg1: memref<1x3x12xf32, #tpu.memory_space<vmem>>, %arg2: memref<1x3x12xf32, #tpu.memory_space<vmem>>, %arg3: memref<1x3x12xf32, #tpu.memory_space<vmem>>, %arg4: memref<1x3x12xf32, #tpu.memory_space<vmem>>, %arg5: memref<9x8x16xf32, #tpu.memory_space<vmem>>, %arg6: memref<1x16xf32, #tpu.memory_space<vmem>>, %arg7: memref<1x2x16xf32, #tpu.memory_space<vmem>>) attributes {dimension_semantics = [#tpu.dimension_semantics<parallel>], iteration_bounds = array<i64: 6>, scalar_prefetch = 0 : i64, scratch_operands = 0 : i64, tpu.core_type = #tpu.core_type<tc>, window_params = [{transform_indices = @transform_0, window_bounds = array<i64: 1, 3, 12>}, {transform_indices = @transform_1, window_bounds = array<i64: 1, 3, 12>}, {transform_indices = @transform_2, window_bounds = array<i64: 1, 3, 12>}, {transform_indices = @transform_3, window_bounds = array<i64: 1, 3, 12>}, {pipeline_mode = #tpu.pipeline_mode<synchronous>, transform_indices = @transform_4, window_bounds = array<i64: 9, 8, 16>}, {pipeline_mode = #tpu.pipeline_mode<synchronous>, transform_indices = @transform_5, window_bounds = array<i64: 1, 16>}, {transform_indices = @transform_6, window_bounds = array<i64: 1, 2, 16>}]} {
    %c0 = arith.constant 0 : index
    %c0_0 = arith.constant 0 : index
    %c0_1 = arith.constant 0 : index
    %0 = vector.load %arg1[%c0, %c0_0, %c0_1] : memref<1x3x12xf32, #tpu.memory_space<vmem>>, vector<1x2x8xf32>
    %1 = vector.shape_cast %0 : vector<1x2x8xf32> to vector<2x8xf32>
    %c0_2 = arith.constant 0 : index
    %c0_3 = arith.constant 0 : index
    %c0_4 = arith.constant 0 : index
    %2 = vector.load %arg5[%c0_2, %c0_3, %c0_4] : memref<9x8x16xf32, #tpu.memory_space<vmem>>, vector<1x8x16xf32>
    %3 = vector.shape_cast %2 : vector<1x8x16xf32> to vector<8x16xf32>
    %cst = arith.constant dense<0.000000e+00> : vector<2x16xf32>
    %4 = tpu.matmul %1, %3, %cst {dimension_numbers = #tpu.dot_dimension_numbers<[1], [0], [0], [1], [0, 0, 1, 1], [], []>} : vector<2x8xf32>, vector<8x16xf32>, vector<2x16xf32> -> vector<2x16xf32>
    %c0_5 = arith.constant 0 : index
    %c0_6 = arith.constant 0 : index
    %c0_7 = arith.constant 0 : index
    %5 = vector.load %arg2[%c0_5, %c0_6, %c0_7] : memref<1x3x12xf32, #tpu.memory_space<vmem>>, vector<1x2x8xf32>
    %6 = vector.shape_cast %5 : vector<1x2x8xf32> to vector<2x8xf32>
    %c1 = arith.constant 1 : index
    %c0_8 = arith.constant 0 : index
    %c0_9 = arith.constant 0 : index
    %7 = vector.load %arg5[%c1, %c0_8, %c0_9] : memref<9x8x16xf32, #tpu.memory_space<vmem>>, vector<1x8x16xf32>
    %8 = vector.shape_cast %7 : vector<1x8x16xf32> to vector<8x16xf32>
    %cst_10 = arith.constant dense<0.000000e+00> : vector<2x16xf32>
    %9 = tpu.matmul %6, %8, %cst_10 {dimension_numbers = #tpu.dot_dimension_numbers<[1], [0], [0], [1], [0, 0, 1, 1], [], []>} : vector<2x8xf32>, vector<8x16xf32>, vector<2x16xf32> -> vector<2x16xf32>
    %10 = arith.addf %4, %9 : vector<2x16xf32>
    %c0_11 = arith.constant 0 : index
    %c0_12 = arith.constant 0 : index
    %c4 = arith.constant 4 : index
    %11 = vector.load %arg1[%c0_11, %c0_12, %c4] : memref<1x3x12xf32, #tpu.memory_space<vmem>>, vector<1x2x8xf32>
    %12 = vector.shape_cast %11 : vector<1x2x8xf32> to vector<2x8xf32>
    %c2 = arith.constant 2 : index
    %c0_13 = arith.constant 0 : index
    %c0_14 = arith.constant 0 : index
    %13 = vector.load %arg5[%c2, %c0_13, %c0_14] : memref<9x8x16xf32, #tpu.memory_space<vmem>>, vector<1x8x16xf32>
    %14 = vector.shape_cast %13 : vector<1x8x16xf32> to vector<8x16xf32>
    %cst_15 = arith.constant dense<0.000000e+00> : vector<2x16xf32>
    %15 = tpu.matmul %12, %14, %cst_15 {dimension_numbers = #tpu.dot_dimension_numbers<[1], [0], [0], [1], [0, 0, 1, 1], [], []>} : vector<2x8xf32>, vector<8x16xf32>, vector<2x16xf32> -> vector<2x16xf32>
    %16 = arith.addf %10, %15 : vector<2x16xf32>
    %c0_16 = arith.constant 0 : index
    %c0_17 = arith.constant 0 : index
    %c0_18 = arith.constant 0 : index
    %17 = vector.load %arg3[%c0_16, %c0_17, %c0_18] : memref<1x3x12xf32, #tpu.memory_space<vmem>>, vector<1x2x8xf32>
    %18 = vector.shape_cast %17 : vector<1x2x8xf32> to vector<2x8xf32>
    %c3 = arith.constant 3 : index
    %c0_19 = arith.constant 0 : index
    %c0_20 = arith.constant 0 : index
    %19 = vector.load %arg5[%c3, %c0_19, %c0_20] : memref<9x8x16xf32, #tpu.memory_space<vmem>>, vector<1x8x16xf32>
    %20 = vector.shape_cast %19 : vector<1x8x16xf32> to vector<8x16xf32>
    %cst_21 = arith.constant dense<0.000000e+00> : vector<2x16xf32>
    %21 = tpu.matmul %18, %20, %cst_21 {dimension_numbers = #tpu.dot_dimension_numbers<[1], [0], [0], [1], [0, 0, 1, 1], [], []>} : vector<2x8xf32>, vector<8x16xf32>, vector<2x16xf32> -> vector<2x16xf32>
    %22 = arith.addf %16, %21 : vector<2x16xf32>
    %c0_22 = arith.constant 0 : index
    %c0_23 = arith.constant 0 : index
    %c0_24 = arith.constant 0 : index
    %23 = vector.load %arg4[%c0_22, %c0_23, %c0_24] : memref<1x3x12xf32, #tpu.memory_space<vmem>>, vector<1x2x8xf32>
    %24 = vector.shape_cast %23 : vector<1x2x8xf32> to vector<2x8xf32>
    %c4_25 = arith.constant 4 : index
    %c0_26 = arith.constant 0 : index
    %c0_27 = arith.constant 0 : index
    %25 = vector.load %arg5[%c4_25, %c0_26, %c0_27] : memref<9x8x16xf32, #tpu.memory_space<vmem>>, vector<1x8x16xf32>
    %26 = vector.shape_cast %25 : vector<1x8x16xf32> to vector<8x16xf32>
    %cst_28 = arith.constant dense<0.000000e+00> : vector<2x16xf32>
    %27 = tpu.matmul %24, %26, %cst_28 {dimension_numbers = #tpu.dot_dimension_numbers<[1], [0], [0], [1], [0, 0, 1, 1], [], []>} : vector<2x8xf32>, vector<8x16xf32>, vector<2x16xf32> -> vector<2x16xf32>
    %28 = arith.addf %22, %27 : vector<2x16xf32>
    %c0_29 = arith.constant 0 : index
    %c0_30 = arith.constant 0 : index
    %c4_31 = arith.constant 4 : index
    %29 = vector.load %arg3[%c0_29, %c0_30, %c4_31] : memref<1x3x12xf32, #tpu.memory_space<vmem>>, vector<1x2x8xf32>
    %30 = vector.shape_cast %29 : vector<1x2x8xf32> to vector<2x8xf32>
    %c5 = arith.constant 5 : index
    %c0_32 = arith.constant 0 : index
    %c0_33 = arith.constant 0 : index
    %31 = vector.load %arg5[%c5, %c0_32, %c0_33] : memref<9x8x16xf32, #tpu.memory_space<vmem>>, vector<1x8x16xf32>
    %32 = vector.shape_cast %31 : vector<1x8x16xf32> to vector<8x16xf32>
    %cst_34 = arith.constant dense<0.000000e+00> : vector<2x16xf32>
    %33 = tpu.matmul %30, %32, %cst_34 {dimension_numbers = #tpu.dot_dimension_numbers<[1], [0], [0], [1], [0, 0, 1, 1], [], []>} : vector<2x8xf32>, vector<8x16xf32>, vector<2x16xf32> -> vector<2x16xf32>
    %34 = arith.addf %28, %33 : vector<2x16xf32>
    %c0_35 = arith.constant 0 : index
    %c1_36 = arith.constant 1 : index
    %c0_37 = arith.constant 0 : index
    %35 = vector.load %arg1[%c0_35, %c1_36, %c0_37] : memref<1x3x12xf32, #tpu.memory_space<vmem>>, vector<1x2x8xf32>
    %36 = vector.shape_cast %35 : vector<1x2x8xf32> to vector<2x8xf32>
    %c6 = arith.constant 6 : index
    %c0_38 = arith.constant 0 : index
    %c0_39 = arith.constant 0 : index
    %37 = vector.load %arg5[%c6, %c0_38, %c0_39] : memref<9x8x16xf32, #tpu.memory_space<vmem>>, vector<1x8x16xf32>
    %38 = vector.shape_cast %37 : vector<1x8x16xf32> to vector<8x16xf32>
    %cst_40 = arith.constant dense<0.000000e+00> : vector<2x16xf32>
    %39 = tpu.matmul %36, %38, %cst_40 {dimension_numbers = #tpu.dot_dimension_numbers<[1], [0], [0], [1], [0, 0, 1, 1], [], []>} : vector<2x8xf32>, vector<8x16xf32>, vector<2x16xf32> -> vector<2x16xf32>
    %40 = arith.addf %34, %39 : vector<2x16xf32>
    %c0_41 = arith.constant 0 : index
    %c1_42 = arith.constant 1 : index
    %c0_43 = arith.constant 0 : index
    %41 = vector.load %arg2[%c0_41, %c1_42, %c0_43] : memref<1x3x12xf32, #tpu.memory_space<vmem>>, vector<1x2x8xf32>
    %42 = vector.shape_cast %41 : vector<1x2x8xf32> to vector<2x8xf32>
    %c7 = arith.constant 7 : index
    %c0_44 = arith.constant 0 : index
    %c0_45 = arith.constant 0 : index
    %43 = vector.load %arg5[%c7, %c0_44, %c0_45] : memref<9x8x16xf32, #tpu.memory_space<vmem>>, vector<1x8x16xf32>
    %44 = vector.shape_cast %43 : vector<1x8x16xf32> to vector<8x16xf32>
    %cst_46 = arith.constant dense<0.000000e+00> : vector<2x16xf32>
    %45 = tpu.matmul %42, %44, %cst_46 {dimension_numbers = #tpu.dot_dimension_numbers<[1], [0], [0], [1], [0, 0, 1, 1], [], []>} : vector<2x8xf32>, vector<8x16xf32>, vector<2x16xf32> -> vector<2x16xf32>
    %46 = arith.addf %40, %45 : vector<2x16xf32>
    %c0_47 = arith.constant 0 : index
    %c1_48 = arith.constant 1 : index
    %c4_49 = arith.constant 4 : index
    %47 = vector.load %arg1[%c0_47, %c1_48, %c4_49] : memref<1x3x12xf32, #tpu.memory_space<vmem>>, vector<1x2x8xf32>
    %48 = vector.shape_cast %47 : vector<1x2x8xf32> to vector<2x8xf32>
    %c8 = arith.constant 8 : index
    %c0_50 = arith.constant 0 : index
    %c0_51 = arith.constant 0 : index
    %49 = vector.load %arg5[%c8, %c0_50, %c0_51] : memref<9x8x16xf32, #tpu.memory_space<vmem>>, vector<1x8x16xf32>
    %50 = vector.shape_cast %49 : vector<1x8x16xf32> to vector<8x16xf32>
    %cst_52 = arith.constant dense<0.000000e+00> : vector<2x16xf32>
    %51 = tpu.matmul %48, %50, %cst_52 {dimension_numbers = #tpu.dot_dimension_numbers<[1], [0], [0], [1], [0, 0, 1, 1], [], []>} : vector<2x8xf32>, vector<8x16xf32>, vector<2x16xf32> -> vector<2x16xf32>
    %52 = arith.addf %46, %51 : vector<2x16xf32>
    %c0_53 = arith.constant 0 : index
    %c0_54 = arith.constant 0 : index
    %c0_55 = arith.constant 0 : index
    %53 = vector.load %arg2[%c0_53, %c0_54, %c0_55] : memref<1x3x12xf32, #tpu.memory_space<vmem>>, vector<1x2x8xf32>
    %54 = vector.shape_cast %53 : vector<1x2x8xf32> to vector<2x8xf32>
    %c0_56 = arith.constant 0 : index
    %c0_57 = arith.constant 0 : index
    %c0_58 = arith.constant 0 : index
    %55 = vector.load %arg5[%c0_56, %c0_57, %c0_58] : memref<9x8x16xf32, #tpu.memory_space<vmem>>, vector<1x8x16xf32>
    %56 = vector.shape_cast %55 : vector<1x8x16xf32> to vector<8x16xf32>
    %cst_59 = arith.constant dense<0.000000e+00> : vector<2x16xf32>
    %57 = tpu.matmul %54, %56, %cst_59 {dimension_numbers = #tpu.dot_dimension_numbers<[1], [0], [0], [1], [0, 0, 1, 1], [], []>} : vector<2x8xf32>, vector<8x16xf32>, vector<2x16xf32> -> vector<2x16xf32>
    %c0_60 = arith.constant 0 : index
    %c0_61 = arith.constant 0 : index
    %c4_62 = arith.constant 4 : index
    %58 = vector.load %arg1[%c0_60, %c0_61, %c4_62] : memref<1x3x12xf32, #tpu.memory_space<vmem>>, vector<1x2x8xf32>
    %59 = vector.shape_cast %58 : vector<1x2x8xf32> to vector<2x8xf32>
    %c1_63 = arith.constant 1 : index
    %c0_64 = arith.constant 0 : index
    %c0_65 = arith.constant 0 : index
    %60 = vector.load %arg5[%c1_63, %c0_64, %c0_65] : memref<9x8x16xf32, #tpu.memory_space<vmem>>, vector<1x8x16xf32>
    %61 = vector.shape_cast %60 : vector<1x8x16xf32> to vector<8x16xf32>
    %cst_66 = arith.constant dense<0.000000e+00> : vector<2x16xf32>
    %62 = tpu.matmul %59, %61, %cst_66 {dimension_numbers = #tpu.dot_dimension_numbers<[1], [0], [0], [1], [0, 0, 1, 1], [], []>} : vector<2x8xf32>, vector<8x16xf32>, vector<2x16xf32> -> vector<2x16xf32>
    %63 = arith.addf %57, %62 : vector<2x16xf32>
    %c0_67 = arith.constant 0 : index
    %c0_68 = arith.constant 0 : index
    %c4_69 = arith.constant 4 : index
    %64 = vector.load %arg2[%c0_67, %c0_68, %c4_69] : memref<1x3x12xf32, #tpu.memory_space<vmem>>, vector<1x2x8xf32>
    %65 = vector.shape_cast %64 : vector<1x2x8xf32> to vector<2x8xf32>
    %c2_70 = arith.constant 2 : index
    %c0_71 = arith.constant 0 : index
    %c0_72 = arith.constant 0 : index
    %66 = vector.load %arg5[%c2_70, %c0_71, %c0_72] : memref<9x8x16xf32, #tpu.memory_space<vmem>>, vector<1x8x16xf32>
    %67 = vector.shape_cast %66 : vector<1x8x16xf32> to vector<8x16xf32>
    %cst_73 = arith.constant dense<0.000000e+00> : vector<2x16xf32>
    %68 = tpu.matmul %65, %67, %cst_73 {dimension_numbers = #tpu.dot_dimension_numbers<[1], [0], [0], [1], [0, 0, 1, 1], [], []>} : vector<2x8xf32>, vector<8x16xf32>, vector<2x16xf32> -> vector<2x16xf32>
    %69 = arith.addf %63, %68 : vector<2x16xf32>
    %c0_74 = arith.constant 0 : index
    %c0_75 = arith.constant 0 : index
    %c0_76 = arith.constant 0 : index
    %70 = vector.load %arg4[%c0_74, %c0_75, %c0_76] : memref<1x3x12xf32, #tpu.memory_space<vmem>>, vector<1x2x8xf32>
    %71 = vector.shape_cast %70 : vector<1x2x8xf32> to vector<2x8xf32>
    %c3_77 = arith.constant 3 : index
    %c0_78 = arith.constant 0 : index
    %c0_79 = arith.constant 0 : index
    %72 = vector.load %arg5[%c3_77, %c0_78, %c0_79] : memref<9x8x16xf32, #tpu.memory_space<vmem>>, vector<1x8x16xf32>
    %73 = vector.shape_cast %72 : vector<1x8x16xf32> to vector<8x16xf32>
    %cst_80 = arith.constant dense<0.000000e+00> : vector<2x16xf32>
    %74 = tpu.matmul %71, %73, %cst_80 {dimension_numbers = #tpu.dot_dimension_numbers<[1], [0], [0], [1], [0, 0, 1, 1], [], []>} : vector<2x8xf32>, vector<8x16xf32>, vector<2x16xf32> -> vector<2x16xf32>
    %75 = arith.addf %69, %74 : vector<2x16xf32>
    %c0_81 = arith.constant 0 : index
    %c0_82 = arith.constant 0 : index
    %c4_83 = arith.constant 4 : index
    %76 = vector.load %arg3[%c0_81, %c0_82, %c4_83] : memref<1x3x12xf32, #tpu.memory_space<vmem>>, vector<1x2x8xf32>
    %77 = vector.shape_cast %76 : vector<1x2x8xf32> to vector<2x8xf32>
    %c4_84 = arith.constant 4 : index
    %c0_85 = arith.constant 0 : index
    %c0_86 = arith.constant 0 : index
    %78 = vector.load %arg5[%c4_84, %c0_85, %c0_86] : memref<9x8x16xf32, #tpu.memory_space<vmem>>, vector<1x8x16xf32>
    %79 = vector.shape_cast %78 : vector<1x8x16xf32> to vector<8x16xf32>
    %cst_87 = arith.constant dense<0.000000e+00> : vector<2x16xf32>
    %80 = tpu.matmul %77, %79, %cst_87 {dimension_numbers = #tpu.dot_dimension_numbers<[1], [0], [0], [1], [0, 0, 1, 1], [], []>} : vector<2x8xf32>, vector<8x16xf32>, vector<2x16xf32> -> vector<2x16xf32>
    %81 = arith.addf %75, %80 : vector<2x16xf32>
    %c0_88 = arith.constant 0 : index
    %c0_89 = arith.constant 0 : index
    %c4_90 = arith.constant 4 : index
    %82 = vector.load %arg4[%c0_88, %c0_89, %c4_90] : memref<1x3x12xf32, #tpu.memory_space<vmem>>, vector<1x2x8xf32>
    %83 = vector.shape_cast %82 : vector<1x2x8xf32> to vector<2x8xf32>
    %c5_91 = arith.constant 5 : index
    %c0_92 = arith.constant 0 : index
    %c0_93 = arith.constant 0 : index
    %84 = vector.load %arg5[%c5_91, %c0_92, %c0_93] : memref<9x8x16xf32, #tpu.memory_space<vmem>>, vector<1x8x16xf32>
    %85 = vector.shape_cast %84 : vector<1x8x16xf32> to vector<8x16xf32>
    %cst_94 = arith.constant dense<0.000000e+00> : vector<2x16xf32>
    %86 = tpu.matmul %83, %85, %cst_94 {dimension_numbers = #tpu.dot_dimension_numbers<[1], [0], [0], [1], [0, 0, 1, 1], [], []>} : vector<2x8xf32>, vector<8x16xf32>, vector<2x16xf32> -> vector<2x16xf32>
    %87 = arith.addf %81, %86 : vector<2x16xf32>
    %c0_95 = arith.constant 0 : index
    %c1_96 = arith.constant 1 : index
    %c0_97 = arith.constant 0 : index
    %88 = vector.load %arg2[%c0_95, %c1_96, %c0_97] : memref<1x3x12xf32, #tpu.memory_space<vmem>>, vector<1x2x8xf32>
    %89 = vector.shape_cast %88 : vector<1x2x8xf32> to vector<2x8xf32>
    %c6_98 = arith.constant 6 : index
    %c0_99 = arith.constant 0 : index
    %c0_100 = arith.constant 0 : index
    %90 = vector.load %arg5[%c6_98, %c0_99, %c0_100] : memref<9x8x16xf32, #tpu.memory_space<vmem>>, vector<1x8x16xf32>
    %91 = vector.shape_cast %90 : vector<1x8x16xf32> to vector<8x16xf32>
    %cst_101 = arith.constant dense<0.000000e+00> : vector<2x16xf32>
    %92 = tpu.matmul %89, %91, %cst_101 {dimension_numbers = #tpu.dot_dimension_numbers<[1], [0], [0], [1], [0, 0, 1, 1], [], []>} : vector<2x8xf32>, vector<8x16xf32>, vector<2x16xf32> -> vector<2x16xf32>
    %93 = arith.addf %87, %92 : vector<2x16xf32>
    %c0_102 = arith.constant 0 : index
    %c1_103 = arith.constant 1 : index
    %c4_104 = arith.constant 4 : index
    %94 = vector.load %arg1[%c0_102, %c1_103, %c4_104] : memref<1x3x12xf32, #tpu.memory_space<vmem>>, vector<1x2x8xf32>
    %95 = vector.shape_cast %94 : vector<1x2x8xf32> to vector<2x8xf32>
    %c7_105 = arith.constant 7 : index
    %c0_106 = arith.constant 0 : index
    %c0_107 = arith.constant 0 : index
    %96 = vector.load %arg5[%c7_105, %c0_106, %c0_107] : memref<9x8x16xf32, #tpu.memory_space<vmem>>, vector<1x8x16xf32>
    %97 = vector.shape_cast %96 : vector<1x8x16xf32> to vector<8x16xf32>
    %cst_108 = arith.constant dense<0.000000e+00> : vector<2x16xf32>
    %98 = tpu.matmul %95, %97, %cst_108 {dimension_numbers = #tpu.dot_dimension_numbers<[1], [0], [0], [1], [0, 0, 1, 1], [], []>} : vector<2x8xf32>, vector<8x16xf32>, vector<2x16xf32> -> vector<2x16xf32>
    %99 = arith.addf %93, %98 : vector<2x16xf32>
    %c0_109 = arith.constant 0 : index
    %c1_110 = arith.constant 1 : index
    %c4_111 = arith.constant 4 : index
    %100 = vector.load %arg2[%c0_109, %c1_110, %c4_111] : memref<1x3x12xf32, #tpu.memory_space<vmem>>, vector<1x2x8xf32>
    %101 = vector.shape_cast %100 : vector<1x2x8xf32> to vector<2x8xf32>
    %c8_112 = arith.constant 8 : index
    %c0_113 = arith.constant 0 : index
    %c0_114 = arith.constant 0 : index
    %102 = vector.load %arg5[%c8_112, %c0_113, %c0_114] : memref<9x8x16xf32, #tpu.memory_space<vmem>>, vector<1x8x16xf32>
    %103 = vector.shape_cast %102 : vector<1x8x16xf32> to vector<8x16xf32>
    %cst_115 = arith.constant dense<0.000000e+00> : vector<2x16xf32>
    %104 = tpu.matmul %101, %103, %cst_115 {dimension_numbers = #tpu.dot_dimension_numbers<[1], [0], [0], [1], [0, 0, 1, 1], [], []>} : vector<2x8xf32>, vector<8x16xf32>, vector<2x16xf32> -> vector<2x16xf32>
    %105 = arith.addf %99, %104 : vector<2x16xf32>
    %106 = arith.maximumf %52, %105 : vector<2x16xf32>
    %c0_116 = arith.constant 0 : index
    %c0_117 = arith.constant 0 : index
    %c0_118 = arith.constant 0 : index
    %107 = vector.load %arg3[%c0_116, %c0_117, %c0_118] : memref<1x3x12xf32, #tpu.memory_space<vmem>>, vector<1x2x8xf32>
    %108 = vector.shape_cast %107 : vector<1x2x8xf32> to vector<2x8xf32>
    %c0_119 = arith.constant 0 : index
    %c0_120 = arith.constant 0 : index
    %c0_121 = arith.constant 0 : index
    %109 = vector.load %arg5[%c0_119, %c0_120, %c0_121] : memref<9x8x16xf32, #tpu.memory_space<vmem>>, vector<1x8x16xf32>
    %110 = vector.shape_cast %109 : vector<1x8x16xf32> to vector<8x16xf32>
    %cst_122 = arith.constant dense<0.000000e+00> : vector<2x16xf32>
    %111 = tpu.matmul %108, %110, %cst_122 {dimension_numbers = #tpu.dot_dimension_numbers<[1], [0], [0], [1], [0, 0, 1, 1], [], []>} : vector<2x8xf32>, vector<8x16xf32>, vector<2x16xf32> -> vector<2x16xf32>
    %c0_123 = arith.constant 0 : index
    %c0_124 = arith.constant 0 : index
    %c0_125 = arith.constant 0 : index
    %112 = vector.load %arg4[%c0_123, %c0_124, %c0_125] : memref<1x3x12xf32, #tpu.memory_space<vmem>>, vector<1x2x8xf32>
    %113 = vector.shape_cast %112 : vector<1x2x8xf32> to vector<2x8xf32>
    %c1_126 = arith.constant 1 : index
    %c0_127 = arith.constant 0 : index
    %c0_128 = arith.constant 0 : index
    %114 = vector.load %arg5[%c1_126, %c0_127, %c0_128] : memref<9x8x16xf32, #tpu.memory_space<vmem>>, vector<1x8x16xf32>
    %115 = vector.shape_cast %114 : vector<1x8x16xf32> to vector<8x16xf32>
    %cst_129 = arith.constant dense<0.000000e+00> : vector<2x16xf32>
    %116 = tpu.matmul %113, %115, %cst_129 {dimension_numbers = #tpu.dot_dimension_numbers<[1], [0], [0], [1], [0, 0, 1, 1], [], []>} : vector<2x8xf32>, vector<8x16xf32>, vector<2x16xf32> -> vector<2x16xf32>
    %117 = arith.addf %111, %116 : vector<2x16xf32>
    %c0_130 = arith.constant 0 : index
    %c0_131 = arith.constant 0 : index
    %c4_132 = arith.constant 4 : index
    %118 = vector.load %arg3[%c0_130, %c0_131, %c4_132] : memref<1x3x12xf32, #tpu.memory_space<vmem>>, vector<1x2x8xf32>
    %119 = vector.shape_cast %118 : vector<1x2x8xf32> to vector<2x8xf32>
    %c2_133 = arith.constant 2 : index
    %c0_134 = arith.constant 0 : index
    %c0_135 = arith.constant 0 : index
    %120 = vector.load %arg5[%c2_133, %c0_134, %c0_135] : memref<9x8x16xf32, #tpu.memory_space<vmem>>, vector<1x8x16xf32>
    %121 = vector.shape_cast %120 : vector<1x8x16xf32> to vector<8x16xf32>
    %cst_136 = arith.constant dense<0.000000e+00> : vector<2x16xf32>
    %122 = tpu.matmul %119, %121, %cst_136 {dimension_numbers = #tpu.dot_dimension_numbers<[1], [0], [0], [1], [0, 0, 1, 1], [], []>} : vector<2x8xf32>, vector<8x16xf32>, vector<2x16xf32> -> vector<2x16xf32>
    %123 = arith.addf %117, %122 : vector<2x16xf32>
    %c0_137 = arith.constant 0 : index
    %c1_138 = arith.constant 1 : index
    %c0_139 = arith.constant 0 : index
    %124 = vector.load %arg1[%c0_137, %c1_138, %c0_139] : memref<1x3x12xf32, #tpu.memory_space<vmem>>, vector<1x2x8xf32>
    %125 = vector.shape_cast %124 : vector<1x2x8xf32> to vector<2x8xf32>
    %c3_140 = arith.constant 3 : index
    %c0_141 = arith.constant 0 : index
    %c0_142 = arith.constant 0 : index
    %126 = vector.load %arg5[%c3_140, %c0_141, %c0_142] : memref<9x8x16xf32, #tpu.memory_space<vmem>>, vector<1x8x16xf32>
    %127 = vector.shape_cast %126 : vector<1x8x16xf32> to vector<8x16xf32>
    %cst_143 = arith.constant dense<0.000000e+00> : vector<2x16xf32>
    %128 = tpu.matmul %125, %127, %cst_143 {dimension_numbers = #tpu.dot_dimension_numbers<[1], [0], [0], [1], [0, 0, 1, 1], [], []>} : vector<2x8xf32>, vector<8x16xf32>, vector<2x16xf32> -> vector<2x16xf32>
    %129 = arith.addf %123, %128 : vector<2x16xf32>
    %c0_144 = arith.constant 0 : index
    %c1_145 = arith.constant 1 : index
    %c0_146 = arith.constant 0 : index
    %130 = vector.load %arg2[%c0_144, %c1_145, %c0_146] : memref<1x3x12xf32, #tpu.memory_space<vmem>>, vector<1x2x8xf32>
    %131 = vector.shape_cast %130 : vector<1x2x8xf32> to vector<2x8xf32>
    %c4_147 = arith.constant 4 : index
    %c0_148 = arith.constant 0 : index
    %c0_149 = arith.constant 0 : index
    %132 = vector.load %arg5[%c4_147, %c0_148, %c0_149] : memref<9x8x16xf32, #tpu.memory_space<vmem>>, vector<1x8x16xf32>
    %133 = vector.shape_cast %132 : vector<1x8x16xf32> to vector<8x16xf32>
    %cst_150 = arith.constant dense<0.000000e+00> : vector<2x16xf32>
    %134 = tpu.matmul %131, %133, %cst_150 {dimension_numbers = #tpu.dot_dimension_numbers<[1], [0], [0], [1], [0, 0, 1, 1], [], []>} : vector<2x8xf32>, vector<8x16xf32>, vector<2x16xf32> -> vector<2x16xf32>
    %135 = arith.addf %129, %134 : vector<2x16xf32>
    %c0_151 = arith.constant 0 : index
    %c1_152 = arith.constant 1 : index
    %c4_153 = arith.constant 4 : index
    %136 = vector.load %arg1[%c0_151, %c1_152, %c4_153] : memref<1x3x12xf32, #tpu.memory_space<vmem>>, vector<1x2x8xf32>
    %137 = vector.shape_cast %136 : vector<1x2x8xf32> to vector<2x8xf32>
    %c5_154 = arith.constant 5 : index
    %c0_155 = arith.constant 0 : index
    %c0_156 = arith.constant 0 : index
    %138 = vector.load %arg5[%c5_154, %c0_155, %c0_156] : memref<9x8x16xf32, #tpu.memory_space<vmem>>, vector<1x8x16xf32>
    %139 = vector.shape_cast %138 : vector<1x8x16xf32> to vector<8x16xf32>
    %cst_157 = arith.constant dense<0.000000e+00> : vector<2x16xf32>
    %140 = tpu.matmul %137, %139, %cst_157 {dimension_numbers = #tpu.dot_dimension_numbers<[1], [0], [0], [1], [0, 0, 1, 1], [], []>} : vector<2x8xf32>, vector<8x16xf32>, vector<2x16xf32> -> vector<2x16xf32>
    %141 = arith.addf %135, %140 : vector<2x16xf32>
    %c0_158 = arith.constant 0 : index
    %c1_159 = arith.constant 1 : index
    %c0_160 = arith.constant 0 : index
    %142 = vector.load %arg3[%c0_158, %c1_159, %c0_160] : memref<1x3x12xf32, #tpu.memory_space<vmem>>, vector<1x2x8xf32>
    %143 = vector.shape_cast %142 : vector<1x2x8xf32> to vector<2x8xf32>
    %c6_161 = arith.constant 6 : index
    %c0_162 = arith.constant 0 : index
    %c0_163 = arith.constant 0 : index
    %144 = vector.load %arg5[%c6_161, %c0_162, %c0_163] : memref<9x8x16xf32, #tpu.memory_space<vmem>>, vector<1x8x16xf32>
    %145 = vector.shape_cast %144 : vector<1x8x16xf32> to vector<8x16xf32>
    %cst_164 = arith.constant dense<0.000000e+00> : vector<2x16xf32>
    %146 = tpu.matmul %143, %145, %cst_164 {dimension_numbers = #tpu.dot_dimension_numbers<[1], [0], [0], [1], [0, 0, 1, 1], [], []>} : vector<2x8xf32>, vector<8x16xf32>, vector<2x16xf32> -> vector<2x16xf32>
    %147 = arith.addf %141, %146 : vector<2x16xf32>
    %c0_165 = arith.constant 0 : index
    %c1_166 = arith.constant 1 : index
    %c0_167 = arith.constant 0 : index
    %148 = vector.load %arg4[%c0_165, %c1_166, %c0_167] : memref<1x3x12xf32, #tpu.memory_space<vmem>>, vector<1x2x8xf32>
    %149 = vector.shape_cast %148 : vector<1x2x8xf32> to vector<2x8xf32>
    %c7_168 = arith.constant 7 : index
    %c0_169 = arith.constant 0 : index
    %c0_170 = arith.constant 0 : index
    %150 = vector.load %arg5[%c7_168, %c0_169, %c0_170] : memref<9x8x16xf32, #tpu.memory_space<vmem>>, vector<1x8x16xf32>
    %151 = vector.shape_cast %150 : vector<1x8x16xf32> to vector<8x16xf32>
    %cst_171 = arith.constant dense<0.000000e+00> : vector<2x16xf32>
    %152 = tpu.matmul %149, %151, %cst_171 {dimension_numbers = #tpu.dot_dimension_numbers<[1], [0], [0], [1], [0, 0, 1, 1], [], []>} : vector<2x8xf32>, vector<8x16xf32>, vector<2x16xf32> -> vector<2x16xf32>
    %153 = arith.addf %147, %152 : vector<2x16xf32>
    %c0_172 = arith.constant 0 : index
    %c1_173 = arith.constant 1 : index
    %c4_174 = arith.constant 4 : index
    %154 = vector.load %arg3[%c0_172, %c1_173, %c4_174] : memref<1x3x12xf32, #tpu.memory_space<vmem>>, vector<1x2x8xf32>
    %155 = vector.shape_cast %154 : vector<1x2x8xf32> to vector<2x8xf32>
    %c8_175 = arith.constant 8 : index
    %c0_176 = arith.constant 0 : index
    %c0_177 = arith.constant 0 : index
    %156 = vector.load %arg5[%c8_175, %c0_176, %c0_177] : memref<9x8x16xf32, #tpu.memory_space<vmem>>, vector<1x8x16xf32>
    %157 = vector.shape_cast %156 : vector<1x8x16xf32> to vector<8x16xf32>
    %cst_178 = arith.constant dense<0.000000e+00> : vector<2x16xf32>
    %158 = tpu.matmul %155, %157, %cst_178 {dimension_numbers = #tpu.dot_dimension_numbers<[1], [0], [0], [1], [0, 0, 1, 1], [], []>} : vector<2x8xf32>, vector<8x16xf32>, vector<2x16xf32> -> vector<2x16xf32>
    %159 = arith.addf %153, %158 : vector<2x16xf32>
    %160 = arith.maximumf %106, %159 : vector<2x16xf32>
    %c0_179 = arith.constant 0 : index
    %c0_180 = arith.constant 0 : index
    %c0_181 = arith.constant 0 : index
    %161 = vector.load %arg4[%c0_179, %c0_180, %c0_181] : memref<1x3x12xf32, #tpu.memory_space<vmem>>, vector<1x2x8xf32>
    %162 = vector.shape_cast %161 : vector<1x2x8xf32> to vector<2x8xf32>
    %c0_182 = arith.constant 0 : index
    %c0_183 = arith.constant 0 : index
    %c0_184 = arith.constant 0 : index
    %163 = vector.load %arg5[%c0_182, %c0_183, %c0_184] : memref<9x8x16xf32, #tpu.memory_space<vmem>>, vector<1x8x16xf32>
    %164 = vector.shape_cast %163 : vector<1x8x16xf32> to vector<8x16xf32>
    %cst_185 = arith.constant dense<0.000000e+00> : vector<2x16xf32>
    %165 = tpu.matmul %162, %164, %cst_185 {dimension_numbers = #tpu.dot_dimension_numbers<[1], [0], [0], [1], [0, 0, 1, 1], [], []>} : vector<2x8xf32>, vector<8x16xf32>, vector<2x16xf32> -> vector<2x16xf32>
    %c0_186 = arith.constant 0 : index
    %c0_187 = arith.constant 0 : index
    %c4_188 = arith.constant 4 : index
    %166 = vector.load %arg3[%c0_186, %c0_187, %c4_188] : memref<1x3x12xf32, #tpu.memory_space<vmem>>, vector<1x2x8xf32>
    %167 = vector.shape_cast %166 : vector<1x2x8xf32> to vector<2x8xf32>
    %c1_189 = arith.constant 1 : index
    %c0_190 = arith.constant 0 : index
    %c0_191 = arith.constant 0 : index
    %168 = vector.load %arg5[%c1_189, %c0_190, %c0_191] : memref<9x8x16xf32, #tpu.memory_space<vmem>>, vector<1x8x16xf32>
    %169 = vector.shape_cast %168 : vector<1x8x16xf32> to vector<8x16xf32>
    %cst_192 = arith.constant dense<0.000000e+00> : vector<2x16xf32>
    %170 = tpu.matmul %167, %169, %cst_192 {dimension_numbers = #tpu.dot_dimension_numbers<[1], [0], [0], [1], [0, 0, 1, 1], [], []>} : vector<2x8xf32>, vector<8x16xf32>, vector<2x16xf32> -> vector<2x16xf32>
    %171 = arith.addf %165, %170 : vector<2x16xf32>
    %c0_193 = arith.constant 0 : index
    %c0_194 = arith.constant 0 : index
    %c4_195 = arith.constant 4 : index
    %172 = vector.load %arg4[%c0_193, %c0_194, %c4_195] : memref<1x3x12xf32, #tpu.memory_space<vmem>>, vector<1x2x8xf32>
    %173 = vector.shape_cast %172 : vector<1x2x8xf32> to vector<2x8xf32>
    %c2_196 = arith.constant 2 : index
    %c0_197 = arith.constant 0 : index
    %c0_198 = arith.constant 0 : index
    %174 = vector.load %arg5[%c2_196, %c0_197, %c0_198] : memref<9x8x16xf32, #tpu.memory_space<vmem>>, vector<1x8x16xf32>
    %175 = vector.shape_cast %174 : vector<1x8x16xf32> to vector<8x16xf32>
    %cst_199 = arith.constant dense<0.000000e+00> : vector<2x16xf32>
    %176 = tpu.matmul %173, %175, %cst_199 {dimension_numbers = #tpu.dot_dimension_numbers<[1], [0], [0], [1], [0, 0, 1, 1], [], []>} : vector<2x8xf32>, vector<8x16xf32>, vector<2x16xf32> -> vector<2x16xf32>
    %177 = arith.addf %171, %176 : vector<2x16xf32>
    %c0_200 = arith.constant 0 : index
    %c1_201 = arith.constant 1 : index
    %c0_202 = arith.constant 0 : index
    %178 = vector.load %arg2[%c0_200, %c1_201, %c0_202] : memref<1x3x12xf32, #tpu.memory_space<vmem>>, vector<1x2x8xf32>
    %179 = vector.shape_cast %178 : vector<1x2x8xf32> to vector<2x8xf32>
    %c3_203 = arith.constant 3 : index
    %c0_204 = arith.constant 0 : index
    %c0_205 = arith.constant 0 : index
    %180 = vector.load %arg5[%c3_203, %c0_204, %c0_205] : memref<9x8x16xf32, #tpu.memory_space<vmem>>, vector<1x8x16xf32>
    %181 = vector.shape_cast %180 : vector<1x8x16xf32> to vector<8x16xf32>
    %cst_206 = arith.constant dense<0.000000e+00> : vector<2x16xf32>
    %182 = tpu.matmul %179, %181, %cst_206 {dimension_numbers = #tpu.dot_dimension_numbers<[1], [0], [0], [1], [0, 0, 1, 1], [], []>} : vector<2x8xf32>, vector<8x16xf32>, vector<2x16xf32> -> vector<2x16xf32>
    %183 = arith.addf %177, %182 : vector<2x16xf32>
    %c0_207 = arith.constant 0 : index
    %c1_208 = arith.constant 1 : index
    %c4_209 = arith.constant 4 : index
    %184 = vector.load %arg1[%c0_207, %c1_208, %c4_209] : memref<1x3x12xf32, #tpu.memory_space<vmem>>, vector<1x2x8xf32>
    %185 = vector.shape_cast %184 : vector<1x2x8xf32> to vector<2x8xf32>
    %c4_210 = arith.constant 4 : index
    %c0_211 = arith.constant 0 : index
    %c0_212 = arith.constant 0 : index
    %186 = vector.load %arg5[%c4_210, %c0_211, %c0_212] : memref<9x8x16xf32, #tpu.memory_space<vmem>>, vector<1x8x16xf32>
    %187 = vector.shape_cast %186 : vector<1x8x16xf32> to vector<8x16xf32>
    %cst_213 = arith.constant dense<0.000000e+00> : vector<2x16xf32>
    %188 = tpu.matmul %185, %187, %cst_213 {dimension_numbers = #tpu.dot_dimension_numbers<[1], [0], [0], [1], [0, 0, 1, 1], [], []>} : vector<2x8xf32>, vector<8x16xf32>, vector<2x16xf32> -> vector<2x16xf32>
    %189 = arith.addf %183, %188 : vector<2x16xf32>
    %c0_214 = arith.constant 0 : index
    %c1_215 = arith.constant 1 : index
    %c4_216 = arith.constant 4 : index
    %190 = vector.load %arg2[%c0_214, %c1_215, %c4_216] : memref<1x3x12xf32, #tpu.memory_space<vmem>>, vector<1x2x8xf32>
    %191 = vector.shape_cast %190 : vector<1x2x8xf32> to vector<2x8xf32>
    %c5_217 = arith.constant 5 : index
    %c0_218 = arith.constant 0 : index
    %c0_219 = arith.constant 0 : index
    %192 = vector.load %arg5[%c5_217, %c0_218, %c0_219] : memref<9x8x16xf32, #tpu.memory_space<vmem>>, vector<1x8x16xf32>
    %193 = vector.shape_cast %192 : vector<1x8x16xf32> to vector<8x16xf32>
    %cst_220 = arith.constant dense<0.000000e+00> : vector<2x16xf32>
    %194 = tpu.matmul %191, %193, %cst_220 {dimension_numbers = #tpu.dot_dimension_numbers<[1], [0], [0], [1], [0, 0, 1, 1], [], []>} : vector<2x8xf32>, vector<8x16xf32>, vector<2x16xf32> -> vector<2x16xf32>
    %195 = arith.addf %189, %194 : vector<2x16xf32>
    %c0_221 = arith.constant 0 : index
    %c1_222 = arith.constant 1 : index
    %c0_223 = arith.constant 0 : index
    %196 = vector.load %arg4[%c0_221, %c1_222, %c0_223] : memref<1x3x12xf32, #tpu.memory_space<vmem>>, vector<1x2x8xf32>
    %197 = vector.shape_cast %196 : vector<1x2x8xf32> to vector<2x8xf32>
    %c6_224 = arith.constant 6 : index
    %c0_225 = arith.constant 0 : index
    %c0_226 = arith.constant 0 : index
    %198 = vector.load %arg5[%c6_224, %c0_225, %c0_226] : memref<9x8x16xf32, #tpu.memory_space<vmem>>, vector<1x8x16xf32>
    %199 = vector.shape_cast %198 : vector<1x8x16xf32> to vector<8x16xf32>
    %cst_227 = arith.constant dense<0.000000e+00> : vector<2x16xf32>
    %200 = tpu.matmul %197, %199, %cst_227 {dimension_numbers = #tpu.dot_dimension_numbers<[1], [0], [0], [1], [0, 0, 1, 1], [], []>} : vector<2x8xf32>, vector<8x16xf32>, vector<2x16xf32> -> vector<2x16xf32>
    %201 = arith.addf %195, %200 : vector<2x16xf32>
    %c0_228 = arith.constant 0 : index
    %c1_229 = arith.constant 1 : index
    %c4_230 = arith.constant 4 : index
    %202 = vector.load %arg3[%c0_228, %c1_229, %c4_230] : memref<1x3x12xf32, #tpu.memory_space<vmem>>, vector<1x2x8xf32>
    %203 = vector.shape_cast %202 : vector<1x2x8xf32> to vector<2x8xf32>
    %c7_231 = arith.constant 7 : index
    %c0_232 = arith.constant 0 : index
    %c0_233 = arith.constant 0 : index
    %204 = vector.load %arg5[%c7_231, %c0_232, %c0_233] : memref<9x8x16xf32, #tpu.memory_space<vmem>>, vector<1x8x16xf32>
    %205 = vector.shape_cast %204 : vector<1x8x16xf32> to vector<8x16xf32>
    %cst_234 = arith.constant dense<0.000000e+00> : vector<2x16xf32>
    %206 = tpu.matmul %203, %205, %cst_234 {dimension_numbers = #tpu.dot_dimension_numbers<[1], [0], [0], [1], [0, 0, 1, 1], [], []>} : vector<2x8xf32>, vector<8x16xf32>, vector<2x16xf32> -> vector<2x16xf32>
    %207 = arith.addf %201, %206 : vector<2x16xf32>
    %c0_235 = arith.constant 0 : index
    %c1_236 = arith.constant 1 : index
    %c4_237 = arith.constant 4 : index
    %208 = vector.load %arg4[%c0_235, %c1_236, %c4_237] : memref<1x3x12xf32, #tpu.memory_space<vmem>>, vector<1x2x8xf32>
    %209 = vector.shape_cast %208 : vector<1x2x8xf32> to vector<2x8xf32>
    %c8_238 = arith.constant 8 : index
    %c0_239 = arith.constant 0 : index
    %c0_240 = arith.constant 0 : index
    %210 = vector.load %arg5[%c8_238, %c0_239, %c0_240] : memref<9x8x16xf32, #tpu.memory_space<vmem>>, vector<1x8x16xf32>
    %211 = vector.shape_cast %210 : vector<1x8x16xf32> to vector<8x16xf32>
    %cst_241 = arith.constant dense<0.000000e+00> : vector<2x16xf32>
    %212 = tpu.matmul %209, %211, %cst_241 {dimension_numbers = #tpu.dot_dimension_numbers<[1], [0], [0], [1], [0, 0, 1, 1], [], []>} : vector<2x8xf32>, vector<8x16xf32>, vector<2x16xf32> -> vector<2x16xf32>
    %213 = arith.addf %207, %212 : vector<2x16xf32>
    %214 = arith.maximumf %160, %213 : vector<2x16xf32>
    %c0_242 = arith.constant 0 : index
    %c0_243 = arith.constant 0 : index
    %215 = vector.load %arg6[%c0_242, %c0_243] : memref<1x16xf32, #tpu.memory_space<vmem>>, vector<1x16xf32>
    %216 = vector.broadcast %215 : vector<1x16xf32> to vector<2x16xf32>
    %217 = arith.addf %214, %216 : vector<2x16xf32>
    %c0_244 = arith.constant 0 : index
    %c0_245 = arith.constant 0 : index
    %c0_246 = arith.constant 0 : index
    %218 = vector.load %arg7[%c0_244, %c0_245, %c0_246] : memref<1x2x16xf32, #tpu.memory_space<vmem>>, vector<1x2x16xf32>
    %219 = vector.shape_cast %218 : vector<1x2x16xf32> to vector<2x16xf32>
    %220 = vector.shape_cast %217 : vector<2x16xf32> to vector<1x2x16xf32>
    tpu.vector_store %arg7[%c0_244, %c0_245, %c0_246], %220 {strides = array<i32>} : memref<1x2x16xf32, #tpu.memory_space<vmem>>, vector<1x2x16xf32>,
    return
  }
  func.func @transform_0(%arg0: i32) -> (i32, i32, i32) {
    %c0_i32 = arith.constant 0 : i32
    %c0_i32_0 = arith.constant 0 : i32
    %c0_i32_1 = arith.constant 0 : i32
    return %arg0, %c0_i32, %c0_i32_0 : i32, i32, i32
  }
  func.func @transform_1(%arg0: i32) -> (i32, i32, i32) {
    %c0_i32 = arith.constant 0 : i32
    %c0_i32_0 = arith.constant 0 : i32
    %c0_i32_1 = arith.constant 0 : i32
    return %arg0, %c0_i32, %c0_i32_0 : i32, i32, i32
  }
  func.func @transform_2(%arg0: i32) -> (i32, i32, i32) {
    %c0_i32 = arith.constant 0 : i32
    %c0_i32_0 = arith.constant 0 : i32
    %c0_i32_1 = arith.constant 0 : i32
    return %arg0, %c0_i32, %c0_i32_0 : i32, i32, i32
  }
  func.func @transform_3(%arg0: i32) -> (i32, i32, i32) {
    %c0_i32 = arith.constant 0 : i32
    %c0_i32_0 = arith.constant 0 : i32
    %c0_i32_1 = arith.constant 0 : i32
    return %arg0, %c0_i32, %c0_i32_0 : i32, i32, i32
  }
  func.func @transform_4(%arg0: i32) -> (i32, i32, i32) {
    %c0_i32 = arith.constant 0 : i32
    %c0_i32_0 = arith.constant 0 : i32
    %c0_i32_1 = arith.constant 0 : i32
    %c0_i32_2 = arith.constant 0 : i32
    return %c0_i32, %c0_i32_0, %c0_i32_1 : i32, i32, i32
  }
  func.func @transform_5(%arg0: i32) -> (i32, i32) {
    %c0_i32 = arith.constant 0 : i32
    %c0_i32_0 = arith.constant 0 : i32
    %c0_i32_1 = arith.constant 0 : i32
    return %c0_i32, %c0_i32_0 : i32, i32
  }
  func.func @transform_6(%arg0: i32) -> (i32, i32, i32) {
    %c0_i32 = arith.constant 0 : i32
    %c0_i32_0 = arith.constant 0 : i32
    %c0_i32_1 = arith.constant 0 : i32
    return %arg0, %c0_i32, %c0_i32_0 : i32, i32, i32
  }
}

module attributes {stable_mosaic.version = 11 : i64} {
  func.func @_conv_pool_kernel(%arg0: i32, %arg1: memref<1x2x16xf32, #tpu.memory_space<vmem>>, %arg2: memref<1x2x16xf32, #tpu.memory_space<vmem>>, %arg3: memref<1x2x16xf32, #tpu.memory_space<vmem>>, %arg4: memref<1x2x16xf32, #tpu.memory_space<vmem>>, %arg5: memref<9x8x16xf32, #tpu.memory_space<vmem>>, %arg6: memref<1x16xf32, #tpu.memory_space<vmem>>, %arg7: memref<1x1x16xf32, #tpu.memory_space<vmem>>) attributes {dimension_semantics = [#tpu.dimension_semantics<parallel>], iteration_bounds = array<i64: 6>, scalar_prefetch = 0 : i64, scratch_operands = 0 : i64, tpu.core_type = #tpu.core_type<tc>, window_params = [{transform_indices = @transform_0, window_bounds = array<i64: 1, 2, 16>}, {transform_indices = @transform_1, window_bounds = array<i64: 1, 2, 16>}, {transform_indices = @transform_2, window_bounds = array<i64: 1, 2, 16>}, {transform_indices = @transform_3, window_bounds = array<i64: 1, 2, 16>}, {pipeline_mode = #tpu.pipeline_mode<synchronous>, transform_indices = @transform_4, window_bounds = array<i64: 9, 8, 16>}, {pipeline_mode = #tpu.pipeline_mode<synchronous>, transform_indices = @transform_5, window_bounds = array<i64: 1, 16>}, {transform_indices = @transform_6, window_bounds = array<i64: 1, 1, 16>}]} {
    %c0 = arith.constant 0 : index
    %c0_0 = arith.constant 0 : index
    %c0_1 = arith.constant 0 : index
    %0 = vector.load %arg1[%c0, %c0_0, %c0_1] : memref<1x2x16xf32, #tpu.memory_space<vmem>>, vector<1x1x8xf32>
    %1 = vector.shape_cast %0 : vector<1x1x8xf32> to vector<1x8xf32>
    %c0_2 = arith.constant 0 : index
    %c0_3 = arith.constant 0 : index
    %c0_4 = arith.constant 0 : index
    %2 = vector.load %arg5[%c0_2, %c0_3, %c0_4] : memref<9x8x16xf32, #tpu.memory_space<vmem>>, vector<1x8x16xf32>
    %3 = vector.shape_cast %2 : vector<1x8x16xf32> to vector<8x16xf32>
    %cst = arith.constant dense<0.000000e+00> : vector<1x16xf32>
    %4 = tpu.matmul %1, %3, %cst {dimension_numbers = #tpu.dot_dimension_numbers<[1], [0], [0], [1], [0, 0, 1, 1], [], []>} : vector<1x8xf32>, vector<8x16xf32>, vector<1x16xf32> -> vector<1x16xf32>
    %c0_5 = arith.constant 0 : index
    %c0_6 = arith.constant 0 : index
    %c0_7 = arith.constant 0 : index
    %5 = vector.load %arg2[%c0_5, %c0_6, %c0_7] : memref<1x2x16xf32, #tpu.memory_space<vmem>>, vector<1x1x8xf32>
    %6 = vector.shape_cast %5 : vector<1x1x8xf32> to vector<1x8xf32>
    %c1 = arith.constant 1 : index
    %c0_8 = arith.constant 0 : index
    %c0_9 = arith.constant 0 : index
    %7 = vector.load %arg5[%c1, %c0_8, %c0_9] : memref<9x8x16xf32, #tpu.memory_space<vmem>>, vector<1x8x16xf32>
    %8 = vector.shape_cast %7 : vector<1x8x16xf32> to vector<8x16xf32>
    %cst_10 = arith.constant dense<0.000000e+00> : vector<1x16xf32>
    %9 = tpu.matmul %6, %8, %cst_10 {dimension_numbers = #tpu.dot_dimension_numbers<[1], [0], [0], [1], [0, 0, 1, 1], [], []>} : vector<1x8xf32>, vector<8x16xf32>, vector<1x16xf32> -> vector<1x16xf32>
    %10 = arith.addf %4, %9 : vector<1x16xf32>
    %c0_11 = arith.constant 0 : index
    %c0_12 = arith.constant 0 : index
    %c8 = arith.constant 8 : index
    %11 = vector.load %arg1[%c0_11, %c0_12, %c8] : memref<1x2x16xf32, #tpu.memory_space<vmem>>, vector<1x1x8xf32>
    %12 = vector.shape_cast %11 : vector<1x1x8xf32> to vector<1x8xf32>
    %c2 = arith.constant 2 : index
    %c0_13 = arith.constant 0 : index
    %c0_14 = arith.constant 0 : index
    %13 = vector.load %arg5[%c2, %c0_13, %c0_14] : memref<9x8x16xf32, #tpu.memory_space<vmem>>, vector<1x8x16xf32>
    %14 = vector.shape_cast %13 : vector<1x8x16xf32> to vector<8x16xf32>
    %cst_15 = arith.constant dense<0.000000e+00> : vector<1x16xf32>
    %15 = tpu.matmul %12, %14, %cst_15 {dimension_numbers = #tpu.dot_dimension_numbers<[1], [0], [0], [1], [0, 0, 1, 1], [], []>} : vector<1x8xf32>, vector<8x16xf32>, vector<1x16xf32> -> vector<1x16xf32>
    %16 = arith.addf %10, %15 : vector<1x16xf32>
    %c0_16 = arith.constant 0 : index
    %c0_17 = arith.constant 0 : index
    %c0_18 = arith.constant 0 : index
    %17 = vector.load %arg3[%c0_16, %c0_17, %c0_18] : memref<1x2x16xf32, #tpu.memory_space<vmem>>, vector<1x1x8xf32>
    %18 = vector.shape_cast %17 : vector<1x1x8xf32> to vector<1x8xf32>
    %c3 = arith.constant 3 : index
    %c0_19 = arith.constant 0 : index
    %c0_20 = arith.constant 0 : index
    %19 = vector.load %arg5[%c3, %c0_19, %c0_20] : memref<9x8x16xf32, #tpu.memory_space<vmem>>, vector<1x8x16xf32>
    %20 = vector.shape_cast %19 : vector<1x8x16xf32> to vector<8x16xf32>
    %cst_21 = arith.constant dense<0.000000e+00> : vector<1x16xf32>
    %21 = tpu.matmul %18, %20, %cst_21 {dimension_numbers = #tpu.dot_dimension_numbers<[1], [0], [0], [1], [0, 0, 1, 1], [], []>} : vector<1x8xf32>, vector<8x16xf32>, vector<1x16xf32> -> vector<1x16xf32>
    %22 = arith.addf %16, %21 : vector<1x16xf32>
    %c0_22 = arith.constant 0 : index
    %c0_23 = arith.constant 0 : index
    %c0_24 = arith.constant 0 : index
    %23 = vector.load %arg4[%c0_22, %c0_23, %c0_24] : memref<1x2x16xf32, #tpu.memory_space<vmem>>, vector<1x1x8xf32>
    %24 = vector.shape_cast %23 : vector<1x1x8xf32> to vector<1x8xf32>
    %c4 = arith.constant 4 : index
    %c0_25 = arith.constant 0 : index
    %c0_26 = arith.constant 0 : index
    %25 = vector.load %arg5[%c4, %c0_25, %c0_26] : memref<9x8x16xf32, #tpu.memory_space<vmem>>, vector<1x8x16xf32>
    %26 = vector.shape_cast %25 : vector<1x8x16xf32> to vector<8x16xf32>
    %cst_27 = arith.constant dense<0.000000e+00> : vector<1x16xf32>
    %27 = tpu.matmul %24, %26, %cst_27 {dimension_numbers = #tpu.dot_dimension_numbers<[1], [0], [0], [1], [0, 0, 1, 1], [], []>} : vector<1x8xf32>, vector<8x16xf32>, vector<1x16xf32> -> vector<1x16xf32>
    %28 = arith.addf %22, %27 : vector<1x16xf32>
    %c0_28 = arith.constant 0 : index
    %c0_29 = arith.constant 0 : index
    %c8_30 = arith.constant 8 : index
    %29 = vector.load %arg3[%c0_28, %c0_29, %c8_30] : memref<1x2x16xf32, #tpu.memory_space<vmem>>, vector<1x1x8xf32>
    %30 = vector.shape_cast %29 : vector<1x1x8xf32> to vector<1x8xf32>
    %c5 = arith.constant 5 : index
    %c0_31 = arith.constant 0 : index
    %c0_32 = arith.constant 0 : index
    %31 = vector.load %arg5[%c5, %c0_31, %c0_32] : memref<9x8x16xf32, #tpu.memory_space<vmem>>, vector<1x8x16xf32>
    %32 = vector.shape_cast %31 : vector<1x8x16xf32> to vector<8x16xf32>
    %cst_33 = arith.constant dense<0.000000e+00> : vector<1x16xf32>
    %33 = tpu.matmul %30, %32, %cst_33 {dimension_numbers = #tpu.dot_dimension_numbers<[1], [0], [0], [1], [0, 0, 1, 1], [], []>} : vector<1x8xf32>, vector<8x16xf32>, vector<1x16xf32> -> vector<1x16xf32>
    %34 = arith.addf %28, %33 : vector<1x16xf32>
    %c0_34 = arith.constant 0 : index
    %c1_35 = arith.constant 1 : index
    %c0_36 = arith.constant 0 : index
    %35 = vector.load %arg1[%c0_34, %c1_35, %c0_36] : memref<1x2x16xf32, #tpu.memory_space<vmem>>, vector<1x1x8xf32>
    %36 = vector.shape_cast %35 : vector<1x1x8xf32> to vector<1x8xf32>
    %c6 = arith.constant 6 : index
    %c0_37 = arith.constant 0 : index
    %c0_38 = arith.constant 0 : index
    %37 = vector.load %arg5[%c6, %c0_37, %c0_38] : memref<9x8x16xf32, #tpu.memory_space<vmem>>, vector<1x8x16xf32>
    %38 = vector.shape_cast %37 : vector<1x8x16xf32> to vector<8x16xf32>
    %cst_39 = arith.constant dense<0.000000e+00> : vector<1x16xf32>
    %39 = tpu.matmul %36, %38, %cst_39 {dimension_numbers = #tpu.dot_dimension_numbers<[1], [0], [0], [1], [0, 0, 1, 1], [], []>} : vector<1x8xf32>, vector<8x16xf32>, vector<1x16xf32> -> vector<1x16xf32>
    %40 = arith.addf %34, %39 : vector<1x16xf32>
    %c0_40 = arith.constant 0 : index
    %c1_41 = arith.constant 1 : index
    %c0_42 = arith.constant 0 : index
    %41 = vector.load %arg2[%c0_40, %c1_41, %c0_42] : memref<1x2x16xf32, #tpu.memory_space<vmem>>, vector<1x1x8xf32>
    %42 = vector.shape_cast %41 : vector<1x1x8xf32> to vector<1x8xf32>
    %c7 = arith.constant 7 : index
    %c0_43 = arith.constant 0 : index
    %c0_44 = arith.constant 0 : index
    %43 = vector.load %arg5[%c7, %c0_43, %c0_44] : memref<9x8x16xf32, #tpu.memory_space<vmem>>, vector<1x8x16xf32>
    %44 = vector.shape_cast %43 : vector<1x8x16xf32> to vector<8x16xf32>
    %cst_45 = arith.constant dense<0.000000e+00> : vector<1x16xf32>
    %45 = tpu.matmul %42, %44, %cst_45 {dimension_numbers = #tpu.dot_dimension_numbers<[1], [0], [0], [1], [0, 0, 1, 1], [], []>} : vector<1x8xf32>, vector<8x16xf32>, vector<1x16xf32> -> vector<1x16xf32>
    %46 = arith.addf %40, %45 : vector<1x16xf32>
    %c0_46 = arith.constant 0 : index
    %c1_47 = arith.constant 1 : index
    %c8_48 = arith.constant 8 : index
    %47 = vector.load %arg1[%c0_46, %c1_47, %c8_48] : memref<1x2x16xf32, #tpu.memory_space<vmem>>, vector<1x1x8xf32>
    %48 = vector.shape_cast %47 : vector<1x1x8xf32> to vector<1x8xf32>
    %c8_49 = arith.constant 8 : index
    %c0_50 = arith.constant 0 : index
    %c0_51 = arith.constant 0 : index
    %49 = vector.load %arg5[%c8_49, %c0_50, %c0_51] : memref<9x8x16xf32, #tpu.memory_space<vmem>>, vector<1x8x16xf32>
    %50 = vector.shape_cast %49 : vector<1x8x16xf32> to vector<8x16xf32>
    %cst_52 = arith.constant dense<0.000000e+00> : vector<1x16xf32>
    %51 = tpu.matmul %48, %50, %cst_52 {dimension_numbers = #tpu.dot_dimension_numbers<[1], [0], [0], [1], [0, 0, 1, 1], [], []>} : vector<1x8xf32>, vector<8x16xf32>, vector<1x16xf32> -> vector<1x16xf32>
    %52 = arith.addf %46, %51 : vector<1x16xf32>
    %c0_53 = arith.constant 0 : index
    %c0_54 = arith.constant 0 : index
    %c0_55 = arith.constant 0 : index
    %53 = vector.load %arg2[%c0_53, %c0_54, %c0_55] : memref<1x2x16xf32, #tpu.memory_space<vmem>>, vector<1x1x8xf32>
    %54 = vector.shape_cast %53 : vector<1x1x8xf32> to vector<1x8xf32>
    %c0_56 = arith.constant 0 : index
    %c0_57 = arith.constant 0 : index
    %c0_58 = arith.constant 0 : index
    %55 = vector.load %arg5[%c0_56, %c0_57, %c0_58] : memref<9x8x16xf32, #tpu.memory_space<vmem>>, vector<1x8x16xf32>
    %56 = vector.shape_cast %55 : vector<1x8x16xf32> to vector<8x16xf32>
    %cst_59 = arith.constant dense<0.000000e+00> : vector<1x16xf32>
    %57 = tpu.matmul %54, %56, %cst_59 {dimension_numbers = #tpu.dot_dimension_numbers<[1], [0], [0], [1], [0, 0, 1, 1], [], []>} : vector<1x8xf32>, vector<8x16xf32>, vector<1x16xf32> -> vector<1x16xf32>
    %c0_60 = arith.constant 0 : index
    %c0_61 = arith.constant 0 : index
    %c8_62 = arith.constant 8 : index
    %58 = vector.load %arg1[%c0_60, %c0_61, %c8_62] : memref<1x2x16xf32, #tpu.memory_space<vmem>>, vector<1x1x8xf32>
    %59 = vector.shape_cast %58 : vector<1x1x8xf32> to vector<1x8xf32>
    %c1_63 = arith.constant 1 : index
    %c0_64 = arith.constant 0 : index
    %c0_65 = arith.constant 0 : index
    %60 = vector.load %arg5[%c1_63, %c0_64, %c0_65] : memref<9x8x16xf32, #tpu.memory_space<vmem>>, vector<1x8x16xf32>
    %61 = vector.shape_cast %60 : vector<1x8x16xf32> to vector<8x16xf32>
    %cst_66 = arith.constant dense<0.000000e+00> : vector<1x16xf32>
    %62 = tpu.matmul %59, %61, %cst_66 {dimension_numbers = #tpu.dot_dimension_numbers<[1], [0], [0], [1], [0, 0, 1, 1], [], []>} : vector<1x8xf32>, vector<8x16xf32>, vector<1x16xf32> -> vector<1x16xf32>
    %63 = arith.addf %57, %62 : vector<1x16xf32>
    %c0_67 = arith.constant 0 : index
    %c0_68 = arith.constant 0 : index
    %c8_69 = arith.constant 8 : index
    %64 = vector.load %arg2[%c0_67, %c0_68, %c8_69] : memref<1x2x16xf32, #tpu.memory_space<vmem>>, vector<1x1x8xf32>
    %65 = vector.shape_cast %64 : vector<1x1x8xf32> to vector<1x8xf32>
    %c2_70 = arith.constant 2 : index
    %c0_71 = arith.constant 0 : index
    %c0_72 = arith.constant 0 : index
    %66 = vector.load %arg5[%c2_70, %c0_71, %c0_72] : memref<9x8x16xf32, #tpu.memory_space<vmem>>, vector<1x8x16xf32>
    %67 = vector.shape_cast %66 : vector<1x8x16xf32> to vector<8x16xf32>
    %cst_73 = arith.constant dense<0.000000e+00> : vector<1x16xf32>
    %68 = tpu.matmul %65, %67, %cst_73 {dimension_numbers = #tpu.dot_dimension_numbers<[1], [0], [0], [1], [0, 0, 1, 1], [], []>} : vector<1x8xf32>, vector<8x16xf32>, vector<1x16xf32> -> vector<1x16xf32>
    %69 = arith.addf %63, %68 : vector<1x16xf32>
    %c0_74 = arith.constant 0 : index
    %c0_75 = arith.constant 0 : index
    %c0_76 = arith.constant 0 : index
    %70 = vector.load %arg4[%c0_74, %c0_75, %c0_76] : memref<1x2x16xf32, #tpu.memory_space<vmem>>, vector<1x1x8xf32>
    %71 = vector.shape_cast %70 : vector<1x1x8xf32> to vector<1x8xf32>
    %c3_77 = arith.constant 3 : index
    %c0_78 = arith.constant 0 : index
    %c0_79 = arith.constant 0 : index
    %72 = vector.load %arg5[%c3_77, %c0_78, %c0_79] : memref<9x8x16xf32, #tpu.memory_space<vmem>>, vector<1x8x16xf32>
    %73 = vector.shape_cast %72 : vector<1x8x16xf32> to vector<8x16xf32>
    %cst_80 = arith.constant dense<0.000000e+00> : vector<1x16xf32>
    %74 = tpu.matmul %71, %73, %cst_80 {dimension_numbers = #tpu.dot_dimension_numbers<[1], [0], [0], [1], [0, 0, 1, 1], [], []>} : vector<1x8xf32>, vector<8x16xf32>, vector<1x16xf32> -> vector<1x16xf32>
    %75 = arith.addf %69, %74 : vector<1x16xf32>
    %c0_81 = arith.constant 0 : index
    %c0_82 = arith.constant 0 : index
    %c8_83 = arith.constant 8 : index
    %76 = vector.load %arg3[%c0_81, %c0_82, %c8_83] : memref<1x2x16xf32, #tpu.memory_space<vmem>>, vector<1x1x8xf32>
    %77 = vector.shape_cast %76 : vector<1x1x8xf32> to vector<1x8xf32>
    %c4_84 = arith.constant 4 : index
    %c0_85 = arith.constant 0 : index
    %c0_86 = arith.constant 0 : index
    %78 = vector.load %arg5[%c4_84, %c0_85, %c0_86] : memref<9x8x16xf32, #tpu.memory_space<vmem>>, vector<1x8x16xf32>
    %79 = vector.shape_cast %78 : vector<1x8x16xf32> to vector<8x16xf32>
    %cst_87 = arith.constant dense<0.000000e+00> : vector<1x16xf32>
    %80 = tpu.matmul %77, %79, %cst_87 {dimension_numbers = #tpu.dot_dimension_numbers<[1], [0], [0], [1], [0, 0, 1, 1], [], []>} : vector<1x8xf32>, vector<8x16xf32>, vector<1x16xf32> -> vector<1x16xf32>
    %81 = arith.addf %75, %80 : vector<1x16xf32>
    %c0_88 = arith.constant 0 : index
    %c0_89 = arith.constant 0 : index
    %c8_90 = arith.constant 8 : index
    %82 = vector.load %arg4[%c0_88, %c0_89, %c8_90] : memref<1x2x16xf32, #tpu.memory_space<vmem>>, vector<1x1x8xf32>
    %83 = vector.shape_cast %82 : vector<1x1x8xf32> to vector<1x8xf32>
    %c5_91 = arith.constant 5 : index
    %c0_92 = arith.constant 0 : index
    %c0_93 = arith.constant 0 : index
    %84 = vector.load %arg5[%c5_91, %c0_92, %c0_93] : memref<9x8x16xf32, #tpu.memory_space<vmem>>, vector<1x8x16xf32>
    %85 = vector.shape_cast %84 : vector<1x8x16xf32> to vector<8x16xf32>
    %cst_94 = arith.constant dense<0.000000e+00> : vector<1x16xf32>
    %86 = tpu.matmul %83, %85, %cst_94 {dimension_numbers = #tpu.dot_dimension_numbers<[1], [0], [0], [1], [0, 0, 1, 1], [], []>} : vector<1x8xf32>, vector<8x16xf32>, vector<1x16xf32> -> vector<1x16xf32>
    %87 = arith.addf %81, %86 : vector<1x16xf32>
    %c0_95 = arith.constant 0 : index
    %c1_96 = arith.constant 1 : index
    %c0_97 = arith.constant 0 : index
    %88 = vector.load %arg2[%c0_95, %c1_96, %c0_97] : memref<1x2x16xf32, #tpu.memory_space<vmem>>, vector<1x1x8xf32>
    %89 = vector.shape_cast %88 : vector<1x1x8xf32> to vector<1x8xf32>
    %c6_98 = arith.constant 6 : index
    %c0_99 = arith.constant 0 : index
    %c0_100 = arith.constant 0 : index
    %90 = vector.load %arg5[%c6_98, %c0_99, %c0_100] : memref<9x8x16xf32, #tpu.memory_space<vmem>>, vector<1x8x16xf32>
    %91 = vector.shape_cast %90 : vector<1x8x16xf32> to vector<8x16xf32>
    %cst_101 = arith.constant dense<0.000000e+00> : vector<1x16xf32>
    %92 = tpu.matmul %89, %91, %cst_101 {dimension_numbers = #tpu.dot_dimension_numbers<[1], [0], [0], [1], [0, 0, 1, 1], [], []>} : vector<1x8xf32>, vector<8x16xf32>, vector<1x16xf32> -> vector<1x16xf32>
    %93 = arith.addf %87, %92 : vector<1x16xf32>
    %c0_102 = arith.constant 0 : index
    %c1_103 = arith.constant 1 : index
    %c8_104 = arith.constant 8 : index
    %94 = vector.load %arg1[%c0_102, %c1_103, %c8_104] : memref<1x2x16xf32, #tpu.memory_space<vmem>>, vector<1x1x8xf32>
    %95 = vector.shape_cast %94 : vector<1x1x8xf32> to vector<1x8xf32>
    %c7_105 = arith.constant 7 : index
    %c0_106 = arith.constant 0 : index
    %c0_107 = arith.constant 0 : index
    %96 = vector.load %arg5[%c7_105, %c0_106, %c0_107] : memref<9x8x16xf32, #tpu.memory_space<vmem>>, vector<1x8x16xf32>
    %97 = vector.shape_cast %96 : vector<1x8x16xf32> to vector<8x16xf32>
    %cst_108 = arith.constant dense<0.000000e+00> : vector<1x16xf32>
    %98 = tpu.matmul %95, %97, %cst_108 {dimension_numbers = #tpu.dot_dimension_numbers<[1], [0], [0], [1], [0, 0, 1, 1], [], []>} : vector<1x8xf32>, vector<8x16xf32>, vector<1x16xf32> -> vector<1x16xf32>
    %99 = arith.addf %93, %98 : vector<1x16xf32>
    %c0_109 = arith.constant 0 : index
    %c1_110 = arith.constant 1 : index
    %c8_111 = arith.constant 8 : index
    %100 = vector.load %arg2[%c0_109, %c1_110, %c8_111] : memref<1x2x16xf32, #tpu.memory_space<vmem>>, vector<1x1x8xf32>
    %101 = vector.shape_cast %100 : vector<1x1x8xf32> to vector<1x8xf32>
    %c8_112 = arith.constant 8 : index
    %c0_113 = arith.constant 0 : index
    %c0_114 = arith.constant 0 : index
    %102 = vector.load %arg5[%c8_112, %c0_113, %c0_114] : memref<9x8x16xf32, #tpu.memory_space<vmem>>, vector<1x8x16xf32>
    %103 = vector.shape_cast %102 : vector<1x8x16xf32> to vector<8x16xf32>
    %cst_115 = arith.constant dense<0.000000e+00> : vector<1x16xf32>
    %104 = tpu.matmul %101, %103, %cst_115 {dimension_numbers = #tpu.dot_dimension_numbers<[1], [0], [0], [1], [0, 0, 1, 1], [], []>} : vector<1x8xf32>, vector<8x16xf32>, vector<1x16xf32> -> vector<1x16xf32>
    %105 = arith.addf %99, %104 : vector<1x16xf32>
    %106 = arith.maximumf %52, %105 : vector<1x16xf32>
    %c0_116 = arith.constant 0 : index
    %c0_117 = arith.constant 0 : index
    %c0_118 = arith.constant 0 : index
    %107 = vector.load %arg3[%c0_116, %c0_117, %c0_118] : memref<1x2x16xf32, #tpu.memory_space<vmem>>, vector<1x1x8xf32>
    %108 = vector.shape_cast %107 : vector<1x1x8xf32> to vector<1x8xf32>
    %c0_119 = arith.constant 0 : index
    %c0_120 = arith.constant 0 : index
    %c0_121 = arith.constant 0 : index
    %109 = vector.load %arg5[%c0_119, %c0_120, %c0_121] : memref<9x8x16xf32, #tpu.memory_space<vmem>>, vector<1x8x16xf32>
    %110 = vector.shape_cast %109 : vector<1x8x16xf32> to vector<8x16xf32>
    %cst_122 = arith.constant dense<0.000000e+00> : vector<1x16xf32>
    %111 = tpu.matmul %108, %110, %cst_122 {dimension_numbers = #tpu.dot_dimension_numbers<[1], [0], [0], [1], [0, 0, 1, 1], [], []>} : vector<1x8xf32>, vector<8x16xf32>, vector<1x16xf32> -> vector<1x16xf32>
    %c0_123 = arith.constant 0 : index
    %c0_124 = arith.constant 0 : index
    %c0_125 = arith.constant 0 : index
    %112 = vector.load %arg4[%c0_123, %c0_124, %c0_125] : memref<1x2x16xf32, #tpu.memory_space<vmem>>, vector<1x1x8xf32>
    %113 = vector.shape_cast %112 : vector<1x1x8xf32> to vector<1x8xf32>
    %c1_126 = arith.constant 1 : index
    %c0_127 = arith.constant 0 : index
    %c0_128 = arith.constant 0 : index
    %114 = vector.load %arg5[%c1_126, %c0_127, %c0_128] : memref<9x8x16xf32, #tpu.memory_space<vmem>>, vector<1x8x16xf32>
    %115 = vector.shape_cast %114 : vector<1x8x16xf32> to vector<8x16xf32>
    %cst_129 = arith.constant dense<0.000000e+00> : vector<1x16xf32>
    %116 = tpu.matmul %113, %115, %cst_129 {dimension_numbers = #tpu.dot_dimension_numbers<[1], [0], [0], [1], [0, 0, 1, 1], [], []>} : vector<1x8xf32>, vector<8x16xf32>, vector<1x16xf32> -> vector<1x16xf32>
    %117 = arith.addf %111, %116 : vector<1x16xf32>
    %c0_130 = arith.constant 0 : index
    %c0_131 = arith.constant 0 : index
    %c8_132 = arith.constant 8 : index
    %118 = vector.load %arg3[%c0_130, %c0_131, %c8_132] : memref<1x2x16xf32, #tpu.memory_space<vmem>>, vector<1x1x8xf32>
    %119 = vector.shape_cast %118 : vector<1x1x8xf32> to vector<1x8xf32>
    %c2_133 = arith.constant 2 : index
    %c0_134 = arith.constant 0 : index
    %c0_135 = arith.constant 0 : index
    %120 = vector.load %arg5[%c2_133, %c0_134, %c0_135] : memref<9x8x16xf32, #tpu.memory_space<vmem>>, vector<1x8x16xf32>
    %121 = vector.shape_cast %120 : vector<1x8x16xf32> to vector<8x16xf32>
    %cst_136 = arith.constant dense<0.000000e+00> : vector<1x16xf32>
    %122 = tpu.matmul %119, %121, %cst_136 {dimension_numbers = #tpu.dot_dimension_numbers<[1], [0], [0], [1], [0, 0, 1, 1], [], []>} : vector<1x8xf32>, vector<8x16xf32>, vector<1x16xf32> -> vector<1x16xf32>
    %123 = arith.addf %117, %122 : vector<1x16xf32>
    %c0_137 = arith.constant 0 : index
    %c1_138 = arith.constant 1 : index
    %c0_139 = arith.constant 0 : index
    %124 = vector.load %arg1[%c0_137, %c1_138, %c0_139] : memref<1x2x16xf32, #tpu.memory_space<vmem>>, vector<1x1x8xf32>
    %125 = vector.shape_cast %124 : vector<1x1x8xf32> to vector<1x8xf32>
    %c3_140 = arith.constant 3 : index
    %c0_141 = arith.constant 0 : index
    %c0_142 = arith.constant 0 : index
    %126 = vector.load %arg5[%c3_140, %c0_141, %c0_142] : memref<9x8x16xf32, #tpu.memory_space<vmem>>, vector<1x8x16xf32>
    %127 = vector.shape_cast %126 : vector<1x8x16xf32> to vector<8x16xf32>
    %cst_143 = arith.constant dense<0.000000e+00> : vector<1x16xf32>
    %128 = tpu.matmul %125, %127, %cst_143 {dimension_numbers = #tpu.dot_dimension_numbers<[1], [0], [0], [1], [0, 0, 1, 1], [], []>} : vector<1x8xf32>, vector<8x16xf32>, vector<1x16xf32> -> vector<1x16xf32>
    %129 = arith.addf %123, %128 : vector<1x16xf32>
    %c0_144 = arith.constant 0 : index
    %c1_145 = arith.constant 1 : index
    %c0_146 = arith.constant 0 : index
    %130 = vector.load %arg2[%c0_144, %c1_145, %c0_146] : memref<1x2x16xf32, #tpu.memory_space<vmem>>, vector<1x1x8xf32>
    %131 = vector.shape_cast %130 : vector<1x1x8xf32> to vector<1x8xf32>
    %c4_147 = arith.constant 4 : index
    %c0_148 = arith.constant 0 : index
    %c0_149 = arith.constant 0 : index
    %132 = vector.load %arg5[%c4_147, %c0_148, %c0_149] : memref<9x8x16xf32, #tpu.memory_space<vmem>>, vector<1x8x16xf32>
    %133 = vector.shape_cast %132 : vector<1x8x16xf32> to vector<8x16xf32>
    %cst_150 = arith.constant dense<0.000000e+00> : vector<1x16xf32>
    %134 = tpu.matmul %131, %133, %cst_150 {dimension_numbers = #tpu.dot_dimension_numbers<[1], [0], [0], [1], [0, 0, 1, 1], [], []>} : vector<1x8xf32>, vector<8x16xf32>, vector<1x16xf32> -> vector<1x16xf32>
    %135 = arith.addf %129, %134 : vector<1x16xf32>
    %c0_151 = arith.constant 0 : index
    %c1_152 = arith.constant 1 : index
    %c8_153 = arith.constant 8 : index
    %136 = vector.load %arg1[%c0_151, %c1_152, %c8_153] : memref<1x2x16xf32, #tpu.memory_space<vmem>>, vector<1x1x8xf32>
    %137 = vector.shape_cast %136 : vector<1x1x8xf32> to vector<1x8xf32>
    %c5_154 = arith.constant 5 : index
    %c0_155 = arith.constant 0 : index
    %c0_156 = arith.constant 0 : index
    %138 = vector.load %arg5[%c5_154, %c0_155, %c0_156] : memref<9x8x16xf32, #tpu.memory_space<vmem>>, vector<1x8x16xf32>
    %139 = vector.shape_cast %138 : vector<1x8x16xf32> to vector<8x16xf32>
    %cst_157 = arith.constant dense<0.000000e+00> : vector<1x16xf32>
    %140 = tpu.matmul %137, %139, %cst_157 {dimension_numbers = #tpu.dot_dimension_numbers<[1], [0], [0], [1], [0, 0, 1, 1], [], []>} : vector<1x8xf32>, vector<8x16xf32>, vector<1x16xf32> -> vector<1x16xf32>
    %141 = arith.addf %135, %140 : vector<1x16xf32>
    %c0_158 = arith.constant 0 : index
    %c1_159 = arith.constant 1 : index
    %c0_160 = arith.constant 0 : index
    %142 = vector.load %arg3[%c0_158, %c1_159, %c0_160] : memref<1x2x16xf32, #tpu.memory_space<vmem>>, vector<1x1x8xf32>
    %143 = vector.shape_cast %142 : vector<1x1x8xf32> to vector<1x8xf32>
    %c6_161 = arith.constant 6 : index
    %c0_162 = arith.constant 0 : index
    %c0_163 = arith.constant 0 : index
    %144 = vector.load %arg5[%c6_161, %c0_162, %c0_163] : memref<9x8x16xf32, #tpu.memory_space<vmem>>, vector<1x8x16xf32>
    %145 = vector.shape_cast %144 : vector<1x8x16xf32> to vector<8x16xf32>
    %cst_164 = arith.constant dense<0.000000e+00> : vector<1x16xf32>
    %146 = tpu.matmul %143, %145, %cst_164 {dimension_numbers = #tpu.dot_dimension_numbers<[1], [0], [0], [1], [0, 0, 1, 1], [], []>} : vector<1x8xf32>, vector<8x16xf32>, vector<1x16xf32> -> vector<1x16xf32>
    %147 = arith.addf %141, %146 : vector<1x16xf32>
    %c0_165 = arith.constant 0 : index
    %c1_166 = arith.constant 1 : index
    %c0_167 = arith.constant 0 : index
    %148 = vector.load %arg4[%c0_165, %c1_166, %c0_167] : memref<1x2x16xf32, #tpu.memory_space<vmem>>, vector<1x1x8xf32>
    %149 = vector.shape_cast %148 : vector<1x1x8xf32> to vector<1x8xf32>
    %c7_168 = arith.constant 7 : index
    %c0_169 = arith.constant 0 : index
    %c0_170 = arith.constant 0 : index
    %150 = vector.load %arg5[%c7_168, %c0_169, %c0_170] : memref<9x8x16xf32, #tpu.memory_space<vmem>>, vector<1x8x16xf32>
    %151 = vector.shape_cast %150 : vector<1x8x16xf32> to vector<8x16xf32>
    %cst_171 = arith.constant dense<0.000000e+00> : vector<1x16xf32>
    %152 = tpu.matmul %149, %151, %cst_171 {dimension_numbers = #tpu.dot_dimension_numbers<[1], [0], [0], [1], [0, 0, 1, 1], [], []>} : vector<1x8xf32>, vector<8x16xf32>, vector<1x16xf32> -> vector<1x16xf32>
    %153 = arith.addf %147, %152 : vector<1x16xf32>
    %c0_172 = arith.constant 0 : index
    %c1_173 = arith.constant 1 : index
    %c8_174 = arith.constant 8 : index
    %154 = vector.load %arg3[%c0_172, %c1_173, %c8_174] : memref<1x2x16xf32, #tpu.memory_space<vmem>>, vector<1x1x8xf32>
    %155 = vector.shape_cast %154 : vector<1x1x8xf32> to vector<1x8xf32>
    %c8_175 = arith.constant 8 : index
    %c0_176 = arith.constant 0 : index
    %c0_177 = arith.constant 0 : index
    %156 = vector.load %arg5[%c8_175, %c0_176, %c0_177] : memref<9x8x16xf32, #tpu.memory_space<vmem>>, vector<1x8x16xf32>
    %157 = vector.shape_cast %156 : vector<1x8x16xf32> to vector<8x16xf32>
    %cst_178 = arith.constant dense<0.000000e+00> : vector<1x16xf32>
    %158 = tpu.matmul %155, %157, %cst_178 {dimension_numbers = #tpu.dot_dimension_numbers<[1], [0], [0], [1], [0, 0, 1, 1], [], []>} : vector<1x8xf32>, vector<8x16xf32>, vector<1x16xf32> -> vector<1x16xf32>
    %159 = arith.addf %153, %158 : vector<1x16xf32>
    %160 = arith.maximumf %106, %159 : vector<1x16xf32>
    %c0_179 = arith.constant 0 : index
    %c0_180 = arith.constant 0 : index
    %c0_181 = arith.constant 0 : index
    %161 = vector.load %arg4[%c0_179, %c0_180, %c0_181] : memref<1x2x16xf32, #tpu.memory_space<vmem>>, vector<1x1x8xf32>
    %162 = vector.shape_cast %161 : vector<1x1x8xf32> to vector<1x8xf32>
    %c0_182 = arith.constant 0 : index
    %c0_183 = arith.constant 0 : index
    %c0_184 = arith.constant 0 : index
    %163 = vector.load %arg5[%c0_182, %c0_183, %c0_184] : memref<9x8x16xf32, #tpu.memory_space<vmem>>, vector<1x8x16xf32>
    %164 = vector.shape_cast %163 : vector<1x8x16xf32> to vector<8x16xf32>
    %cst_185 = arith.constant dense<0.000000e+00> : vector<1x16xf32>
    %165 = tpu.matmul %162, %164, %cst_185 {dimension_numbers = #tpu.dot_dimension_numbers<[1], [0], [0], [1], [0, 0, 1, 1], [], []>} : vector<1x8xf32>, vector<8x16xf32>, vector<1x16xf32> -> vector<1x16xf32>
    %c0_186 = arith.constant 0 : index
    %c0_187 = arith.constant 0 : index
    %c8_188 = arith.constant 8 : index
    %166 = vector.load %arg3[%c0_186, %c0_187, %c8_188] : memref<1x2x16xf32, #tpu.memory_space<vmem>>, vector<1x1x8xf32>
    %167 = vector.shape_cast %166 : vector<1x1x8xf32> to vector<1x8xf32>
    %c1_189 = arith.constant 1 : index
    %c0_190 = arith.constant 0 : index
    %c0_191 = arith.constant 0 : index
    %168 = vector.load %arg5[%c1_189, %c0_190, %c0_191] : memref<9x8x16xf32, #tpu.memory_space<vmem>>, vector<1x8x16xf32>
    %169 = vector.shape_cast %168 : vector<1x8x16xf32> to vector<8x16xf32>
    %cst_192 = arith.constant dense<0.000000e+00> : vector<1x16xf32>
    %170 = tpu.matmul %167, %169, %cst_192 {dimension_numbers = #tpu.dot_dimension_numbers<[1], [0], [0], [1], [0, 0, 1, 1], [], []>} : vector<1x8xf32>, vector<8x16xf32>, vector<1x16xf32> -> vector<1x16xf32>
    %171 = arith.addf %165, %170 : vector<1x16xf32>
    %c0_193 = arith.constant 0 : index
    %c0_194 = arith.constant 0 : index
    %c8_195 = arith.constant 8 : index
    %172 = vector.load %arg4[%c0_193, %c0_194, %c8_195] : memref<1x2x16xf32, #tpu.memory_space<vmem>>, vector<1x1x8xf32>
    %173 = vector.shape_cast %172 : vector<1x1x8xf32> to vector<1x8xf32>
    %c2_196 = arith.constant 2 : index
    %c0_197 = arith.constant 0 : index
    %c0_198 = arith.constant 0 : index
    %174 = vector.load %arg5[%c2_196, %c0_197, %c0_198] : memref<9x8x16xf32, #tpu.memory_space<vmem>>, vector<1x8x16xf32>
    %175 = vector.shape_cast %174 : vector<1x8x16xf32> to vector<8x16xf32>
    %cst_199 = arith.constant dense<0.000000e+00> : vector<1x16xf32>
    %176 = tpu.matmul %173, %175, %cst_199 {dimension_numbers = #tpu.dot_dimension_numbers<[1], [0], [0], [1], [0, 0, 1, 1], [], []>} : vector<1x8xf32>, vector<8x16xf32>, vector<1x16xf32> -> vector<1x16xf32>
    %177 = arith.addf %171, %176 : vector<1x16xf32>
    %c0_200 = arith.constant 0 : index
    %c1_201 = arith.constant 1 : index
    %c0_202 = arith.constant 0 : index
    %178 = vector.load %arg2[%c0_200, %c1_201, %c0_202] : memref<1x2x16xf32, #tpu.memory_space<vmem>>, vector<1x1x8xf32>
    %179 = vector.shape_cast %178 : vector<1x1x8xf32> to vector<1x8xf32>
    %c3_203 = arith.constant 3 : index
    %c0_204 = arith.constant 0 : index
    %c0_205 = arith.constant 0 : index
    %180 = vector.load %arg5[%c3_203, %c0_204, %c0_205] : memref<9x8x16xf32, #tpu.memory_space<vmem>>, vector<1x8x16xf32>
    %181 = vector.shape_cast %180 : vector<1x8x16xf32> to vector<8x16xf32>
    %cst_206 = arith.constant dense<0.000000e+00> : vector<1x16xf32>
    %182 = tpu.matmul %179, %181, %cst_206 {dimension_numbers = #tpu.dot_dimension_numbers<[1], [0], [0], [1], [0, 0, 1, 1], [], []>} : vector<1x8xf32>, vector<8x16xf32>, vector<1x16xf32> -> vector<1x16xf32>
    %183 = arith.addf %177, %182 : vector<1x16xf32>
    %c0_207 = arith.constant 0 : index
    %c1_208 = arith.constant 1 : index
    %c8_209 = arith.constant 8 : index
    %184 = vector.load %arg1[%c0_207, %c1_208, %c8_209] : memref<1x2x16xf32, #tpu.memory_space<vmem>>, vector<1x1x8xf32>
    %185 = vector.shape_cast %184 : vector<1x1x8xf32> to vector<1x8xf32>
    %c4_210 = arith.constant 4 : index
    %c0_211 = arith.constant 0 : index
    %c0_212 = arith.constant 0 : index
    %186 = vector.load %arg5[%c4_210, %c0_211, %c0_212] : memref<9x8x16xf32, #tpu.memory_space<vmem>>, vector<1x8x16xf32>
    %187 = vector.shape_cast %186 : vector<1x8x16xf32> to vector<8x16xf32>
    %cst_213 = arith.constant dense<0.000000e+00> : vector<1x16xf32>
    %188 = tpu.matmul %185, %187, %cst_213 {dimension_numbers = #tpu.dot_dimension_numbers<[1], [0], [0], [1], [0, 0, 1, 1], [], []>} : vector<1x8xf32>, vector<8x16xf32>, vector<1x16xf32> -> vector<1x16xf32>
    %189 = arith.addf %183, %188 : vector<1x16xf32>
    %c0_214 = arith.constant 0 : index
    %c1_215 = arith.constant 1 : index
    %c8_216 = arith.constant 8 : index
    %190 = vector.load %arg2[%c0_214, %c1_215, %c8_216] : memref<1x2x16xf32, #tpu.memory_space<vmem>>, vector<1x1x8xf32>
    %191 = vector.shape_cast %190 : vector<1x1x8xf32> to vector<1x8xf32>
    %c5_217 = arith.constant 5 : index
    %c0_218 = arith.constant 0 : index
    %c0_219 = arith.constant 0 : index
    %192 = vector.load %arg5[%c5_217, %c0_218, %c0_219] : memref<9x8x16xf32, #tpu.memory_space<vmem>>, vector<1x8x16xf32>
    %193 = vector.shape_cast %192 : vector<1x8x16xf32> to vector<8x16xf32>
    %cst_220 = arith.constant dense<0.000000e+00> : vector<1x16xf32>
    %194 = tpu.matmul %191, %193, %cst_220 {dimension_numbers = #tpu.dot_dimension_numbers<[1], [0], [0], [1], [0, 0, 1, 1], [], []>} : vector<1x8xf32>, vector<8x16xf32>, vector<1x16xf32> -> vector<1x16xf32>
    %195 = arith.addf %189, %194 : vector<1x16xf32>
    %c0_221 = arith.constant 0 : index
    %c1_222 = arith.constant 1 : index
    %c0_223 = arith.constant 0 : index
    %196 = vector.load %arg4[%c0_221, %c1_222, %c0_223] : memref<1x2x16xf32, #tpu.memory_space<vmem>>, vector<1x1x8xf32>
    %197 = vector.shape_cast %196 : vector<1x1x8xf32> to vector<1x8xf32>
    %c6_224 = arith.constant 6 : index
    %c0_225 = arith.constant 0 : index
    %c0_226 = arith.constant 0 : index
    %198 = vector.load %arg5[%c6_224, %c0_225, %c0_226] : memref<9x8x16xf32, #tpu.memory_space<vmem>>, vector<1x8x16xf32>
    %199 = vector.shape_cast %198 : vector<1x8x16xf32> to vector<8x16xf32>
    %cst_227 = arith.constant dense<0.000000e+00> : vector<1x16xf32>
    %200 = tpu.matmul %197, %199, %cst_227 {dimension_numbers = #tpu.dot_dimension_numbers<[1], [0], [0], [1], [0, 0, 1, 1], [], []>} : vector<1x8xf32>, vector<8x16xf32>, vector<1x16xf32> -> vector<1x16xf32>
    %201 = arith.addf %195, %200 : vector<1x16xf32>
    %c0_228 = arith.constant 0 : index
    %c1_229 = arith.constant 1 : index
    %c8_230 = arith.constant 8 : index
    %202 = vector.load %arg3[%c0_228, %c1_229, %c8_230] : memref<1x2x16xf32, #tpu.memory_space<vmem>>, vector<1x1x8xf32>
    %203 = vector.shape_cast %202 : vector<1x1x8xf32> to vector<1x8xf32>
    %c7_231 = arith.constant 7 : index
    %c0_232 = arith.constant 0 : index
    %c0_233 = arith.constant 0 : index
    %204 = vector.load %arg5[%c7_231, %c0_232, %c0_233] : memref<9x8x16xf32, #tpu.memory_space<vmem>>, vector<1x8x16xf32>
    %205 = vector.shape_cast %204 : vector<1x8x16xf32> to vector<8x16xf32>
    %cst_234 = arith.constant dense<0.000000e+00> : vector<1x16xf32>
    %206 = tpu.matmul %203, %205, %cst_234 {dimension_numbers = #tpu.dot_dimension_numbers<[1], [0], [0], [1], [0, 0, 1, 1], [], []>} : vector<1x8xf32>, vector<8x16xf32>, vector<1x16xf32> -> vector<1x16xf32>
    %207 = arith.addf %201, %206 : vector<1x16xf32>
    %c0_235 = arith.constant 0 : index
    %c1_236 = arith.constant 1 : index
    %c8_237 = arith.constant 8 : index
    %208 = vector.load %arg4[%c0_235, %c1_236, %c8_237] : memref<1x2x16xf32, #tpu.memory_space<vmem>>, vector<1x1x8xf32>
    %209 = vector.shape_cast %208 : vector<1x1x8xf32> to vector<1x8xf32>
    %c8_238 = arith.constant 8 : index
    %c0_239 = arith.constant 0 : index
    %c0_240 = arith.constant 0 : index
    %210 = vector.load %arg5[%c8_238, %c0_239, %c0_240] : memref<9x8x16xf32, #tpu.memory_space<vmem>>, vector<1x8x16xf32>
    %211 = vector.shape_cast %210 : vector<1x8x16xf32> to vector<8x16xf32>
    %cst_241 = arith.constant dense<0.000000e+00> : vector<1x16xf32>
    %212 = tpu.matmul %209, %211, %cst_241 {dimension_numbers = #tpu.dot_dimension_numbers<[1], [0], [0], [1], [0, 0, 1, 1], [], []>} : vector<1x8xf32>, vector<8x16xf32>, vector<1x16xf32> -> vector<1x16xf32>
    %213 = arith.addf %207, %212 : vector<1x16xf32>
    %214 = arith.maximumf %160, %213 : vector<1x16xf32>
    %c0_242 = arith.constant 0 : index
    %c0_243 = arith.constant 0 : index
    %215 = vector.load %arg6[%c0_242, %c0_243] : memref<1x16xf32, #tpu.memory_space<vmem>>, vector<1x16xf32>
    %216 = arith.addf %214, %215 : vector<1x16xf32>
    %c0_244 = arith.constant 0 : index
    %c0_245 = arith.constant 0 : index
    %c0_246 = arith.constant 0 : index
    %217 = vector.load %arg7[%c0_244, %c0_245, %c0_246] : memref<1x1x16xf32, #tpu.memory_space<vmem>>, vector<1x1x16xf32>
    %218 = vector.shape_cast %217 : vector<1x1x16xf32> to vector<1x16xf32>
    %219 = vector.shape_cast %216 : vector<1x16xf32> to vector<1x1x16xf32>
    tpu.vector_store %arg7[%c0_244, %c0_245, %c0_246], %219 {strides = array<i32>} : memref<1x1x16xf32, #tpu.memory_space<vmem>>, vector<1x1x16xf32>,
    return
  }
  func.func @transform_0(%arg0: i32) -> (i32, i32, i32) {
    %c0_i32 = arith.constant 0 : i32
    %c0_i32_0 = arith.constant 0 : i32
    %c0_i32_1 = arith.constant 0 : i32
    return %arg0, %c0_i32, %c0_i32_0 : i32, i32, i32
  }
  func.func @transform_1(%arg0: i32) -> (i32, i32, i32) {
    %c0_i32 = arith.constant 0 : i32
    %c0_i32_0 = arith.constant 0 : i32
    %c0_i32_1 = arith.constant 0 : i32
    return %arg0, %c0_i32, %c0_i32_0 : i32, i32, i32
  }
  func.func @transform_2(%arg0: i32) -> (i32, i32, i32) {
    %c0_i32 = arith.constant 0 : i32
    %c0_i32_0 = arith.constant 0 : i32
    %c0_i32_1 = arith.constant 0 : i32
    return %arg0, %c0_i32, %c0_i32_0 : i32, i32, i32
  }
  func.func @transform_3(%arg0: i32) -> (i32, i32, i32) {
    %c0_i32 = arith.constant 0 : i32
    %c0_i32_0 = arith.constant 0 : i32
    %c0_i32_1 = arith.constant 0 : i32
    return %arg0, %c0_i32, %c0_i32_0 : i32, i32, i32
  }
  func.func @transform_4(%arg0: i32) -> (i32, i32, i32) {
    %c0_i32 = arith.constant 0 : i32
    %c0_i32_0 = arith.constant 0 : i32
    %c0_i32_1 = arith.constant 0 : i32
    %c0_i32_2 = arith.constant 0 : i32
    return %c0_i32, %c0_i32_0, %c0_i32_1 : i32, i32, i32
  }
  func.func @transform_5(%arg0: i32) -> (i32, i32) {
    %c0_i32 = arith.constant 0 : i32
    %c0_i32_0 = arith.constant 0 : i32
    %c0_i32_1 = arith.constant 0 : i32
    return %c0_i32, %c0_i32_0 : i32, i32
  }
  func.func @transform_6(%arg0: i32) -> (i32, i32, i32) {
    %c0_i32 = arith.constant 0 : i32
    %c0_i32_0 = arith.constant 0 : i32
    %c0_i32_1 = arith.constant 0 : i32
    return %arg0, %c0_i32, %c0_i32_0 : i32, i32, i32
  }
}

module attributes {stable_mosaic.version = 11 : i64} {
  func.func @_blstm_stack_kernel(%arg0: memref<6x16xf32, #tpu.memory_space<vmem>>, %arg1: memref<6x16xf32, #tpu.memory_space<vmem>>, %arg2: memref<4x16x8xf32, #tpu.memory_space<vmem>>, %arg3: memref<4x1x8xf32, #tpu.memory_space<vmem>>, %arg4: memref<4x8x8xf32, #tpu.memory_space<vmem>>, %arg5: memref<4x1x8xf32, #tpu.memory_space<vmem>>, %arg6: memref<4x8x8xf32, #tpu.memory_space<vmem>>, %arg7: memref<4x1x8xf32, #tpu.memory_space<vmem>>, %arg8: memref<4x8x8xf32, #tpu.memory_space<vmem>>, %arg9: memref<4x1x8xf32, #tpu.memory_space<vmem>>, %arg10: memref<4x16x8xf32, #tpu.memory_space<vmem>>, %arg11: memref<4x1x8xf32, #tpu.memory_space<vmem>>, %arg12: memref<4x8x8xf32, #tpu.memory_space<vmem>>, %arg13: memref<4x1x8xf32, #tpu.memory_space<vmem>>, %arg14: memref<4x8x8xf32, #tpu.memory_space<vmem>>, %arg15: memref<4x1x8xf32, #tpu.memory_space<vmem>>, %arg16: memref<4x8x8xf32, #tpu.memory_space<vmem>>, %arg17: memref<4x1x8xf32, #tpu.memory_space<vmem>>, %arg18: memref<6x16xf32, #tpu.memory_space<vmem>>) attributes {dimension_semantics = [], scalar_prefetch = 0 : i64, scratch_operands = 0 : i64, tpu.core_type = #tpu.core_type<tc>} {
    %c0 = arith.constant 0 : index
    %c0_0 = arith.constant 0 : index
    %0 = vector.load %arg0[%c0, %c0_0] : memref<6x16xf32, #tpu.memory_space<vmem>>, vector<6x16xf32>
    %c0_1 = arith.constant 0 : index
    %c0_2 = arith.constant 0 : index
    %c0_3 = arith.constant 0 : index
    %1 = vector.load %arg2[%c0_1, %c0_2, %c0_3] : memref<4x16x8xf32, #tpu.memory_space<vmem>>, vector<1x16x8xf32>
    %2 = vector.shape_cast %1 : vector<1x16x8xf32> to vector<16x8xf32>
    %cst = arith.constant dense<0.000000e+00> : vector<6x8xf32>
    %3 = tpu.matmul %0, %2, %cst {dimension_numbers = #tpu.dot_dimension_numbers<[1], [0], [0], [1], [0, 0, 1, 1], [], []>} : vector<6x16xf32>, vector<16x8xf32>, vector<6x8xf32> -> vector<6x8xf32>
    %c0_4 = arith.constant 0 : index
    %c0_5 = arith.constant 0 : index
    %c0_6 = arith.constant 0 : index
    %4 = vector.load %arg3[%c0_4, %c0_5, %c0_6] : memref<4x1x8xf32, #tpu.memory_space<vmem>>, vector<1x1x8xf32>
    %5 = vector.shape_cast %4 : vector<1x1x8xf32> to vector<1x8xf32>
    %6 = vector.broadcast %5 : vector<1x8xf32> to vector<6x8xf32>
    %7 = arith.addf %3, %6 : vector<6x8xf32>
    %8 = arith.negf %7 : vector<6x8xf32>
    %9 = math.exp %8 : vector<6x8xf32>
    %cst_7 = arith.constant 1.000000e+00 : f32
    %10 = vector.broadcast %cst_7 : f32 to vector<6x8xf32>
    %11 = arith.addf %10, %9 : vector<6x8xf32>
    %12 = arith.divf %10, %11 : vector<6x8xf32>
    %c2 = arith.constant 2 : index
    %c0_8 = arith.constant 0 : index
    %c0_9 = arith.constant 0 : index
    %13 = vector.load %arg2[%c2, %c0_8, %c0_9] : memref<4x16x8xf32, #tpu.memory_space<vmem>>, vector<1x16x8xf32>
    %14 = vector.shape_cast %13 : vector<1x16x8xf32> to vector<16x8xf32>
    %cst_10 = arith.constant dense<0.000000e+00> : vector<6x8xf32>
    %15 = tpu.matmul %0, %14, %cst_10 {dimension_numbers = #tpu.dot_dimension_numbers<[1], [0], [0], [1], [0, 0, 1, 1], [], []>} : vector<6x16xf32>, vector<16x8xf32>, vector<6x8xf32> -> vector<6x8xf32>
    %c2_11 = arith.constant 2 : index
    %c0_12 = arith.constant 0 : index
    %c0_13 = arith.constant 0 : index
    %16 = vector.load %arg3[%c2_11, %c0_12, %c0_13] : memref<4x1x8xf32, #tpu.memory_space<vmem>>, vector<1x1x8xf32>
    %17 = vector.shape_cast %16 : vector<1x1x8xf32> to vector<1x8xf32>
    %18 = vector.broadcast %17 : vector<1x8xf32> to vector<6x8xf32>
    %19 = arith.addf %15, %18 : vector<6x8xf32>
    %20 = arith.negf %19 : vector<6x8xf32>
    %21 = math.exp %20 : vector<6x8xf32>
    %cst_14 = arith.constant 1.000000e+00 : f32
    %22 = vector.broadcast %cst_14 : f32 to vector<6x8xf32>
    %23 = arith.addf %22, %21 : vector<6x8xf32>
    %24 = arith.divf %22, %23 : vector<6x8xf32>
    %c3 = arith.constant 3 : index
    %c0_15 = arith.constant 0 : index
    %c0_16 = arith.constant 0 : index
    %25 = vector.load %arg2[%c3, %c0_15, %c0_16] : memref<4x16x8xf32, #tpu.memory_space<vmem>>, vector<1x16x8xf32>
    %26 = vector.shape_cast %25 : vector<1x16x8xf32> to vector<16x8xf32>
    %cst_17 = arith.constant dense<0.000000e+00> : vector<6x8xf32>
    %27 = tpu.matmul %0, %26, %cst_17 {dimension_numbers = #tpu.dot_dimension_numbers<[1], [0], [0], [1], [0, 0, 1, 1], [], []>} : vector<6x16xf32>, vector<16x8xf32>, vector<6x8xf32> -> vector<6x8xf32>
    %c3_18 = arith.constant 3 : index
    %c0_19 = arith.constant 0 : index
    %c0_20 = arith.constant 0 : index
    %28 = vector.load %arg3[%c3_18, %c0_19, %c0_20] : memref<4x1x8xf32, #tpu.memory_space<vmem>>, vector<1x1x8xf32>
    %29 = vector.shape_cast %28 : vector<1x1x8xf32> to vector<1x8xf32>
    %30 = vector.broadcast %29 : vector<1x8xf32> to vector<6x8xf32>
    %31 = arith.addf %27, %30 : vector<6x8xf32>
    %32 = math.tanh %31 : vector<6x8xf32>
    %33 = arith.mulf %12, %32 : vector<6x8xf32>
    %34 = math.tanh %33 : vector<6x8xf32>
    %35 = arith.mulf %24, %34 : vector<6x8xf32>
    %c0_21 = arith.constant 0 : index
    %c0_22 = arith.constant 0 : index
    %c0_23 = arith.constant 0 : index
    %36 = vector.load %arg4[%c0_21, %c0_22, %c0_23] : memref<4x8x8xf32, #tpu.memory_space<vmem>>, vector<1x8x8xf32>
    %37 = vector.shape_cast %36 : vector<1x8x8xf32> to vector<8x8xf32>
    %cst_24 = arith.constant dense<0.000000e+00> : vector<6x8xf32>
    %38 = tpu.matmul %35, %37, %cst_24 {dimension_numbers = #tpu.dot_dimension_numbers<[1], [0], [0], [1], [0, 0, 1, 1], [], []>} : vector<6x8xf32>, vector<8x8xf32>, vector<6x8xf32> -> vector<6x8xf32>
    %c0_25 = arith.constant 0 : index
    %c0_26 = arith.constant 0 : index
    %c0_27 = arith.constant 0 : index
    %39 = vector.load %arg5[%c0_25, %c0_26, %c0_27] : memref<4x1x8xf32, #tpu.memory_space<vmem>>, vector<1x1x8xf32>
    %40 = vector.shape_cast %39 : vector<1x1x8xf32> to vector<1x8xf32>
    %41 = vector.broadcast %40 : vector<1x8xf32> to vector<6x8xf32>
    %42 = arith.addf %38, %41 : vector<6x8xf32>
    %43 = arith.negf %42 : vector<6x8xf32>
    %44 = math.exp %43 : vector<6x8xf32>
    %cst_28 = arith.constant 1.000000e+00 : f32
    %45 = vector.broadcast %cst_28 : f32 to vector<6x8xf32>
    %46 = arith.addf %45, %44 : vector<6x8xf32>
    %47 = arith.divf %45, %46 : vector<6x8xf32>
    %c2_29 = arith.constant 2 : index
    %c0_30 = arith.constant 0 : index
    %c0_31 = arith.constant 0 : index
    %48 = vector.load %arg4[%c2_29, %c0_30, %c0_31] : memref<4x8x8xf32, #tpu.memory_space<vmem>>, vector<1x8x8xf32>
    %49 = vector.shape_cast %48 : vector<1x8x8xf32> to vector<8x8xf32>
    %cst_32 = arith.constant dense<0.000000e+00> : vector<6x8xf32>
    %50 = tpu.matmul %35, %49, %cst_32 {dimension_numbers = #tpu.dot_dimension_numbers<[1], [0], [0], [1], [0, 0, 1, 1], [], []>} : vector<6x8xf32>, vector<8x8xf32>, vector<6x8xf32> -> vector<6x8xf32>
    %c2_33 = arith.constant 2 : index
    %c0_34 = arith.constant 0 : index
    %c0_35 = arith.constant 0 : index
    %51 = vector.load %arg5[%c2_33, %c0_34, %c0_35] : memref<4x1x8xf32, #tpu.memory_space<vmem>>, vector<1x1x8xf32>
    %52 = vector.shape_cast %51 : vector<1x1x8xf32> to vector<1x8xf32>
    %53 = vector.broadcast %52 : vector<1x8xf32> to vector<6x8xf32>
    %54 = arith.addf %50, %53 : vector<6x8xf32>
    %55 = arith.negf %54 : vector<6x8xf32>
    %56 = math.exp %55 : vector<6x8xf32>
    %cst_36 = arith.constant 1.000000e+00 : f32
    %57 = vector.broadcast %cst_36 : f32 to vector<6x8xf32>
    %58 = arith.addf %57, %56 : vector<6x8xf32>
    %59 = arith.divf %57, %58 : vector<6x8xf32>
    %c3_37 = arith.constant 3 : index
    %c0_38 = arith.constant 0 : index
    %c0_39 = arith.constant 0 : index
    %60 = vector.load %arg4[%c3_37, %c0_38, %c0_39] : memref<4x8x8xf32, #tpu.memory_space<vmem>>, vector<1x8x8xf32>
    %61 = vector.shape_cast %60 : vector<1x8x8xf32> to vector<8x8xf32>
    %cst_40 = arith.constant dense<0.000000e+00> : vector<6x8xf32>
    %62 = tpu.matmul %35, %61, %cst_40 {dimension_numbers = #tpu.dot_dimension_numbers<[1], [0], [0], [1], [0, 0, 1, 1], [], []>} : vector<6x8xf32>, vector<8x8xf32>, vector<6x8xf32> -> vector<6x8xf32>
    %c3_41 = arith.constant 3 : index
    %c0_42 = arith.constant 0 : index
    %c0_43 = arith.constant 0 : index
    %63 = vector.load %arg5[%c3_41, %c0_42, %c0_43] : memref<4x1x8xf32, #tpu.memory_space<vmem>>, vector<1x1x8xf32>
    %64 = vector.shape_cast %63 : vector<1x1x8xf32> to vector<1x8xf32>
    %65 = vector.broadcast %64 : vector<1x8xf32> to vector<6x8xf32>
    %66 = arith.addf %62, %65 : vector<6x8xf32>
    %67 = math.tanh %66 : vector<6x8xf32>
    %68 = arith.mulf %47, %67 : vector<6x8xf32>
    %69 = math.tanh %68 : vector<6x8xf32>
    %70 = arith.mulf %59, %69 : vector<6x8xf32>
    %c0_44 = arith.constant 0 : index
    %c0_45 = arith.constant 0 : index
    %c0_46 = arith.constant 0 : index
    %71 = vector.load %arg6[%c0_44, %c0_45, %c0_46] : memref<4x8x8xf32, #tpu.memory_space<vmem>>, vector<1x8x8xf32>
    %72 = vector.shape_cast %71 : vector<1x8x8xf32> to vector<8x8xf32>
    %cst_47 = arith.constant dense<0.000000e+00> : vector<6x8xf32>
    %73 = tpu.matmul %70, %72, %cst_47 {dimension_numbers = #tpu.dot_dimension_numbers<[1], [0], [0], [1], [0, 0, 1, 1], [], []>} : vector<6x8xf32>, vector<8x8xf32>, vector<6x8xf32> -> vector<6x8xf32>
    %c0_48 = arith.constant 0 : index
    %c0_49 = arith.constant 0 : index
    %c0_50 = arith.constant 0 : index
    %74 = vector.load %arg7[%c0_48, %c0_49, %c0_50] : memref<4x1x8xf32, #tpu.memory_space<vmem>>, vector<1x1x8xf32>
    %75 = vector.shape_cast %74 : vector<1x1x8xf32> to vector<1x8xf32>
    %76 = vector.broadcast %75 : vector<1x8xf32> to vector<6x8xf32>
    %77 = arith.addf %73, %76 : vector<6x8xf32>
    %78 = arith.negf %77 : vector<6x8xf32>
    %79 = math.exp %78 : vector<6x8xf32>
    %cst_51 = arith.constant 1.000000e+00 : f32
    %80 = vector.broadcast %cst_51 : f32 to vector<6x8xf32>
    %81 = arith.addf %80, %79 : vector<6x8xf32>
    %82 = arith.divf %80, %81 : vector<6x8xf32>
    %c2_52 = arith.constant 2 : index
    %c0_53 = arith.constant 0 : index
    %c0_54 = arith.constant 0 : index
    %83 = vector.load %arg6[%c2_52, %c0_53, %c0_54] : memref<4x8x8xf32, #tpu.memory_space<vmem>>, vector<1x8x8xf32>
    %84 = vector.shape_cast %83 : vector<1x8x8xf32> to vector<8x8xf32>
    %cst_55 = arith.constant dense<0.000000e+00> : vector<6x8xf32>
    %85 = tpu.matmul %70, %84, %cst_55 {dimension_numbers = #tpu.dot_dimension_numbers<[1], [0], [0], [1], [0, 0, 1, 1], [], []>} : vector<6x8xf32>, vector<8x8xf32>, vector<6x8xf32> -> vector<6x8xf32>
    %c2_56 = arith.constant 2 : index
    %c0_57 = arith.constant 0 : index
    %c0_58 = arith.constant 0 : index
    %86 = vector.load %arg7[%c2_56, %c0_57, %c0_58] : memref<4x1x8xf32, #tpu.memory_space<vmem>>, vector<1x1x8xf32>
    %87 = vector.shape_cast %86 : vector<1x1x8xf32> to vector<1x8xf32>
    %88 = vector.broadcast %87 : vector<1x8xf32> to vector<6x8xf32>
    %89 = arith.addf %85, %88 : vector<6x8xf32>
    %90 = arith.negf %89 : vector<6x8xf32>
    %91 = math.exp %90 : vector<6x8xf32>
    %cst_59 = arith.constant 1.000000e+00 : f32
    %92 = vector.broadcast %cst_59 : f32 to vector<6x8xf32>
    %93 = arith.addf %92, %91 : vector<6x8xf32>
    %94 = arith.divf %92, %93 : vector<6x8xf32>
    %c3_60 = arith.constant 3 : index
    %c0_61 = arith.constant 0 : index
    %c0_62 = arith.constant 0 : index
    %95 = vector.load %arg6[%c3_60, %c0_61, %c0_62] : memref<4x8x8xf32, #tpu.memory_space<vmem>>, vector<1x8x8xf32>
    %96 = vector.shape_cast %95 : vector<1x8x8xf32> to vector<8x8xf32>
    %cst_63 = arith.constant dense<0.000000e+00> : vector<6x8xf32>
    %97 = tpu.matmul %70, %96, %cst_63 {dimension_numbers = #tpu.dot_dimension_numbers<[1], [0], [0], [1], [0, 0, 1, 1], [], []>} : vector<6x8xf32>, vector<8x8xf32>, vector<6x8xf32> -> vector<6x8xf32>
    %c3_64 = arith.constant 3 : index
    %c0_65 = arith.constant 0 : index
    %c0_66 = arith.constant 0 : index
    %98 = vector.load %arg7[%c3_64, %c0_65, %c0_66] : memref<4x1x8xf32, #tpu.memory_space<vmem>>, vector<1x1x8xf32>
    %99 = vector.shape_cast %98 : vector<1x1x8xf32> to vector<1x8xf32>
    %100 = vector.broadcast %99 : vector<1x8xf32> to vector<6x8xf32>
    %101 = arith.addf %97, %100 : vector<6x8xf32>
    %102 = math.tanh %101 : vector<6x8xf32>
    %103 = arith.mulf %82, %102 : vector<6x8xf32>
    %104 = math.tanh %103 : vector<6x8xf32>
    %105 = arith.mulf %94, %104 : vector<6x8xf32>
    %c0_67 = arith.constant 0 : index
    %c0_68 = arith.constant 0 : index
    %c0_69 = arith.constant 0 : index
    %106 = vector.load %arg8[%c0_67, %c0_68, %c0_69] : memref<4x8x8xf32, #tpu.memory_space<vmem>>, vector<1x8x8xf32>
    %107 = vector.shape_cast %106 : vector<1x8x8xf32> to vector<8x8xf32>
    %cst_70 = arith.constant dense<0.000000e+00> : vector<6x8xf32>
    %108 = tpu.matmul %105, %107, %cst_70 {dimension_numbers = #tpu.dot_dimension_numbers<[1], [0], [0], [1], [0, 0, 1, 1], [], []>} : vector<6x8xf32>, vector<8x8xf32>, vector<6x8xf32> -> vector<6x8xf32>
    %c0_71 = arith.constant 0 : index
    %c0_72 = arith.constant 0 : index
    %c0_73 = arith.constant 0 : index
    %109 = vector.load %arg9[%c0_71, %c0_72, %c0_73] : memref<4x1x8xf32, #tpu.memory_space<vmem>>, vector<1x1x8xf32>
    %110 = vector.shape_cast %109 : vector<1x1x8xf32> to vector<1x8xf32>
    %111 = vector.broadcast %110 : vector<1x8xf32> to vector<6x8xf32>
    %112 = arith.addf %108, %111 : vector<6x8xf32>
    %113 = arith.negf %112 : vector<6x8xf32>
    %114 = math.exp %113 : vector<6x8xf32>
    %cst_74 = arith.constant 1.000000e+00 : f32
    %115 = vector.broadcast %cst_74 : f32 to vector<6x8xf32>
    %116 = arith.addf %115, %114 : vector<6x8xf32>
    %117 = arith.divf %115, %116 : vector<6x8xf32>
    %c2_75 = arith.constant 2 : index
    %c0_76 = arith.constant 0 : index
    %c0_77 = arith.constant 0 : index
    %118 = vector.load %arg8[%c2_75, %c0_76, %c0_77] : memref<4x8x8xf32, #tpu.memory_space<vmem>>, vector<1x8x8xf32>
    %119 = vector.shape_cast %118 : vector<1x8x8xf32> to vector<8x8xf32>
    %cst_78 = arith.constant dense<0.000000e+00> : vector<6x8xf32>
    %120 = tpu.matmul %105, %119, %cst_78 {dimension_numbers = #tpu.dot_dimension_numbers<[1], [0], [0], [1], [0, 0, 1, 1], [], []>} : vector<6x8xf32>, vector<8x8xf32>, vector<6x8xf32> -> vector<6x8xf32>
    %c2_79 = arith.constant 2 : index
    %c0_80 = arith.constant 0 : index
    %c0_81 = arith.constant 0 : index
    %121 = vector.load %arg9[%c2_79, %c0_80, %c0_81] : memref<4x1x8xf32, #tpu.memory_space<vmem>>, vector<1x1x8xf32>
    %122 = vector.shape_cast %121 : vector<1x1x8xf32> to vector<1x8xf32>
    %123 = vector.broadcast %122 : vector<1x8xf32> to vector<6x8xf32>
    %124 = arith.addf %120, %123 : vector<6x8xf32>
    %125 = arith.negf %124 : vector<6x8xf32>
    %126 = math.exp %125 : vector<6x8xf32>
    %cst_82 = arith.constant 1.000000e+00 : f32
    %127 = vector.broadcast %cst_82 : f32 to vector<6x8xf32>
    %128 = arith.addf %127, %126 : vector<6x8xf32>
    %129 = arith.divf %127, %128 : vector<6x8xf32>
    %c3_83 = arith.constant 3 : index
    %c0_84 = arith.constant 0 : index
    %c0_85 = arith.constant 0 : index
    %130 = vector.load %arg8[%c3_83, %c0_84, %c0_85] : memref<4x8x8xf32, #tpu.memory_space<vmem>>, vector<1x8x8xf32>
    %131 = vector.shape_cast %130 : vector<1x8x8xf32> to vector<8x8xf32>
    %cst_86 = arith.constant dense<0.000000e+00> : vector<6x8xf32>
    %132 = tpu.matmul %105, %131, %cst_86 {dimension_numbers = #tpu.dot_dimension_numbers<[1], [0], [0], [1], [0, 0, 1, 1], [], []>} : vector<6x8xf32>, vector<8x8xf32>, vector<6x8xf32> -> vector<6x8xf32>
    %c3_87 = arith.constant 3 : index
    %c0_88 = arith.constant 0 : index
    %c0_89 = arith.constant 0 : index
    %133 = vector.load %arg9[%c3_87, %c0_88, %c0_89] : memref<4x1x8xf32, #tpu.memory_space<vmem>>, vector<1x1x8xf32>
    %134 = vector.shape_cast %133 : vector<1x1x8xf32> to vector<1x8xf32>
    %135 = vector.broadcast %134 : vector<1x8xf32> to vector<6x8xf32>
    %136 = arith.addf %132, %135 : vector<6x8xf32>
    %137 = math.tanh %136 : vector<6x8xf32>
    %138 = arith.mulf %117, %137 : vector<6x8xf32>
    %139 = math.tanh %138 : vector<6x8xf32>
    %140 = arith.mulf %129, %139 : vector<6x8xf32>
    %c0_90 = arith.constant 0 : index
    %c0_91 = arith.constant 0 : index
    %141 = vector.load %arg1[%c0_90, %c0_91] : memref<6x16xf32, #tpu.memory_space<vmem>>, vector<6x16xf32>
    %c0_92 = arith.constant 0 : index
    %c0_93 = arith.constant 0 : index
    %c0_94 = arith.constant 0 : index
    %142 = vector.load %arg10[%c0_92, %c0_93, %c0_94] : memref<4x16x8xf32, #tpu.memory_space<vmem>>, vector<1x16x8xf32>
    %143 = vector.shape_cast %142 : vector<1x16x8xf32> to vector<16x8xf32>
    %cst_95 = arith.constant dense<0.000000e+00> : vector<6x8xf32>
    %144 = tpu.matmul %141, %143, %cst_95 {dimension_numbers = #tpu.dot_dimension_numbers<[1], [0], [0], [1], [0, 0, 1, 1], [], []>} : vector<6x16xf32>, vector<16x8xf32>, vector<6x8xf32> -> vector<6x8xf32>
    %c0_96 = arith.constant 0 : index
    %c0_97 = arith.constant 0 : index
    %c0_98 = arith.constant 0 : index
    %145 = vector.load %arg11[%c0_96, %c0_97, %c0_98] : memref<4x1x8xf32, #tpu.memory_space<vmem>>, vector<1x1x8xf32>
    %146 = vector.shape_cast %145 : vector<1x1x8xf32> to vector<1x8xf32>
    %147 = vector.broadcast %146 : vector<1x8xf32> to vector<6x8xf32>
    %148 = arith.addf %144, %147 : vector<6x8xf32>
    %149 = arith.negf %148 : vector<6x8xf32>
    %150 = math.exp %149 : vector<6x8xf32>
    %cst_99 = arith.constant 1.000000e+00 : f32
    %151 = vector.broadcast %cst_99 : f32 to vector<6x8xf32>
    %152 = arith.addf %151, %150 : vector<6x8xf32>
    %153 = arith.divf %151, %152 : vector<6x8xf32>
    %c2_100 = arith.constant 2 : index
    %c0_101 = arith.constant 0 : index
    %c0_102 = arith.constant 0 : index
    %154 = vector.load %arg10[%c2_100, %c0_101, %c0_102] : memref<4x16x8xf32, #tpu.memory_space<vmem>>, vector<1x16x8xf32>
    %155 = vector.shape_cast %154 : vector<1x16x8xf32> to vector<16x8xf32>
    %cst_103 = arith.constant dense<0.000000e+00> : vector<6x8xf32>
    %156 = tpu.matmul %141, %155, %cst_103 {dimension_numbers = #tpu.dot_dimension_numbers<[1], [0], [0], [1], [0, 0, 1, 1], [], []>} : vector<6x16xf32>, vector<16x8xf32>, vector<6x8xf32> -> vector<6x8xf32>
    %c2_104 = arith.constant 2 : index
    %c0_105 = arith.constant 0 : index
    %c0_106 = arith.constant 0 : index
    %157 = vector.load %arg11[%c2_104, %c0_105, %c0_106] : memref<4x1x8xf32, #tpu.memory_space<vmem>>, vector<1x1x8xf32>
    %158 = vector.shape_cast %157 : vector<1x1x8xf32> to vector<1x8xf32>
    %159 = vector.broadcast %158 : vector<1x8xf32> to vector<6x8xf32>
    %160 = arith.addf %156, %159 : vector<6x8xf32>
    %161 = arith.negf %160 : vector<6x8xf32>
    %162 = math.exp %161 : vector<6x8xf32>
    %cst_107 = arith.constant 1.000000e+00 : f32
    %163 = vector.broadcast %cst_107 : f32 to vector<6x8xf32>
    %164 = arith.addf %163, %162 : vector<6x8xf32>
    %165 = arith.divf %163, %164 : vector<6x8xf32>
    %c3_108 = arith.constant 3 : index
    %c0_109 = arith.constant 0 : index
    %c0_110 = arith.constant 0 : index
    %166 = vector.load %arg10[%c3_108, %c0_109, %c0_110] : memref<4x16x8xf32, #tpu.memory_space<vmem>>, vector<1x16x8xf32>
    %167 = vector.shape_cast %166 : vector<1x16x8xf32> to vector<16x8xf32>
    %cst_111 = arith.constant dense<0.000000e+00> : vector<6x8xf32>
    %168 = tpu.matmul %141, %167, %cst_111 {dimension_numbers = #tpu.dot_dimension_numbers<[1], [0], [0], [1], [0, 0, 1, 1], [], []>} : vector<6x16xf32>, vector<16x8xf32>, vector<6x8xf32> -> vector<6x8xf32>
    %c3_112 = arith.constant 3 : index
    %c0_113 = arith.constant 0 : index
    %c0_114 = arith.constant 0 : index
    %169 = vector.load %arg11[%c3_112, %c0_113, %c0_114] : memref<4x1x8xf32, #tpu.memory_space<vmem>>, vector<1x1x8xf32>
    %170 = vector.shape_cast %169 : vector<1x1x8xf32> to vector<1x8xf32>
    %171 = vector.broadcast %170 : vector<1x8xf32> to vector<6x8xf32>
    %172 = arith.addf %168, %171 : vector<6x8xf32>
    %173 = math.tanh %172 : vector<6x8xf32>
    %174 = arith.mulf %153, %173 : vector<6x8xf32>
    %175 = math.tanh %174 : vector<6x8xf32>
    %176 = arith.mulf %165, %175 : vector<6x8xf32>
    %c0_115 = arith.constant 0 : index
    %c0_116 = arith.constant 0 : index
    %c0_117 = arith.constant 0 : index
    %177 = vector.load %arg12[%c0_115, %c0_116, %c0_117] : memref<4x8x8xf32, #tpu.memory_space<vmem>>, vector<1x8x8xf32>
    %178 = vector.shape_cast %177 : vector<1x8x8xf32> to vector<8x8xf32>
    %cst_118 = arith.constant dense<0.000000e+00> : vector<6x8xf32>
    %179 = tpu.matmul %176, %178, %cst_118 {dimension_numbers = #tpu.dot_dimension_numbers<[1], [0], [0], [1], [0, 0, 1, 1], [], []>} : vector<6x8xf32>, vector<8x8xf32>, vector<6x8xf32> -> vector<6x8xf32>
    %c0_119 = arith.constant 0 : index
    %c0_120 = arith.constant 0 : index
    %c0_121 = arith.constant 0 : index
    %180 = vector.load %arg13[%c0_119, %c0_120, %c0_121] : memref<4x1x8xf32, #tpu.memory_space<vmem>>, vector<1x1x8xf32>
    %181 = vector.shape_cast %180 : vector<1x1x8xf32> to vector<1x8xf32>
    %182 = vector.broadcast %181 : vector<1x8xf32> to vector<6x8xf32>
    %183 = arith.addf %179, %182 : vector<6x8xf32>
    %184 = arith.negf %183 : vector<6x8xf32>
    %185 = math.exp %184 : vector<6x8xf32>
    %cst_122 = arith.constant 1.000000e+00 : f32
    %186 = vector.broadcast %cst_122 : f32 to vector<6x8xf32>
    %187 = arith.addf %186, %185 : vector<6x8xf32>
    %188 = arith.divf %186, %187 : vector<6x8xf32>
    %c2_123 = arith.constant 2 : index
    %c0_124 = arith.constant 0 : index
    %c0_125 = arith.constant 0 : index
    %189 = vector.load %arg12[%c2_123, %c0_124, %c0_125] : memref<4x8x8xf32, #tpu.memory_space<vmem>>, vector<1x8x8xf32>
    %190 = vector.shape_cast %189 : vector<1x8x8xf32> to vector<8x8xf32>
    %cst_126 = arith.constant dense<0.000000e+00> : vector<6x8xf32>
    %191 = tpu.matmul %176, %190, %cst_126 {dimension_numbers = #tpu.dot_dimension_numbers<[1], [0], [0], [1], [0, 0, 1, 1], [], []>} : vector<6x8xf32>, vector<8x8xf32>, vector<6x8xf32> -> vector<6x8xf32>
    %c2_127 = arith.constant 2 : index
    %c0_128 = arith.constant 0 : index
    %c0_129 = arith.constant 0 : index
    %192 = vector.load %arg13[%c2_127, %c0_128, %c0_129] : memref<4x1x8xf32, #tpu.memory_space<vmem>>, vector<1x1x8xf32>
    %193 = vector.shape_cast %192 : vector<1x1x8xf32> to vector<1x8xf32>
    %194 = vector.broadcast %193 : vector<1x8xf32> to vector<6x8xf32>
    %195 = arith.addf %191, %194 : vector<6x8xf32>
    %196 = arith.negf %195 : vector<6x8xf32>
    %197 = math.exp %196 : vector<6x8xf32>
    %cst_130 = arith.constant 1.000000e+00 : f32
    %198 = vector.broadcast %cst_130 : f32 to vector<6x8xf32>
    %199 = arith.addf %198, %197 : vector<6x8xf32>
    %200 = arith.divf %198, %199 : vector<6x8xf32>
    %c3_131 = arith.constant 3 : index
    %c0_132 = arith.constant 0 : index
    %c0_133 = arith.constant 0 : index
    %201 = vector.load %arg12[%c3_131, %c0_132, %c0_133] : memref<4x8x8xf32, #tpu.memory_space<vmem>>, vector<1x8x8xf32>
    %202 = vector.shape_cast %201 : vector<1x8x8xf32> to vector<8x8xf32>
    %cst_134 = arith.constant dense<0.000000e+00> : vector<6x8xf32>
    %203 = tpu.matmul %176, %202, %cst_134 {dimension_numbers = #tpu.dot_dimension_numbers<[1], [0], [0], [1], [0, 0, 1, 1], [], []>} : vector<6x8xf32>, vector<8x8xf32>, vector<6x8xf32> -> vector<6x8xf32>
    %c3_135 = arith.constant 3 : index
    %c0_136 = arith.constant 0 : index
    %c0_137 = arith.constant 0 : index
    %204 = vector.load %arg13[%c3_135, %c0_136, %c0_137] : memref<4x1x8xf32, #tpu.memory_space<vmem>>, vector<1x1x8xf32>
    %205 = vector.shape_cast %204 : vector<1x1x8xf32> to vector<1x8xf32>
    %206 = vector.broadcast %205 : vector<1x8xf32> to vector<6x8xf32>
    %207 = arith.addf %203, %206 : vector<6x8xf32>
    %208 = math.tanh %207 : vector<6x8xf32>
    %209 = arith.mulf %188, %208 : vector<6x8xf32>
    %210 = math.tanh %209 : vector<6x8xf32>
    %211 = arith.mulf %200, %210 : vector<6x8xf32>
    %c0_138 = arith.constant 0 : index
    %c0_139 = arith.constant 0 : index
    %c0_140 = arith.constant 0 : index
    %212 = vector.load %arg14[%c0_138, %c0_139, %c0_140] : memref<4x8x8xf32, #tpu.memory_space<vmem>>, vector<1x8x8xf32>
    %213 = vector.shape_cast %212 : vector<1x8x8xf32> to vector<8x8xf32>
    %cst_141 = arith.constant dense<0.000000e+00> : vector<6x8xf32>
    %214 = tpu.matmul %211, %213, %cst_141 {dimension_numbers = #tpu.dot_dimension_numbers<[1], [0], [0], [1], [0, 0, 1, 1], [], []>} : vector<6x8xf32>, vector<8x8xf32>, vector<6x8xf32> -> vector<6x8xf32>
    %c0_142 = arith.constant 0 : index
    %c0_143 = arith.constant 0 : index
    %c0_144 = arith.constant 0 : index
    %215 = vector.load %arg15[%c0_142, %c0_143, %c0_144] : memref<4x1x8xf32, #tpu.memory_space<vmem>>, vector<1x1x8xf32>
    %216 = vector.shape_cast %215 : vector<1x1x8xf32> to vector<1x8xf32>
    %217 = vector.broadcast %216 : vector<1x8xf32> to vector<6x8xf32>
    %218 = arith.addf %214, %217 : vector<6x8xf32>
    %219 = arith.negf %218 : vector<6x8xf32>
    %220 = math.exp %219 : vector<6x8xf32>
    %cst_145 = arith.constant 1.000000e+00 : f32
    %221 = vector.broadcast %cst_145 : f32 to vector<6x8xf32>
    %222 = arith.addf %221, %220 : vector<6x8xf32>
    %223 = arith.divf %221, %222 : vector<6x8xf32>
    %c2_146 = arith.constant 2 : index
    %c0_147 = arith.constant 0 : index
    %c0_148 = arith.constant 0 : index
    %224 = vector.load %arg14[%c2_146, %c0_147, %c0_148] : memref<4x8x8xf32, #tpu.memory_space<vmem>>, vector<1x8x8xf32>
    %225 = vector.shape_cast %224 : vector<1x8x8xf32> to vector<8x8xf32>
    %cst_149 = arith.constant dense<0.000000e+00> : vector<6x8xf32>
    %226 = tpu.matmul %211, %225, %cst_149 {dimension_numbers = #tpu.dot_dimension_numbers<[1], [0], [0], [1], [0, 0, 1, 1], [], []>} : vector<6x8xf32>, vector<8x8xf32>, vector<6x8xf32> -> vector<6x8xf32>
    %c2_150 = arith.constant 2 : index
    %c0_151 = arith.constant 0 : index
    %c0_152 = arith.constant 0 : index
    %227 = vector.load %arg15[%c2_150, %c0_151, %c0_152] : memref<4x1x8xf32, #tpu.memory_space<vmem>>, vector<1x1x8xf32>
    %228 = vector.shape_cast %227 : vector<1x1x8xf32> to vector<1x8xf32>
    %229 = vector.broadcast %228 : vector<1x8xf32> to vector<6x8xf32>
    %230 = arith.addf %226, %229 : vector<6x8xf32>
    %231 = arith.negf %230 : vector<6x8xf32>
    %232 = math.exp %231 : vector<6x8xf32>
    %cst_153 = arith.constant 1.000000e+00 : f32
    %233 = vector.broadcast %cst_153 : f32 to vector<6x8xf32>
    %234 = arith.addf %233, %232 : vector<6x8xf32>
    %235 = arith.divf %233, %234 : vector<6x8xf32>
    %c3_154 = arith.constant 3 : index
    %c0_155 = arith.constant 0 : index
    %c0_156 = arith.constant 0 : index
    %236 = vector.load %arg14[%c3_154, %c0_155, %c0_156] : memref<4x8x8xf32, #tpu.memory_space<vmem>>, vector<1x8x8xf32>
    %237 = vector.shape_cast %236 : vector<1x8x8xf32> to vector<8x8xf32>
    %cst_157 = arith.constant dense<0.000000e+00> : vector<6x8xf32>
    %238 = tpu.matmul %211, %237, %cst_157 {dimension_numbers = #tpu.dot_dimension_numbers<[1], [0], [0], [1], [0, 0, 1, 1], [], []>} : vector<6x8xf32>, vector<8x8xf32>, vector<6x8xf32> -> vector<6x8xf32>
    %c3_158 = arith.constant 3 : index
    %c0_159 = arith.constant 0 : index
    %c0_160 = arith.constant 0 : index
    %239 = vector.load %arg15[%c3_158, %c0_159, %c0_160] : memref<4x1x8xf32, #tpu.memory_space<vmem>>, vector<1x1x8xf32>
    %240 = vector.shape_cast %239 : vector<1x1x8xf32> to vector<1x8xf32>
    %241 = vector.broadcast %240 : vector<1x8xf32> to vector<6x8xf32>
    %242 = arith.addf %238, %241 : vector<6x8xf32>
    %243 = math.tanh %242 : vector<6x8xf32>
    %244 = arith.mulf %223, %243 : vector<6x8xf32>
    %245 = math.tanh %244 : vector<6x8xf32>
    %246 = arith.mulf %235, %245 : vector<6x8xf32>
    %c0_161 = arith.constant 0 : index
    %c0_162 = arith.constant 0 : index
    %c0_163 = arith.constant 0 : index
    %247 = vector.load %arg16[%c0_161, %c0_162, %c0_163] : memref<4x8x8xf32, #tpu.memory_space<vmem>>, vector<1x8x8xf32>
    %248 = vector.shape_cast %247 : vector<1x8x8xf32> to vector<8x8xf32>
    %cst_164 = arith.constant dense<0.000000e+00> : vector<6x8xf32>
    %249 = tpu.matmul %246, %248, %cst_164 {dimension_numbers = #tpu.dot_dimension_numbers<[1], [0], [0], [1], [0, 0, 1, 1], [], []>} : vector<6x8xf32>, vector<8x8xf32>, vector<6x8xf32> -> vector<6x8xf32>
    %c0_165 = arith.constant 0 : index
    %c0_166 = arith.constant 0 : index
    %c0_167 = arith.constant 0 : index
    %250 = vector.load %arg17[%c0_165, %c0_166, %c0_167] : memref<4x1x8xf32, #tpu.memory_space<vmem>>, vector<1x1x8xf32>
    %251 = vector.shape_cast %250 : vector<1x1x8xf32> to vector<1x8xf32>
    %252 = vector.broadcast %251 : vector<1x8xf32> to vector<6x8xf32>
    %253 = arith.addf %249, %252 : vector<6x8xf32>
    %254 = arith.negf %253 : vector<6x8xf32>
    %255 = math.exp %254 : vector<6x8xf32>
    %cst_168 = arith.constant 1.000000e+00 : f32
    %256 = vector.broadcast %cst_168 : f32 to vector<6x8xf32>
    %257 = arith.addf %256, %255 : vector<6x8xf32>
    %258 = arith.divf %256, %257 : vector<6x8xf32>
    %c2_169 = arith.constant 2 : index
    %c0_170 = arith.constant 0 : index
    %c0_171 = arith.constant 0 : index
    %259 = vector.load %arg16[%c2_169, %c0_170, %c0_171] : memref<4x8x8xf32, #tpu.memory_space<vmem>>, vector<1x8x8xf32>
    %260 = vector.shape_cast %259 : vector<1x8x8xf32> to vector<8x8xf32>
    %cst_172 = arith.constant dense<0.000000e+00> : vector<6x8xf32>
    %261 = tpu.matmul %246, %260, %cst_172 {dimension_numbers = #tpu.dot_dimension_numbers<[1], [0], [0], [1], [0, 0, 1, 1], [], []>} : vector<6x8xf32>, vector<8x8xf32>, vector<6x8xf32> -> vector<6x8xf32>
    %c2_173 = arith.constant 2 : index
    %c0_174 = arith.constant 0 : index
    %c0_175 = arith.constant 0 : index
    %262 = vector.load %arg17[%c2_173, %c0_174, %c0_175] : memref<4x1x8xf32, #tpu.memory_space<vmem>>, vector<1x1x8xf32>
    %263 = vector.shape_cast %262 : vector<1x1x8xf32> to vector<1x8xf32>
    %264 = vector.broadcast %263 : vector<1x8xf32> to vector<6x8xf32>
    %265 = arith.addf %261, %264 : vector<6x8xf32>
    %266 = arith.negf %265 : vector<6x8xf32>
    %267 = math.exp %266 : vector<6x8xf32>
    %cst_176 = arith.constant 1.000000e+00 : f32
    %268 = vector.broadcast %cst_176 : f32 to vector<6x8xf32>
    %269 = arith.addf %268, %267 : vector<6x8xf32>
    %270 = arith.divf %268, %269 : vector<6x8xf32>
    %c3_177 = arith.constant 3 : index
    %c0_178 = arith.constant 0 : index
    %c0_179 = arith.constant 0 : index
    %271 = vector.load %arg16[%c3_177, %c0_178, %c0_179] : memref<4x8x8xf32, #tpu.memory_space<vmem>>, vector<1x8x8xf32>
    %272 = vector.shape_cast %271 : vector<1x8x8xf32> to vector<8x8xf32>
    %cst_180 = arith.constant dense<0.000000e+00> : vector<6x8xf32>
    %273 = tpu.matmul %246, %272, %cst_180 {dimension_numbers = #tpu.dot_dimension_numbers<[1], [0], [0], [1], [0, 0, 1, 1], [], []>} : vector<6x8xf32>, vector<8x8xf32>, vector<6x8xf32> -> vector<6x8xf32>
    %c3_181 = arith.constant 3 : index
    %c0_182 = arith.constant 0 : index
    %c0_183 = arith.constant 0 : index
    %274 = vector.load %arg17[%c3_181, %c0_182, %c0_183] : memref<4x1x8xf32, #tpu.memory_space<vmem>>, vector<1x1x8xf32>
    %275 = vector.shape_cast %274 : vector<1x1x8xf32> to vector<1x8xf32>
    %276 = vector.broadcast %275 : vector<1x8xf32> to vector<6x8xf32>
    %277 = arith.addf %273, %276 : vector<6x8xf32>
    %278 = math.tanh %277 : vector<6x8xf32>
    %279 = arith.mulf %258, %278 : vector<6x8xf32>
    %280 = math.tanh %279 : vector<6x8xf32>
    %281 = arith.mulf %270, %280 : vector<6x8xf32>
    %c0_184 = arith.constant 0 : index
    %c0_185 = arith.constant 0 : index
    %282 = vector.load %arg18[%c0_184, %c0_185] : memref<6x16xf32, #tpu.memory_space<vmem>>, vector<6x8xf32>
    tpu.vector_store %arg18[%c0_184, %c0_185], %140 {strides = array<i32>} : memref<6x16xf32, #tpu.memory_space<vmem>>, vector<6x8xf32>,
    %c0_186 = arith.constant 0 : index
    %c8 = arith.constant 8 : index
    %283 = vector.load %arg18[%c0_186, %c8] : memref<6x16xf32, #tpu.memory_space<vmem>>, vector<6x8xf32>
    tpu.vector_store %arg18[%c0_186, %c8], %281 {strides = array<i32>} : memref<6x16xf32, #tpu.memory_space<vmem>>, vector<6x8xf32>,
    return
  }
}

module attributes {stable_mosaic.version = 11 : i64} {
  func.func @_gcn_tail_kernel(%arg0: memref<6x4xf32, #tpu.memory_space<vmem>>, %arg1: memref<6x16xf32, #tpu.memory_space<vmem>>, %arg2: memref<6x6xf32, #tpu.memory_space<vmem>>, %arg3: memref<4x32xf32, #tpu.memory_space<vmem>>, %arg4: memref<1x32xf32, #tpu.memory_space<vmem>>, %arg5: memref<32x16xf32, #tpu.memory_space<vmem>>, %arg6: memref<1x16xf32, #tpu.memory_space<vmem>>, %arg7: memref<16x8xf32, #tpu.memory_space<vmem>>, %arg8: memref<1x8xf32, #tpu.memory_space<vmem>>, %arg9: memref<8x4xf32, #tpu.memory_space<vmem>>, %arg10: memref<1x4xf32, #tpu.memory_space<vmem>>, %arg11: memref<4x16xf32, #tpu.memory_space<vmem>>, %arg12: memref<16x16xf32, #tpu.memory_space<vmem>>, %arg13: memref<1x16xf32, #tpu.memory_space<vmem>>, %arg14: memref<16x4xf32, #tpu.memory_space<vmem>>, %arg15: memref<1x4xf32, #tpu.memory_space<vmem>>, %arg16: memref<4x16xf32, #tpu.memory_space<vmem>>, %arg17: memref<16x16xf32, #tpu.memory_space<vmem>>, %arg18: memref<1x16xf32, #tpu.memory_space<vmem>>, %arg19: memref<16x4xf32, #tpu.memory_space<vmem>>, %arg20: memref<1x4xf32, #tpu.memory_space<vmem>>, %arg21: memref<4x4xf32, #tpu.memory_space<vmem>>, %arg22: memref<1x4xf32, #tpu.memory_space<vmem>>, %arg23: memref<6x4xf32, #tpu.memory_space<vmem>>) attributes {dimension_semantics = [], scalar_prefetch = 0 : i64, scratch_operands = 0 : i64, tpu.core_type = #tpu.core_type<tc>} {
    %c0 = arith.constant 0 : index
    %c0_0 = arith.constant 0 : index
    %0 = vector.load %arg0[%c0, %c0_0] : memref<6x4xf32, #tpu.memory_space<vmem>>, vector<6x4xf32>
    %c0_1 = arith.constant 0 : index
    %c0_2 = arith.constant 0 : index
    %1 = vector.load %arg3[%c0_1, %c0_2] : memref<4x32xf32, #tpu.memory_space<vmem>>, vector<4x32xf32>
    %cst = arith.constant dense<0.000000e+00> : vector<6x32xf32>
    %2 = tpu.matmul %0, %1, %cst {dimension_numbers = #tpu.dot_dimension_numbers<[1], [0], [0], [1], [0, 0, 1, 1], [], []>} : vector<6x4xf32>, vector<4x32xf32>, vector<6x32xf32> -> vector<6x32xf32>
    %c0_3 = arith.constant 0 : index
    %c0_4 = arith.constant 0 : index
    %3 = vector.load %arg4[%c0_3, %c0_4] : memref<1x32xf32, #tpu.memory_space<vmem>>, vector<1x32xf32>
    %4 = vector.broadcast %3 : vector<1x32xf32> to vector<6x32xf32>
    %5 = arith.addf %2, %4 : vector<6x32xf32>
    %cst_5 = arith.constant 0.000000e+00 : f32
    %6 = vector.broadcast %cst_5 : f32 to vector<6x32xf32>
    %7 = arith.maximumf %5, %6 : vector<6x32xf32>
    %c0_6 = arith.constant 0 : index
    %c0_7 = arith.constant 0 : index
    %8 = vector.load %arg5[%c0_6, %c0_7] : memref<32x16xf32, #tpu.memory_space<vmem>>, vector<32x16xf32>
    %cst_8 = arith.constant dense<0.000000e+00> : vector<6x16xf32>
    %9 = tpu.matmul %7, %8, %cst_8 {dimension_numbers = #tpu.dot_dimension_numbers<[1], [0], [0], [1], [0, 0, 1, 1], [], []>} : vector<6x32xf32>, vector<32x16xf32>, vector<6x16xf32> -> vector<6x16xf32>
    %c0_9 = arith.constant 0 : index
    %c0_10 = arith.constant 0 : index
    %10 = vector.load %arg6[%c0_9, %c0_10] : memref<1x16xf32, #tpu.memory_space<vmem>>, vector<1x16xf32>
    %11 = vector.broadcast %10 : vector<1x16xf32> to vector<6x16xf32>
    %12 = arith.addf %9, %11 : vector<6x16xf32>
    %cst_11 = arith.constant 0.000000e+00 : f32
    %13 = vector.broadcast %cst_11 : f32 to vector<6x16xf32>
    %14 = arith.maximumf %12, %13 : vector<6x16xf32>
    %c0_12 = arith.constant 0 : index
    %c0_13 = arith.constant 0 : index
    %15 = vector.load %arg7[%c0_12, %c0_13] : memref<16x8xf32, #tpu.memory_space<vmem>>, vector<16x8xf32>
    %cst_14 = arith.constant dense<0.000000e+00> : vector<6x8xf32>
    %16 = tpu.matmul %14, %15, %cst_14 {dimension_numbers = #tpu.dot_dimension_numbers<[1], [0], [0], [1], [0, 0, 1, 1], [], []>} : vector<6x16xf32>, vector<16x8xf32>, vector<6x8xf32> -> vector<6x8xf32>
    %c0_15 = arith.constant 0 : index
    %c0_16 = arith.constant 0 : index
    %17 = vector.load %arg8[%c0_15, %c0_16] : memref<1x8xf32, #tpu.memory_space<vmem>>, vector<1x8xf32>
    %18 = vector.broadcast %17 : vector<1x8xf32> to vector<6x8xf32>
    %19 = arith.addf %16, %18 : vector<6x8xf32>
    %cst_17 = arith.constant 0.000000e+00 : f32
    %20 = vector.broadcast %cst_17 : f32 to vector<6x8xf32>
    %21 = arith.maximumf %19, %20 : vector<6x8xf32>
    %c0_18 = arith.constant 0 : index
    %c0_19 = arith.constant 0 : index
    %22 = vector.load %arg9[%c0_18, %c0_19] : memref<8x4xf32, #tpu.memory_space<vmem>>, vector<8x4xf32>
    %cst_20 = arith.constant dense<0.000000e+00> : vector<6x4xf32>
    %23 = tpu.matmul %21, %22, %cst_20 {dimension_numbers = #tpu.dot_dimension_numbers<[1], [0], [0], [1], [0, 0, 1, 1], [], []>} : vector<6x8xf32>, vector<8x4xf32>, vector<6x4xf32> -> vector<6x4xf32>
    %c0_21 = arith.constant 0 : index
    %c0_22 = arith.constant 0 : index
    %24 = vector.load %arg10[%c0_21, %c0_22] : memref<1x4xf32, #tpu.memory_space<vmem>>, vector<1x4xf32>
    %25 = vector.broadcast %24 : vector<1x4xf32> to vector<6x4xf32>
    %26 = arith.addf %23, %25 : vector<6x4xf32>
    %cst_23 = arith.constant 0.000000e+00 : f32
    %27 = vector.broadcast %cst_23 : f32 to vector<6x4xf32>
    %28 = arith.maximumf %26, %27 : vector<6x4xf32>
    %c0_24 = arith.constant 0 : index
    %c0_25 = arith.constant 0 : index
    %29 = vector.load %arg1[%c0_24, %c0_25] : memref<6x16xf32, #tpu.memory_space<vmem>>, vector<6x16xf32>
    %c0_26 = arith.constant 0 : index
    %c0_27 = arith.constant 0 : index
    %30 = vector.load %arg2[%c0_26, %c0_27] : memref<6x6xf32, #tpu.memory_space<vmem>>, vector<6x6xf32>
    %c0_28 = arith.constant 0 : index
    %c0_29 = arith.constant 0 : index
    %31 = vector.load %arg11[%c0_28, %c0_29] : memref<4x16xf32, #tpu.memory_space<vmem>>, vector<4x16xf32>
    %cst_30 = arith.constant dense<0.000000e+00> : vector<6x16xf32>
    %32 = tpu.matmul %28, %31, %cst_30 {dimension_numbers = #tpu.dot_dimension_numbers<[1], [0], [0], [1], [0, 0, 1, 1], [], []>} : vector<6x4xf32>, vector<4x16xf32>, vector<6x16xf32> -> vector<6x16xf32>
    %c0_31 = arith.constant 0 : index
    %c0_32 = arith.constant 0 : index
    %33 = vector.load %arg12[%c0_31, %c0_32] : memref<16x16xf32, #tpu.memory_space<vmem>>, vector<16x16xf32>
    %cst_33 = arith.constant dense<0.000000e+00> : vector<6x16xf32>
    %34 = tpu.matmul %29, %33, %cst_33 {dimension_numbers = #tpu.dot_dimension_numbers<[1], [0], [0], [1], [0, 0, 1, 1], [], []>} : vector<6x16xf32>, vector<16x16xf32>, vector<6x16xf32> -> vector<6x16xf32>
    %35 = arith.addf %32, %34 : vector<6x16xf32>
    %cst_34 = arith.constant dense<0.000000e+00> : vector<6x16xf32>
    %36 = tpu.matmul %30, %35, %cst_34 {dimension_numbers = #tpu.dot_dimension_numbers<[1], [0], [0], [1], [0, 0, 1, 1], [], []>} : vector<6x6xf32>, vector<6x16xf32>, vector<6x16xf32> -> vector<6x16xf32>
    %c0_35 = arith.constant 0 : index
    %c0_36 = arith.constant 0 : index
    %37 = vector.load %arg13[%c0_35, %c0_36] : memref<1x16xf32, #tpu.memory_space<vmem>>, vector<1x16xf32>
    %38 = vector.broadcast %37 : vector<1x16xf32> to vector<6x16xf32>
    %39 = arith.addf %36, %38 : vector<6x16xf32>
    %c0_37 = arith.constant 0 : index
    %c0_38 = arith.constant 0 : index
    %40 = vector.load %arg14[%c0_37, %c0_38] : memref<16x4xf32, #tpu.memory_space<vmem>>, vector<16x4xf32>
    %cst_39 = arith.constant dense<0.000000e+00> : vector<6x4xf32>
    %41 = tpu.matmul %39, %40, %cst_39 {dimension_numbers = #tpu.dot_dimension_numbers<[1], [0], [0], [1], [0, 0, 1, 1], [], []>} : vector<6x16xf32>, vector<16x4xf32>, vector<6x4xf32> -> vector<6x4xf32>
    %c0_40 = arith.constant 0 : index
    %c0_41 = arith.constant 0 : index
    %42 = vector.load %arg15[%c0_40, %c0_41] : memref<1x4xf32, #tpu.memory_space<vmem>>, vector<1x4xf32>
    %43 = vector.broadcast %42 : vector<1x4xf32> to vector<6x4xf32>
    %44 = arith.addf %41, %43 : vector<6x4xf32>
    %cst_42 = arith.constant 0.000000e+00 : f32
    %45 = vector.broadcast %cst_42 : f32 to vector<6x4xf32>
    %46 = arith.maximumf %44, %45 : vector<6x4xf32>
    %47 = arith.addf %46, %28 : vector<6x4xf32>
    %c0_43 = arith.constant 0 : index
    %c0_44 = arith.constant 0 : index
    %48 = vector.load %arg16[%c0_43, %c0_44] : memref<4x16xf32, #tpu.memory_space<vmem>>, vector<4x16xf32>
    %cst_45 = arith.constant dense<0.000000e+00> : vector<6x16xf32>
    %49 = tpu.matmul %47, %48, %cst_45 {dimension_numbers = #tpu.dot_dimension_numbers<[1], [0], [0], [1], [0, 0, 1, 1], [], []>} : vector<6x4xf32>, vector<4x16xf32>, vector<6x16xf32> -> vector<6x16xf32>
    %c0_46 = arith.constant 0 : index
    %c0_47 = arith.constant 0 : index
    %50 = vector.load %arg17[%c0_46, %c0_47] : memref<16x16xf32, #tpu.memory_space<vmem>>, vector<16x16xf32>
    %cst_48 = arith.constant dense<0.000000e+00> : vector<6x16xf32>
    %51 = tpu.matmul %29, %50, %cst_48 {dimension_numbers = #tpu.dot_dimension_numbers<[1], [0], [0], [1], [0, 0, 1, 1], [], []>} : vector<6x16xf32>, vector<16x16xf32>, vector<6x16xf32> -> vector<6x16xf32>
    %52 = arith.addf %49, %51 : vector<6x16xf32>
    %cst_49 = arith.constant dense<0.000000e+00> : vector<6x16xf32>
    %53 = tpu.matmul %30, %52, %cst_49 {dimension_numbers = #tpu.dot_dimension_numbers<[1], [0], [0], [1], [0, 0, 1, 1], [], []>} : vector<6x6xf32>, vector<6x16xf32>, vector<6x16xf32> -> vector<6x16xf32>
    %c0_50 = arith.constant 0 : index
    %c0_51 = arith.constant 0 : index
    %54 = vector.load %arg18[%c0_50, %c0_51] : memref<1x16xf32, #tpu.memory_space<vmem>>, vector<1x16xf32>
    %55 = vector.broadcast %54 : vector<1x16xf32> to vector<6x16xf32>
    %56 = arith.addf %53, %55 : vector<6x16xf32>
    %c0_52 = arith.constant 0 : index
    %c0_53 = arith.constant 0 : index
    %57 = vector.load %arg19[%c0_52, %c0_53] : memref<16x4xf32, #tpu.memory_space<vmem>>, vector<16x4xf32>
    %cst_54 = arith.constant dense<0.000000e+00> : vector<6x4xf32>
    %58 = tpu.matmul %56, %57, %cst_54 {dimension_numbers = #tpu.dot_dimension_numbers<[1], [0], [0], [1], [0, 0, 1, 1], [], []>} : vector<6x16xf32>, vector<16x4xf32>, vector<6x4xf32> -> vector<6x4xf32>
    %c0_55 = arith.constant 0 : index
    %c0_56 = arith.constant 0 : index
    %59 = vector.load %arg20[%c0_55, %c0_56] : memref<1x4xf32, #tpu.memory_space<vmem>>, vector<1x4xf32>
    %60 = vector.broadcast %59 : vector<1x4xf32> to vector<6x4xf32>
    %61 = arith.addf %58, %60 : vector<6x4xf32>
    %cst_57 = arith.constant 0.000000e+00 : f32
    %62 = vector.broadcast %cst_57 : f32 to vector<6x4xf32>
    %63 = arith.maximumf %61, %62 : vector<6x4xf32>
    %64 = arith.addf %63, %47 : vector<6x4xf32>
    %c0_58 = arith.constant 0 : index
    %c0_59 = arith.constant 0 : index
    %65 = vector.load %arg21[%c0_58, %c0_59] : memref<4x4xf32, #tpu.memory_space<vmem>>, vector<4x4xf32>
    %cst_60 = arith.constant dense<0.000000e+00> : vector<6x4xf32>
    %66 = tpu.matmul %64, %65, %cst_60 {dimension_numbers = #tpu.dot_dimension_numbers<[1], [0], [0], [1], [0, 0, 1, 1], [], []>} : vector<6x4xf32>, vector<4x4xf32>, vector<6x4xf32> -> vector<6x4xf32>
    %c0_61 = arith.constant 0 : index
    %c0_62 = arith.constant 0 : index
    %67 = vector.load %arg22[%c0_61, %c0_62] : memref<1x4xf32, #tpu.memory_space<vmem>>, vector<1x4xf32>
    %68 = vector.broadcast %67 : vector<1x4xf32> to vector<6x4xf32>
    %69 = arith.addf %66, %68 : vector<6x4xf32>
    %c0_63 = arith.constant 0 : index
    %c0_64 = arith.constant 0 : index
    %70 = vector.load %arg23[%c0_63, %c0_64] : memref<6x4xf32, #tpu.memory_space<vmem>>, vector<6x4xf32>
    tpu.vector_store %arg23[%c0_63, %c0_64], %69 {strides = array<i32>} : memref<6x4xf32, #tpu.memory_space<vmem>>, vector<6x4xf32>,
    return
  }
}

</mosaic_0001>

<bundles_post_ra>
// kernel: tile.15
= control target key start
LH: loop header
LB: loop body
LE: loop exit
PB: predicated region body
PF: predicated region fallthrough
CT: control target
= control target key end

     0   :  { %s37_s8 = smov 4   ;;  %s38_s9 = smov 8   ;;  %vm7_vm0 = vcmask 31744   ;;  %vm13_vm1 = vcmask 130144   ;;  %vm19_vm2 = vcmask 97344   ;;  %vm25_vm3 = vcmask 64544   ;;  %s55_s0 = inlined_call_operand.vmem [shape: f32[4,4], index: 0, kind: input, shape index: {}]   ;;  %s56_s1 = inlined_call_operand.vmem [shape: f32[1,16], index: 1, kind: output, shape index: {}]  }
   0x1   :  { %v4_v0 = vld [vmem:[%s55_s0] sm:$0xf]  ;;  %s36_s0 = smov 12  }
   0x2   :  { %5 = vst [vmem:[#allocation1] sm:$0xf] %v4_v0 }
   0x9   :  { %v10_v1 = vld [vmem:[#allocation1 + $0x3] sm:$0x1]   ;;  %v22_v2 = vld [vmem:[#allocation1 + $0x1] sm:$0x1]   ;;  %v16_v3 = vld [vmem:[#allocation1 + $0x2] sm:$0x1]  }
   0xa   :  { %11 = vrot.lane.b32.xlu0 %v10_v1, %s36_s0  ;;  %23 = vrot.lane.b32.xlu1 %v22_v2, %s37_s8  ;;  %v6_v4 = vld [vmem:[#allocation1] sm:$0x1]  }
   0xb   :  { %8 = vst.msk [vmem:[#allocation0] sm:$0x1] %vm7_vm0, %v6_v4  }
  0x12   :  { %17 = vrot.lane.b32.xlu0 %v16_v3, %s38_s9 }
  0x7c   :  { %v12_v5 = vpop.permute.xlu0 %11   ;;  %v24_v6 = vpop.permute.xlu1 %23  }
  0x7d   :  { %14 = vst.msk [vmem:[#allocation0] sm:$0x1] %vm13_vm1, %v12_v5  }
  0x84   :  { %v18_v7 = vpop.permute.xlu0 %17  }
  0x85   :  { %20 = vst.msk [vmem:[#allocation0] sm:$0x1] %vm19_vm2, %v18_v7  }
  0x86   :  { %26 = vst.msk [vmem:[#allocation0] sm:$0x1] %vm25_vm3, %v24_v6  }
  0x8d   :  { %v29_v8 = vld [vmem:[#allocation0] sm:$0x1] }
  0x8e   :  { %32 = vst [vmem:[%s56_s1] sm:$0x1] %v29_v8 }

// kernel: tile.19
= control target key start
LH: loop header
LB: loop body
LE: loop exit
PB: predicated region body
PF: predicated region fallthrough
CT: control target
= control target key end

     0   :  { %s22_s0 = inlined_call_operand.vmem [shape: f32[8], index: 0, kind: input, shape index: {}]   ;;  %s23_s1 = inlined_call_operand.vmem [shape: f32[2,8], index: 1, kind: output, shape index: {}]  }
   0x1   :  { %v4_v0 = vld [vmem:[%s22_s0] ss:$0 sm:$0xff] }
   0x2   :  { %5 = vst [vmem:[%s23_s1] sm:$0x3] %v4_v0 }

// kernel: tile.20
= control target key start
LH: loop header
LB: loop body
LE: loop exit
PB: predicated region body
PF: predicated region fallthrough
CT: control target
= control target key end

     0   :  { %vm7_vm0 = vcmask 64512   ;;  %vm13_vm1 = vcmask 130112   ;;  %s39_s0 = inlined_call_operand.vmem [shape: f32[2,8], index: 0, kind: input, shape index: {}]   ;;  %s40_s1 = inlined_call_operand.vmem [shape: f32[1,16], index: 1, kind: output, shape index: {}]  }
   0x1   :  { %v4_v0 = vld [vmem:[%s39_s0] sm:$0x3]  ;;  %s22_s0 = smov 8  }
   0x2   :  { %5 = vst [vmem:[#allocation1] sm:$0x3] %v4_v0 }
   0x9   :  { %v10_v1 = vld [vmem:[#allocation1 + $0x1] sm:$0x1]   ;;  %v6_v2 = vld [vmem:[#allocation1] sm:$0x1]  }
   0xa   :  { %11 = vrot.lane.b32.xlu0 %v10_v1, %s22_s0  ;;  %8 = vst.msk [vmem:[#allocation0] sm:$0x1] %vm7_vm0, %v6_v2  }
  0x7c   :  { %v12_v3 = vpop.permute.xlu0 %11  }
  0x7d   :  { %14 = vst.msk [vmem:[#allocation0] sm:$0x1] %vm13_vm1, %v12_v3  }
  0x84   :  { %v17_v4 = vld [vmem:[#allocation0] sm:$0x1] }
  0x85   :  { %20 = vst [vmem:[%s40_s1] sm:$0x1] %v17_v4 }

// kernel: gpr_gcn_forward.5
= control target key start
LH: loop header
LB: loop body
LE: loop exit
PB: predicated region body
PF: predicated region fallthrough
CT: control target
= control target key end

     0   :  { %s1401_s21 = smov 0   ;;  %s1599_s0 = inlined_call_operand.vmem [shape: f32[6,5,5], index: 0, kind: input, shape index: {}]   ;;  %s1600_s1 = inlined_call_operand.vmem [shape: f32[6,5,5], index: 1, kind: input, shape index: {}]   ;;  %s1601_s2 = inlined_call_operand.vmem [shape: f32[6,5,5], index: 2, kind: input, shape index: {}]   ;;  %s1602_s3 = inlined_call_operand.vmem [shape: f32[6,5,5], index: 3, kind: input, shape index: {}]   ;;  %s1603_s4 = inlined_call_operand.vmem [shape: f32[9,4,16], index: 4, kind: input, shape index: {}]   ;;  %s1604_s5 = inlined_call_operand.vmem [shape: f32[1,16], index: 5, kind: input, shape index: {}]   ;;  %s1605_s6 = inlined_call_operand.vmem [shape: f32[6,4,16], index: 6, kind: output, shape index: {}]  }
   0x1 LB: > { %s1255_s22 = sadd.s32 4294967295, %s1363_s21   ;;  %p1259_p0 = scmp.ge.s32.totalorder %s1363_s21, 1  ;;  %s1363_s21 = sphi %s1401_s21, %s16_s21  }
   0x2   : > { %p238_p1 = scmp.lt.s32.totalorder %s1363_s21, 7 }
   0x4   : > { %p239_p2 = pnand %p1259_p0, %p238_p1 }
   0x5   : > { %p278_p3 = scmp.lt.s32.totalorder (!%p239_p2), %s1255_s22, 5  ;;  %s1365_s23 = smov (!%p239_p2), 127  }
   0x6   : > { %242 = sbr.rel (%p239_p2) target bundleno = 337 (0x151), region = 44 }
   0xb   : > { %v1412_v0 = vld [vmem:[%s1603_s4 + $0x4] sm:$0xf]  ;;  %vm307_vm0 = vcmask 1043456   ;;  %v1419_v1 = vld [vmem:[%s1603_s4 + $0xc] sm:$0xf]  ;;  %s1607_s22 = smov (!%p278_p3, %s1255_s22), 5 }
   0xc   : > { %1266 = vmatpush.msk.msra.mxu0 %vm307_vm0, %v1412_v0  ;;  %v1424_v2 = vld [vmem:[%s1603_s4 + $0x10] sm:$0xf]  ;;  %v1429_v3 = vld [vmem:[%s1603_s4] sm:$0xf]  ;;  %1274 = vmatpush.msk.msra.mxu3 %vm307_vm0, %v1419_v1  ;;  %v1440_v4 = vld [vmem:[%s1603_s4 + $0x8] sm:$0xf] }
   0xd   : > { %v1445_v5 = vld [vmem:[%s1603_s4 + $0x1c] sm:$0xf]  ;;  %1268 = vmatpush.msk.msra.mxu1 %vm307_vm0, %v1429_v3  ;;  %1271 = vmatpush.msk.msra.mxu2 %vm307_vm0, %v1440_v4  ;;  %s1260_s11 = sshll.u32 %s1607_s22, 3  ;;  %vm303_vm1 = vcmask 31744   ;;  %v1472_v9 = vld [vmem:[%s1603_s4 + $0x20] sm:$0xf] }
   0xe   : > { %1277 = vmatpush.msk.msrb.mxu0 %vm307_vm0, %v1424_v2  ;;  %1286 = vmatpush.msk.msrb.mxu3 %vm307_vm0, %v1445_v5  ;;  %s281_s14 = scalar_lea.vmem %s1599_s0, %s1260_s11  ;;  %s285_s17 = scalar_lea.vmem %s1600_s1, %s1260_s11  ;;  %v1282_v15 = vld [vmem:[%s1603_s4 + $0x18] sm:$0xf]  ;;  %v1279_v16 = vld [vmem:[%s1603_s4 + $0x14] sm:$0xf]  ;;  %vm1164_vm2 = vcmask 125952  }
   0xf   : > { %v1457_v6 = vld [vmem:[%s281_s14 + $0x1] sm:$0xf]  ;;  %s289_s20 = scalar_lea.vmem %s1601_s2, %s1260_s11  ;;  %s293_s26 = scalar_lea.vmem %s1602_s3, %s1260_s11  ;;  %1283 = vmatpush.msk.msrb.mxu2 %vm307_vm0, %v1282_v15  ;;  %1280 = vmatpush.msk.msrb.mxu1 %vm307_vm0, %v1279_v16 }
  0x10   : > { %v298_v7 = vld [vmem:[%s281_s14] sm:$0xf]  ;;  %539 = vrot.lane.b32.xlu1 %v1457_v6, %s1365_s23  ;;  %s1264_s9 = sshll.u32 %s1607_s22, 2 }
  0x11   : > { %359 = vrot.lane.b32.xlu0 %v298_v7, %s1365_s23  ;;  %v300_v8 = vld [vmem:[%s285_s17] sm:$0xf]  ;;  %1269 = vmatmul.msk.f32.vlgmr.msra.gmra.mxu1 %vm303_vm1, %v298_v7  ;;  %s297_s14 = scalar_lea.vmem %s1605_s6, %s1264_s9 }
  0x12   : > { %v387_v10 = vld [vmem:[%s289_s20] sm:$0xf]  ;;  %1267 = vmatmul.msk.f32.vlgmr.msra.gmra.mxu0 %vm303_vm1, %v300_v8  ;;  %1291 = vmatpush.msk.msra.mxu1 %vm307_vm0, %v1412_v0 }
  0x13   : > { %v1474_v11 = vld [vmem:[%s293_s26] sm:$0xf]  ;;  %1275 = vmatmul.msk.f32.vlgmr.msra.gmra.mxu3 %vm303_vm1, %v387_v10  ;;  %1289 = vmatpush.msk.msra.mxu0 %vm307_vm0, %v1472_v9 }
  0x14   : > { %674 = vrot.lane.b32.xlu2 %v1474_v11, %s1365_s23  ;;  %1295 = vmatpush.msk.msra.mxu3 %vm307_vm0, %v1440_v4  ;;  %v1484_v12 = vld [vmem:[%s285_s17 + $0x1] sm:$0xf] }
  0x15   : > { %v891_v13 = vld [vmem:[%s289_s20 + $0x1] sm:$0xf] }
  0x16   : > { %v1493_v14 = vld [vmem:[%s293_s26 + $0x1] sm:$0xf] }
  0x18   : > { %607 = vrot.lane.b32.xlu1 %v300_v8, %s1365_s23 }
  0x19   : > { %449 = vrot.lane.b32.xlu0 %v387_v10, %s1365_s23 }
  0x1a   : > { %1278 = vmatmul.msk.f32.vlgmr.msrb.gmra.mxu0 %vm303_vm1, %v1474_v11 }
  0x1b   : > { %1287 = vmatmul.msk.f32.vlgmr.msrb.gmra.mxu3 %vm303_vm1, %v1484_v12  ;;  %1297 = vmatpush.msk.msrb.mxu0 %vm307_vm0, %v1419_v1 }
  0x1c   : > { %741 = vrot.lane.b32.xlu2 %v1484_v12, %s1365_s23  ;;  %1303 = vmatpush.msk.msrb.mxu3 %vm307_vm0, %v1282_v15 }
  0x20   : > { %1133 = vrot.lane.b32.xlu1 %v1493_v14, %s1365_s23 }
  0x21   : > { %941 = vrot.lane.b32.xlu0 %v891_v13, %s1365_s23 }
  0x6e   : > { %v675_v21 = vpop.permute.xlu2 %674 }
  0x76   : > { %v742_v22 = vpop.permute.xlu2 %741 }
  0x82   : > { %v540_v17 = vpop.permute.xlu1 %539 }
  0x83   : > { %v360_v18 = vpop.permute.xlu0 %359  ;;  %1290 = vmatmul.msk.f32.vlgmr.msra.gmra.mxu0 %vm303_vm1, %v540_v17 }
  0x84   : > { %1272 = vmatmul.msk.f32.vlgmr.msra.gmra.mxu2 %vm303_vm1, %v360_v18  ;;  %1305 = vmatpush.msk.msra.mxu0 %vm307_vm0, %v1445_v5 }
  0x85   : > { %1293 = vmatpush.msk.msra.mxu2 %vm307_vm0, %v1429_v3 }
  0x8a   : > { %v608_v19 = vpop.permute.xlu1 %607 }
  0x8b   : > { %v450_v20 = vpop.permute.xlu0 %449  ;;  %1296 = vmatmul.msk.f32.vlgmr.msra.gmra.mxu3 %vm303_vm1, %v608_v19  ;;  %1298 = vmatmul.msk.f32.vlgmr.msrb.gmra.mxu0 %vm303_vm1, %v1474_v11 }
  0x8c   : > { %1281 = vmatmul.msk.f32.vlgmr.msrb.gmra.mxu1 %vm303_vm1, %v450_v20  ;;  %1284 = vmatmul.msk.f32.vlgmr.msrb.gmra.mxu2 %vm303_vm1, %v1457_v6 }
  0x8d   : > { %1301 = vmatpush.msk.msrb.mxu2 %vm307_vm0, %v1279_v16  ;;  %1299 = vmatpush.msk.msrb.mxu1 %vm307_vm0, %v1424_v2 }
  0x8e   : > { %1311 = vmatpush.msk.msra.mxu3 %vm307_vm0, %v1429_v3  ;;  %1313 = vmatpush.msk.msrb.mxu0 %vm307_vm0, %v1440_v4  ;;  %v354_v28 = vpop.f32.mrf.mxu1 }
  0x8f   : > { %v328_v25 = vpop.f32.mrf.mxu0 }
  0x90   : > { %v355_v49 = vadd.f32 %v354_v28, %v328_v25 }
  0x92   : > { %v1134_v24 = vpop.permute.xlu1 %1133 }
  0x93   : > { %1304 = vmatmul.msk.f32.vlgmr.msrb.gmra.mxu3 %vm303_vm1, %v1484_v12  ;;  %1306 = vmatmul.msk.f32.vlgmr.msra.gmra.mxu0 %vm303_vm1, %v540_v17  ;;  %v942_v23 = vpop.permute.xlu0 %941 }
  0x94   : > { %1292 = vmatmul.msk.f32.vlgmr.msra.gmra.mxu1 %vm303_vm1, %v360_v18  ;;  %1294 = vmatmul.msk.f32.vlgmr.msra.gmra.mxu2 %vm303_vm1, %v300_v8 }
  0x95   : > { %1309 = vmatpush.msk.msra.mxu2 %vm307_vm0, %v1412_v0  ;;  %1307 = vmatpush.msk.msra.mxu1 %vm307_vm0, %v1472_v9 }
  0x96   : > { %1319 = vmatpush.msk.msrb.mxu3 %vm307_vm0, %v1279_v16  ;;  %1321 = vmatpush.msk.msra.mxu0 %vm307_vm0, %v1282_v15  ;;  %v413_v26 = vpop.f32.mrf.mxu3 }
  0x97   : > { %v443_v27 = vpop.f32.mrf.mxu0 }
  0x9b   : > { %1312 = vmatmul.msk.f32.vlgmr.msra.gmra.mxu3 %vm303_vm1, %v387_v10  ;;  %1314 = vmatmul.msk.f32.vlgmr.msrb.gmra.mxu0 %vm303_vm1, %v450_v20 }
  0x9c   : > { %1300 = vmatmul.msk.f32.vlgmr.msrb.gmra.mxu1 %vm303_vm1, %v450_v20  ;;  %1302 = vmatmul.msk.f32.vlgmr.msrb.gmra.mxu2 %vm303_vm1, %v675_v21 }
  0x9d   : > { %1317 = vmatpush.msk.msrb.mxu2 %vm307_vm0, %v1424_v2  ;;  %1315 = vmatpush.msk.msrb.mxu1 %vm307_vm0, %v1419_v1 }
  0x9e   : > { %1327 = vmatpush.msk.msra.mxu3 %vm307_vm0, %v1412_v0  ;;  %1329 = vmatpush.msk.msrb.mxu0 %vm307_vm0, %v1429_v3  ;;  %v533_v29 = vpop.f32.mrf.mxu3 }
  0xa3   : > { %1320 = vmatmul.msk.f32.vlgmr.msrb.gmra.mxu3 %vm303_vm1, %v540_v17  ;;  %1322 = vmatmul.msk.f32.vlgmr.msra.gmra.mxu0 %vm303_vm1, %v891_v13 }
  0xa4   : > { %1308 = vmatmul.msk.f32.vlgmr.msra.gmra.mxu1 %vm303_vm1, %v742_v22  ;;  %1310 = vmatmul.msk.f32.vlgmr.msra.gmra.mxu2 %vm303_vm1, %v1474_v11 }
  0xa5   : > { %1325 = vmatpush.msk.msra.mxu2 %vm307_vm0, %v1472_v9  ;;  %1323 = vmatpush.msk.msra.mxu1 %vm307_vm0, %v1445_v5 }
  0xa6   : > { %1335 = vmatpush.msk.msrb.mxu3 %vm307_vm0, %v1424_v2  ;;  %1337 = vmatpush.msk.msra.mxu0 %vm307_vm0, %v1279_v16 }
  0xab   : > { %1328 = vmatmul.msk.f32.vlgmr.msra.gmra.mxu3 %vm303_vm1, %v450_v20  ;;  %1330 = vmatmul.msk.f32.vlgmr.msrb.gmra.mxu0 %vm303_vm1, %v1474_v11 }
  0xac   : > { %1316 = vmatmul.msk.f32.vlgmr.msrb.gmra.mxu1 %vm303_vm1, %v1457_v6  ;;  %1318 = vmatmul.msk.f32.vlgmr.msrb.gmra.mxu2 %vm303_vm1, %v1484_v12 }
  0xad   : > { %1333 = vmatpush.msk.msrb.mxu2 %vm307_vm0, %v1419_v1  ;;  %1331 = vmatpush.msk.msrb.mxu1 %vm307_vm0, %v1440_v4 }
  0xae   : > { %1343 = vmatpush.msk.msra.mxu3 %vm307_vm0, %v1472_v9 }
  0xb3   : > { %1336 = vmatmul.msk.f32.vlgmr.msrb.gmra.mxu3 %vm303_vm1, %v540_v17  ;;  %1338 = vmatmul.msk.f32.vlgmr.msra.gmra.mxu0 %vm303_vm1, %v742_v22 }
  0xb4   : > { %1324 = vmatmul.msk.f32.vlgmr.msra.gmra.mxu1 %vm303_vm1, %v1493_v14  ;;  %1326 = vmatmul.msk.f32.vlgmr.msra.gmra.mxu2 %vm303_vm1, %v942_v23 }
  0xb5   : > { %1341 = vmatpush.msk.msra.mxu2 %vm307_vm0, %v1445_v5  ;;  %1339 = vmatpush.msk.msra.mxu1 %vm307_vm0, %v1282_v15 }
  0xbb   : > { %1344 = vmatmul.msk.f32.vlgmr.msra.gmra.mxu3 %vm303_vm1, %v1134_v24 }
  0xbc   : > { %1332 = vmatmul.msk.f32.vlgmr.msrb.gmra.mxu1 %vm303_vm1, %v675_v21  ;;  %1334 = vmatmul.msk.f32.vlgmr.msrb.gmra.mxu2 %vm303_vm1, %v1484_v12 }
  0xc4   : > { %1342 = vmatmul.msk.f32.vlgmr.msra.gmra.mxu2 %vm303_vm1, %v942_v23  ;;  %1340 = vmatmul.msk.f32.vlgmr.msra.gmra.mxu1 %vm303_vm1, %v1493_v14 }
 0x100   : > { %v563_v30 = vpop.f32.mrf.mxu0 }
 0x107   : > { %v383_v31 = vpop.f32.mrf.mxu2 }
 0x108   : > { %v649_v35 = vpop.f32.mrf.mxu0  ;;  %v386_v52 = vadd.f32 %v383_v31, %v355_v49 }
 0x109   : > { %v473_v32 = vpop.f32.mrf.mxu1 }
 0x10a   : > { %v416_v58 = vadd.f32 %v413_v26, %v386_v52 }
 0x10c   : > { %v446_v62 = vadd.f32 %v443_v27, %v416_v58 }
 0x10e   : > { %v628_v34 = vpop.f32.mrf.mxu3  ;;  %v476_v3 = vadd.f32 %v473_v32, %v446_v62 }
 0x10f   : > { %v503_v33 = vpop.f32.mrf.mxu2 }
 0x110   : > { %v737_v40 = vpop.f32.mrf.mxu0  ;;  %v506_v8 = vadd.f32 %v503_v33, %v476_v3 }
 0x111   : > { %v584_v36 = vpop.f32.mrf.mxu1 }
 0x112   : > { %v536_v15 = vadd.f32 %v533_v29, %v506_v8  ;;  %v1356_v29 = vld [vmem:[%s1604_s5] ss:$0 sm:$0xff] }
 0x114   : > { %v566_v22 = vadd.f32 %v563_v30, %v536_v15 }
 0x116   : > { %v716_v38 = vpop.f32.mrf.mxu3 }
 0x117   : > { %v604_v37 = vpop.f32.mrf.mxu2 }
 0x118   : > { %v824_v44 = vpop.f32.mrf.mxu0  ;;  %v605_v46 = vadd.f32 %v604_v37, %v584_v36 }
 0x119   : > { %v670_v39 = vpop.f32.mrf.mxu1 }
 0x11a   : > { %v631_v50 = vadd.f32 %v628_v34, %v605_v46 }
 0x11c   : > { %v652_v55 = vadd.f32 %v649_v35, %v631_v50 }
 0x11e   : > { %v804_v42 = vpop.f32.mrf.mxu3  ;;  %v673_v59 = vadd.f32 %v670_v39, %v652_v55 }
 0x11f   : > { %v695_v41 = vpop.f32.mrf.mxu2 }
 0x120   : > { %v912_v53 = vpop.f32.mrf.mxu0  ;;  %v698_v1 = vadd.f32 %v695_v41, %v673_v59 }
 0x121   : > { %v762_v43 = vpop.f32.mrf.mxu1 }
 0x122   : > { %v719_v6 = vadd.f32 %v716_v38, %v698_v1 }
 0x124   : > { %v740_v13 = vadd.f32 %v737_v40, %v719_v6 }
 0x126   : > { %v887_v48 = vpop.f32.mrf.mxu3  ;;  %v765_v20 = vadd.f32 %v762_v43, %v740_v13 }
 0x127   : > { %v784_v45 = vpop.f32.mrf.mxu2 }
 0x128   : > { %v805_v51 = vadd.f32 %v804_v42, %v784_v45  ;;  %v1004_v2 = vpop.f32.mrf.mxu0  ;;  %v766_v27 = vmax.f32 %v566_v22, %v765_v20 }
 0x129   : > { %v845_v47 = vpop.f32.mrf.mxu1 }
 0x12a   : > { %v827_v56 = vadd.f32 %v824_v44, %v805_v51 }
 0x12c   : > { %v848_v60 = vadd.f32 %v845_v47, %v827_v56 }
 0x12e   : > { %v984_v61 = vpop.f32.mrf.mxu3 }
 0x12f   : > { %v866_v54 = vpop.f32.mrf.mxu2  ;;  %v1005_v7 = vadd.f32 %v1004_v2, %v984_v61 }
 0x130   : > { %v869_v63 = vadd.f32 %v866_v54, %v848_v60  ;;  %v1087_v18 = vpop.f32.mrf.mxu0 }
 0x131   : > { %v937_v57 = vpop.f32.mrf.mxu1 }
 0x132   : > { %v890_v4 = vadd.f32 %v887_v48, %v869_v63 }
 0x134   : > { %v915_v9 = vadd.f32 %v912_v53, %v890_v4 }
 0x136   : > { %v1066_v11 = vpop.f32.mrf.mxu3  ;;  %v940_v16 = vadd.f32 %v937_v57, %v915_v9 }
 0x137   : > { %v962_v0 = vpop.f32.mrf.mxu2 }
 0x138   : > { %v965_v23 = vadd.f32 %v962_v0, %v940_v16 }
 0x139   : > { %v1024_v5 = vpop.f32.mrf.mxu1 }
 0x13a   : > { %v1027_v10 = vadd.f32 %v1024_v5, %v1005_v7  ;;  %v966_v31 = vmax.f32 %v766_v27, %v965_v23 }
 0x13e   : > { %v1154_v26 = vpop.f32.mrf.mxu3 }
 0x13f   : > { %v1045_v12 = vpop.f32.mrf.mxu2 }
 0x140   : > { %v1048_v14 = vadd.f32 %v1045_v12, %v1027_v10 }
 0x141   : > { %v1108_v19 = vpop.f32.mrf.mxu1 }
 0x142   : > { %v1069_v17 = vadd.f32 %v1066_v11, %v1048_v14 }
 0x144   : > { %v1090_v21 = vadd.f32 %v1087_v18, %v1069_v17 }
 0x146   : > { %v1111_v24 = vadd.f32 %v1108_v19, %v1090_v21 }
 0x147   : > { %v1129_v25 = vpop.f32.mrf.mxu2 }
 0x148   : > { %v1132_v28 = vadd.f32 %v1129_v25, %v1111_v24 }
 0x14a   : > { %v1157_v32 = vadd.f32 %v1154_v26, %v1132_v28 }
 0x14c   : > { %v1158_v33 = vmax.f32 %v966_v31, %v1157_v32 }
 0x14e   : > { %v1163_v30 = vadd.f32 %v1356_v29, %v1158_v33 }
 0x150   : > { %1165 = vst.msk [vmem:[%s297_s14] sm:$0xf] %vm1164_vm2, %v1163_v30 }
 0x151 PF: > { %s16_s21 = sadd.s32 1, %s1363_s21  }
 0x152   : > { %p13_p4 = scmp.ge.s32.totalorder %s16_s21, 8  }
 0x154   :  { %15 = sbr.rel (!%p13_p4) target bundleno = 1 (0x1), region = 91 }

// kernel: gpr_gcn_forward.6
= control target key start
LH: loop header
LB: loop body
LE: loop exit
PB: predicated region body
PF: predicated region fallthrough
CT: control target
= control target key end

     0   :  { %s1337_s21 = smov 0   ;;  %s1499_s0 = inlined_call_operand.vmem [shape: f32[6,3,12], index: 0, kind: input, shape index: {}]   ;;  %s1500_s1 = inlined_call_operand.vmem [shape: f32[6,3,12], index: 1, kind: input, shape index: {}]   ;;  %s1501_s2 = inlined_call_operand.vmem [shape: f32[6,3,12], index: 2, kind: input, shape index: {}]   ;;  %s1502_s3 = inlined_call_operand.vmem [shape: f32[6,3,12], index: 3, kind: input, shape index: {}]   ;;  %s1503_s4 = inlined_call_operand.vmem [shape: f32[9,8,16], index: 4, kind: input, shape index: {}]   ;;  %s1504_s5 = inlined_call_operand.vmem [shape: f32[1,16], index: 5, kind: input, shape index: {}]   ;;  %s1505_s6 = inlined_call_operand.vmem [shape: f32[6,2,16], index: 6, kind: output, shape index: {}]  }
   0x1 LB: > { %s1227_s22 = sadd.s32 4294967295, %s1299_s21   ;;  %p1231_p0 = scmp.ge.s32.totalorder %s1299_s21, 1  ;;  %s1299_s21 = sphi %s1337_s21, %s16_s21  }
   0x2   : > { %p238_p1 = scmp.lt.s32.totalorder %s1299_s21, 7 }
   0x4   : > { %p239_p2 = pnand %p1231_p0, %p238_p1 }
   0x5   : > { %p278_p3 = scmp.lt.s32.totalorder (!%p239_p2), %s1227_s22, 5  ;;  %s1301_s23 = smov (!%p239_p2), 124  }
   0x6   : > { %242 = sbr.rel (%p239_p2) target bundleno = 336 (0x150), region = 44 }
   0xb   : > { %v1348_v0 = vld [vmem:[%s1503_s4 + $0x8] sm:$0xff]  ;;  %v1353_v1 = vld [vmem:[%s1503_s4 + $0x18] sm:$0xff]  ;;  %v1358_v2 = vld [vmem:[%s1503_s4 + $0x20] sm:$0xff]  ;;  %s1507_s22 = smov (!%p278_p3, %s1227_s22), 5  ;;  %vm303_vm0 = vcmask 64512   ;;  %vm1136_vm1 = vcmask 123904  }
   0xc   : > { %322 = vmatpush.msra.mxu0 %v1348_v0  ;;  %398 = vmatpush.msra.mxu3 %v1353_v1  ;;  %v1365_v3 = vld [vmem:[%s1503_s4] sm:$0xff]  ;;  %v1370_v4 = vld [vmem:[%s1503_s4 + $0x10] sm:$0xff]  ;;  %v1375_v5 = vld [vmem:[%s1503_s4 + $0x38] sm:$0xff]  ;;  %s1232_s11 = sshll.u32 %s1507_s22, 2  ;;  %s1236_s9 = sshll.u32 %s1507_s22, 1 }
   0xd   : > { %345 = vmatpush.msra.mxu1 %v1365_v3  ;;  %371 = vmatpush.msra.mxu2 %v1370_v4  ;;  %s281_s14 = scalar_lea.vmem %s1499_s0, %s1232_s11  ;;  %s285_s17 = scalar_lea.vmem %s1500_s1, %s1232_s11  ;;  %v1402_v9 = vld [vmem:[%s1503_s4 + $0x40] sm:$0xff]  ;;  %v1248_v15 = vld [vmem:[%s1503_s4 + $0x30] sm:$0xff]  ;;  %v1246_v16 = vld [vmem:[%s1503_s4 + $0x28] sm:$0xff] }
   0xe   : > { %425 = vmatpush.msrb.mxu0 %v1358_v2  ;;  %506 = vmatpush.msrb.mxu3 %v1375_v5  ;;  %v1387_v6 = vld [vmem:[%s281_s14 + $0x1] sm:$0x3]  ;;  %s289_s20 = scalar_lea.vmem %s1501_s2, %s1232_s11  ;;  %s293_s26 = scalar_lea.vmem %s1502_s3, %s1232_s11 }
   0xf   : > { %v298_v7 = vld [vmem:[%s281_s14] sm:$0x3]  ;;  %514 = vrot.lane.b32.xlu1 %v1387_v6, %s1301_s23  ;;  %479 = vmatpush.msrb.mxu2 %v1248_v15  ;;  %s297_s14 = scalar_lea.vmem %s1505_s6, %s1236_s9 }
  0x10   : > { %352 = vrot.lane.b32.xlu0 %v298_v7, %s1301_s23  ;;  %v300_v8 = vld [vmem:[%s285_s17] sm:$0x3]  ;;  %1239 = vmatmul.msk.f32.vlgmr.msra.gmra.mxu1 %vm303_vm0, %v298_v7 }
  0x11   : > { %v377_v10 = vld [vmem:[%s289_s20] sm:$0x3]  ;;  %1238 = vmatmul.msk.f32.vlgmr.msra.gmra.mxu0 %vm303_vm0, %v300_v8  ;;  %452 = vmatpush.msrb.mxu1 %v1246_v16 }
  0x12   : > { %v1404_v11 = vld [vmem:[%s293_s26] sm:$0x3]  ;;  %1243 = vmatmul.msk.f32.vlgmr.msra.gmra.mxu3 %vm303_vm0, %v377_v10  ;;  %533 = vmatpush.msra.mxu0 %v1402_v9 }
  0x13   : > { %646 = vrot.lane.b32.xlu2 %v1404_v11, %s1301_s23  ;;  %598 = vmatpush.msra.mxu3 %v1370_v4  ;;  %v1412_v12 = vld [vmem:[%s285_s17 + $0x1] sm:$0x3] }
  0x14   : > { %v863_v13 = vld [vmem:[%s289_s20 + $0x1] sm:$0x3]  ;;  %554 = vmatpush.msra.mxu1 %v1348_v0 }
  0x15   : > { %v1420_v14 = vld [vmem:[%s293_s26 + $0x1] sm:$0x3] }
  0x17   : > { %579 = vrot.lane.b32.xlu1 %v300_v8, %s1301_s23 }
  0x18   : > { %433 = vrot.lane.b32.xlu0 %v377_v10, %s1301_s23 }
  0x19   : > { %1245 = vmatmul.msk.f32.vlgmr.msrb.gmra.mxu0 %vm303_vm0, %v1404_v11 }
  0x1a   : > { %1251 = vmatmul.msk.f32.vlgmr.msrb.gmra.mxu3 %vm303_vm0, %v1412_v12  ;;  %619 = vmatpush.msrb.mxu0 %v1353_v1 }
  0x1b   : > { %713 = vrot.lane.b32.xlu2 %v1412_v12, %s1301_s23  ;;  %686 = vmatpush.msrb.mxu3 %v1248_v15 }
  0x1f   : > { %1105 = vrot.lane.b32.xlu1 %v1420_v14, %s1301_s23 }
  0x20   : > { %913 = vrot.lane.b32.xlu0 %v863_v13, %s1301_s23 }
  0x6d   : > { %v647_v21 = vpop.permute.xlu2 %646 }
  0x75   : > { %v714_v22 = vpop.permute.xlu2 %713 }
  0x81   : > { %v515_v17 = vpop.permute.xlu1 %514 }
  0x82   : > { %v353_v18 = vpop.permute.xlu0 %352  ;;  %1253 = vmatmul.msk.f32.vlgmr.msra.gmra.mxu0 %vm303_vm0, %v515_v17 }
  0x83   : > { %1241 = vmatmul.msk.f32.vlgmr.msra.gmra.mxu2 %vm303_vm0, %v353_v18  ;;  %707 = vmatpush.msra.mxu0 %v1375_v5 }
  0x84   : > { %574 = vmatpush.msra.mxu2 %v1365_v3 }
  0x89   : > { %v580_v19 = vpop.permute.xlu1 %579 }
  0x8a   : > { %v434_v20 = vpop.permute.xlu0 %433  ;;  %1256 = vmatmul.msk.f32.vlgmr.msra.gmra.mxu3 %vm303_vm0, %v580_v19  ;;  %1257 = vmatmul.msk.f32.vlgmr.msrb.gmra.mxu0 %vm303_vm0, %v1404_v11 }
  0x8b   : > { %1247 = vmatmul.msk.f32.vlgmr.msrb.gmra.mxu1 %vm303_vm0, %v434_v20  ;;  %1249 = vmatmul.msk.f32.vlgmr.msrb.gmra.mxu2 %vm303_vm0, %v1387_v6 }
  0x8c   : > { %665 = vmatpush.msrb.mxu2 %v1246_v16  ;;  %640 = vmatpush.msrb.mxu1 %v1358_v2 }
  0x8d   : > { %774 = vmatpush.msra.mxu3 %v1365_v3  ;;  %794 = vmatpush.msrb.mxu0 %v1370_v4  ;;  %v347_v28 = vpop.f32.mrf.mxu1 }
  0x8e   : > { %v324_v25 = vpop.f32.mrf.mxu0 }
  0x8f   : > { %v348_v49 = vadd.f32 %v347_v28, %v324_v25 }
  0x91   : > { %v1106_v24 = vpop.permute.xlu1 %1105 }
  0x92   : > { %1260 = vmatmul.msk.f32.vlgmr.msrb.gmra.mxu3 %vm303_vm0, %v1412_v12  ;;  %1261 = vmatmul.msk.f32.vlgmr.msra.gmra.mxu0 %vm303_vm0, %v515_v17  ;;  %v914_v23 = vpop.permute.xlu0 %913 }
  0x93   : > { %1254 = vmatmul.msk.f32.vlgmr.msra.gmra.mxu1 %vm303_vm0, %v353_v18  ;;  %1255 = vmatmul.msk.f32.vlgmr.msra.gmra.mxu2 %vm303_vm0, %v300_v8 }
  0x94   : > { %754 = vmatpush.msra.mxu2 %v1348_v0  ;;  %732 = vmatpush.msra.mxu1 %v1402_v9 }
  0x95   : > { %857 = vmatpush.msrb.mxu3 %v1246_v16  ;;  %882 = vmatpush.msra.mxu0 %v1248_v15  ;;  %v400_v26 = vpop.f32.mrf.mxu3 }
  0x96   : > { %v427_v27 = vpop.f32.mrf.mxu0 }
  0x9a   : > { %1264 = vmatmul.msk.f32.vlgmr.msra.gmra.mxu3 %vm303_vm0, %v377_v10  ;;  %1265 = vmatmul.msk.f32.vlgmr.msrb.gmra.mxu0 %vm303_vm0, %v434_v20 }
  0x9b   : > { %1258 = vmatmul.msk.f32.vlgmr.msrb.gmra.mxu1 %vm303_vm0, %v434_v20  ;;  %1259 = vmatmul.msk.f32.vlgmr.msrb.gmra.mxu2 %vm303_vm0, %v647_v21 }
  0x9c   : > { %836 = vmatpush.msrb.mxu2 %v1358_v2  ;;  %815 = vmatpush.msrb.mxu1 %v1353_v1 }
  0x9d   : > { %954 = vmatpush.msra.mxu3 %v1348_v0  ;;  %974 = vmatpush.msrb.mxu0 %v1365_v3  ;;  %v508_v29 = vpop.f32.mrf.mxu3 }
  0xa2   : > { %1268 = vmatmul.msk.f32.vlgmr.msrb.gmra.mxu3 %vm303_vm0, %v515_v17  ;;  %1269 = vmatmul.msk.f32.vlgmr.msra.gmra.mxu0 %vm303_vm0, %v863_v13 }
  0xa3   : > { %1262 = vmatmul.msk.f32.vlgmr.msra.gmra.mxu1 %vm303_vm0, %v714_v22  ;;  %1263 = vmatmul.msk.f32.vlgmr.msra.gmra.mxu2 %vm303_vm0, %v1404_v11 }
  0xa4   : > { %932 = vmatpush.msra.mxu2 %v1402_v9  ;;  %907 = vmatpush.msra.mxu1 %v1375_v5 }
  0xa5   : > { %1036 = vmatpush.msrb.mxu3 %v1358_v2  ;;  %1057 = vmatpush.msra.mxu0 %v1246_v16 }
  0xaa   : > { %1272 = vmatmul.msk.f32.vlgmr.msra.gmra.mxu3 %vm303_vm0, %v434_v20  ;;  %1273 = vmatmul.msk.f32.vlgmr.msrb.gmra.mxu0 %vm303_vm0, %v1404_v11 }
  0xab   : > { %1266 = vmatmul.msk.f32.vlgmr.msrb.gmra.mxu1 %vm303_vm0, %v1387_v6  ;;  %1267 = vmatmul.msk.f32.vlgmr.msrb.gmra.mxu2 %vm303_vm0, %v1412_v12 }
  0xac   : > { %1015 = vmatpush.msrb.mxu2 %v1353_v1  ;;  %994 = vmatpush.msrb.mxu1 %v1370_v4 }
  0xad   : > { %1124 = vmatpush.msra.mxu3 %v1402_v9 }
  0xb2   : > { %1276 = vmatmul.msk.f32.vlgmr.msrb.gmra.mxu3 %vm303_vm0, %v515_v17  ;;  %1277 = vmatmul.msk.f32.vlgmr.msra.gmra.mxu0 %vm303_vm0, %v714_v22 }
  0xb3   : > { %1270 = vmatmul.msk.f32.vlgmr.msra.gmra.mxu1 %vm303_vm0, %v1420_v14  ;;  %1271 = vmatmul.msk.f32.vlgmr.msra.gmra.mxu2 %vm303_vm0, %v914_v23 }
  0xb4   : > { %1099 = vmatpush.msra.mxu2 %v1375_v5  ;;  %1078 = vmatpush.msra.mxu1 %v1248_v15 }
  0xba   : > { %1280 = vmatmul.msk.f32.vlgmr.msra.gmra.mxu3 %vm303_vm0, %v1106_v24 }
  0xbb   : > { %1274 = vmatmul.msk.f32.vlgmr.msrb.gmra.mxu1 %vm303_vm0, %v647_v21  ;;  %1275 = vmatmul.msk.f32.vlgmr.msrb.gmra.mxu2 %vm303_vm0, %v1412_v12 }
  0xc3   : > { %1279 = vmatmul.msk.f32.vlgmr.msra.gmra.mxu2 %vm303_vm0, %v914_v23  ;;  %1278 = vmatmul.msk.f32.vlgmr.msra.gmra.mxu1 %vm303_vm0, %v1420_v14 }
  0xff   : > { %v535_v30 = vpop.f32.mrf.mxu0 }
 0x106   : > { %v373_v31 = vpop.f32.mrf.mxu2 }
 0x107   : > { %v621_v35 = vpop.f32.mrf.mxu0  ;;  %v376_v52 = vadd.f32 %v373_v31, %v348_v49 }
 0x108   : > { %v454_v32 = vpop.f32.mrf.mxu1 }
 0x109   : > { %v403_v58 = vadd.f32 %v400_v26, %v376_v52 }
 0x10b   : > { %v430_v62 = vadd.f32 %v427_v27, %v403_v58 }
 0x10d   : > { %v600_v34 = vpop.f32.mrf.mxu3  ;;  %v457_v3 = vadd.f32 %v454_v32, %v430_v62 }
 0x10e   : > { %v481_v33 = vpop.f32.mrf.mxu2 }
 0x10f   : > { %v709_v40 = vpop.f32.mrf.mxu0  ;;  %v484_v8 = vadd.f32 %v481_v33, %v457_v3 }
 0x110   : > { %v556_v36 = vpop.f32.mrf.mxu1 }
 0x111   : > { %v511_v15 = vadd.f32 %v508_v29, %v484_v8  ;;  %v1292_v29 = vld [vmem:[%s1504_s5] ss:$0 sm:$0xff] }
 0x113   : > { %v538_v22 = vadd.f32 %v535_v30, %v511_v15 }
 0x115   : > { %v688_v38 = vpop.f32.mrf.mxu3 }
 0x116   : > { %v576_v37 = vpop.f32.mrf.mxu2 }
 0x117   : > { %v796_v44 = vpop.f32.mrf.mxu0  ;;  %v577_v46 = vadd.f32 %v576_v37, %v556_v36 }
 0x118   : > { %v642_v39 = vpop.f32.mrf.mxu1 }
 0x119   : > { %v603_v50 = vadd.f32 %v600_v34, %v577_v46 }
 0x11b   : > { %v624_v55 = vadd.f32 %v621_v35, %v603_v50 }
 0x11d   : > { %v776_v42 = vpop.f32.mrf.mxu3  ;;  %v645_v59 = vadd.f32 %v642_v39, %v624_v55 }
 0x11e   : > { %v667_v41 = vpop.f32.mrf.mxu2 }
 0x11f   : > { %v884_v53 = vpop.f32.mrf.mxu0  ;;  %v670_v1 = vadd.f32 %v667_v41, %v645_v59 }
 0x120   : > { %v734_v43 = vpop.f32.mrf.mxu1 }
 0x121   : > { %v691_v6 = vadd.f32 %v688_v38, %v670_v1 }
 0x123   : > { %v712_v13 = vadd.f32 %v709_v40, %v691_v6 }
 0x125   : > { %v859_v48 = vpop.f32.mrf.mxu3  ;;  %v737_v20 = vadd.f32 %v734_v43, %v712_v13 }
 0x126   : > { %v756_v45 = vpop.f32.mrf.mxu2 }
 0x127   : > { %v777_v51 = vadd.f32 %v776_v42, %v756_v45  ;;  %v976_v2 = vpop.f32.mrf.mxu0  ;;  %v738_v27 = vmax.f32 %v538_v22, %v737_v20 }
 0x128   : > { %v817_v47 = vpop.f32.mrf.mxu1 }
 0x129   : > { %v799_v56 = vadd.f32 %v796_v44, %v777_v51 }
 0x12b   : > { %v820_v60 = vadd.f32 %v817_v47, %v799_v56 }
 0x12d   : > { %v956_v61 = vpop.f32.mrf.mxu3 }
 0x12e   : > { %v838_v54 = vpop.f32.mrf.mxu2  ;;  %v977_v7 = vadd.f32 %v976_v2, %v956_v61 }
 0x12f   : > { %v841_v63 = vadd.f32 %v838_v54, %v820_v60  ;;  %v1059_v18 = vpop.f32.mrf.mxu0 }
 0x130   : > { %v909_v57 = vpop.f32.mrf.mxu1 }
 0x131   : > { %v862_v4 = vadd.f32 %v859_v48, %v841_v63 }
 0x133   : > { %v887_v9 = vadd.f32 %v884_v53, %v862_v4 }
 0x135   : > { %v1038_v11 = vpop.f32.mrf.mxu3  ;;  %v912_v16 = vadd.f32 %v909_v57, %v887_v9 }
 0x136   : > { %v934_v0 = vpop.f32.mrf.mxu2 }
 0x137   : > { %v937_v23 = vadd.f32 %v934_v0, %v912_v16 }
 0x138   : > { %v996_v5 = vpop.f32.mrf.mxu1 }
 0x139   : > { %v999_v10 = vadd.f32 %v996_v5, %v977_v7  ;;  %v938_v31 = vmax.f32 %v738_v27, %v937_v23 }
 0x13d   : > { %v1126_v26 = vpop.f32.mrf.mxu3 }
 0x13e   : > { %v1017_v12 = vpop.f32.mrf.mxu2 }
 0x13f   : > { %v1020_v14 = vadd.f32 %v1017_v12, %v999_v10 }
 0x140   : > { %v1080_v19 = vpop.f32.mrf.mxu1 }
 0x141   : > { %v1041_v17 = vadd.f32 %v1038_v11, %v1020_v14 }
 0x143   : > { %v1062_v21 = vadd.f32 %v1059_v18, %v1041_v17 }
 0x145   : > { %v1083_v24 = vadd.f32 %v1080_v19, %v1062_v21 }
 0x146   : > { %v1101_v25 = vpop.f32.mrf.mxu2 }
 0x147   : > { %v1104_v28 = vadd.f32 %v1101_v25, %v1083_v24 }
 0x149   : > { %v1129_v32 = vadd.f32 %v1126_v26, %v1104_v28 }
 0x14b   : > { %v1130_v33 = vmax.f32 %v938_v31, %v1129_v32 }
 0x14d   : > { %v1135_v30 = vadd.f32 %v1292_v29, %v1130_v33 }
 0x14f   : > { %1137 = vst.msk [vmem:[%s297_s14] sm:$0x3] %vm1136_vm1, %v1135_v30 }
 0x150 PF: > { %s16_s21 = sadd.s32 1, %s1299_s21  }
 0x151   : > { %p13_p4 = scmp.ge.s32.totalorder %s16_s21, 8  }
 0x153   :  { %15 = sbr.rel (!%p13_p4) target bundleno = 1 (0x1), region = 91 }

// kernel: gpr_gcn_forward.7
= control target key start
LH: loop header
LB: loop body
LE: loop exit
PB: predicated region body
PF: predicated region fallthrough
CT: control target
= control target key end

     0   :  { %s1324_s21 = smov 0   ;;  %s1486_s0 = inlined_call_operand.vmem [shape: f32[6,2,16], index: 0, kind: input, shape index: {}]   ;;  %s1487_s1 = inlined_call_operand.vmem [shape: f32[6,2,16], index: 1, kind: input, shape index: {}]   ;;  %s1488_s2 = inlined_call_operand.vmem [shape: f32[6,2,16], index: 2, kind: input, shape index: {}]   ;;  %s1489_s3 = inlined_call_operand.vmem [shape: f32[6,2,16], index: 3, kind: input, shape index: {}]   ;;  %s1490_s4 = inlined_call_operand.vmem [shape: f32[9,8,16], index: 4, kind: input, shape index: {}]   ;;  %s1491_s5 = inlined_call_operand.vmem [shape: f32[1,16], index: 5, kind: input, shape index: {}]   ;;  %s1492_s6 = inlined_call_operand.vmem [shape: f32[6,1,16], index: 6, kind: output, shape index: {}]  }
   0x1 LB: > { %s1216_s22 = sadd.s32 4294967295, %s1286_s21   ;;  %p1220_p0 = scmp.ge.s32.totalorder %s1286_s21, 1  ;;  %s1286_s21 = sphi %s1324_s21, %s16_s21  }
   0x2   : > { %p238_p1 = scmp.lt.s32.totalorder %s1286_s21, 7 }
   0x4   : > { %p239_p2 = pnand %p1220_p0, %p238_p1 }
   0x5   : > { %p277_p3 = scmp.lt.s32.totalorder (!%p239_p2), %s1216_s22, 5  ;;  %s1288_s28 = smov (!%p239_p2), 120  }
   0x6   : > { %242 = sbr.rel (%p239_p2) target bundleno = 335 (0x14f), region = 44 }
   0xb   : > { %v1335_v0 = vld [vmem:[%s1490_s4 + $0x8] sm:$0xff]  ;;  %v1340_v1 = vld [vmem:[%s1490_s4 + $0x18] sm:$0xff]  ;;  %v1345_v2 = vld [vmem:[%s1490_s4 + $0x20] sm:$0xff]  ;;  %s1494_s22 = smov (!%p277_p3, %s1216_s22), 5  ;;  %vm301_vm0 = vcmask 64512   ;;  %vm1131_vm1 = vcmask 122880  }
   0xc   : > { %320 = vmatpush.msra.mxu0 %v1335_v0  ;;  %396 = vmatpush.msra.mxu3 %v1340_v1  ;;  %v1352_v3 = vld [vmem:[%s1490_s4] sm:$0xff]  ;;  %v1357_v4 = vld [vmem:[%s1490_s4 + $0x10] sm:$0xff]  ;;  %v1362_v5 = vld [vmem:[%s1490_s4 + $0x38] sm:$0xff]  ;;  %s1221_s11 = sshll.u32 %s1494_s22, 1  ;;  %s295_s13 = scalar_lea.vmem %s1492_s6, %s1494_s22 }
   0xd   : > { %343 = vmatpush.msra.mxu1 %v1352_v3  ;;  %369 = vmatpush.msra.mxu2 %v1357_v4  ;;  %s280_s14 = scalar_lea.vmem %s1486_s0, %s1221_s11  ;;  %s284_s17 = scalar_lea.vmem %s1487_s1, %s1221_s11  ;;  %v1388_v8 = vld [vmem:[%s1490_s4 + $0x40] sm:$0xff]  ;;  %v1236_v15 = vld [vmem:[%s1490_s4 + $0x30] sm:$0xff]  ;;  %v1234_v16 = vld [vmem:[%s1490_s4 + $0x28] sm:$0xff] }
   0xe   : > { %423 = vmatpush.msrb.mxu0 %v1345_v2  ;;  %504 = vmatpush.msrb.mxu3 %v1362_v5  ;;  %v1377_v6 = vld [vmem:[%s280_s14 + $0x1] sm:$0x1]  ;;  %v296_v7 = vld [vmem:[%s280_s14] sm:$0x1]  ;;  %s288_s20 = scalar_lea.vmem %s1488_s2, %s1221_s11  ;;  %s292_s25 = scalar_lea.vmem %s1489_s3, %s1221_s11 }
   0xf   : > { %512 = vrot.lane.b32.xlu1 %v1377_v6, %s1288_s28  ;;  %350 = vrot.lane.b32.xlu0 %v296_v7, %s1288_s28  ;;  %v298_v9 = vld [vmem:[%s284_s17] sm:$0x1]  ;;  %v1399_v12 = vld [vmem:[%s284_s17 + $0x1] sm:$0x1] }
  0x10   : > { %v375_v10 = vld [vmem:[%s288_s20] sm:$0x1]  ;;  %1226 = vmatmul.msk.f32.vlgmr.msra.gmra.mxu0 %vm301_vm0, %v298_v9  ;;  %1227 = vmatmul.msk.f32.vlgmr.msra.gmra.mxu1 %vm301_vm0, %v296_v7  ;;  %v861_v13 = vld [vmem:[%s288_s20 + $0x1] sm:$0x1] }
  0x11   : > { %v1391_v11 = vld [vmem:[%s292_s25] sm:$0x1]  ;;  %1231 = vmatmul.msk.f32.vlgmr.msra.gmra.mxu3 %vm301_vm0, %v375_v10  ;;  %531 = vmatpush.msra.mxu0 %v1388_v8  ;;  %v1407_v14 = vld [vmem:[%s292_s25 + $0x1] sm:$0x1] }
  0x12   : > { %644 = vrot.lane.b32.xlu2 %v1391_v11, %s1288_s28  ;;  %596 = vmatpush.msra.mxu3 %v1357_v4 }
  0x13   : > { %477 = vmatpush.msrb.mxu2 %v1236_v15  ;;  %450 = vmatpush.msrb.mxu1 %v1234_v16 }
  0x15   : > { %552 = vmatpush.msra.mxu1 %v1335_v0 }
  0x17   : > { %577 = vrot.lane.b32.xlu1 %v298_v9, %s1288_s28  ;;  %431 = vrot.lane.b32.xlu0 %v375_v10, %s1288_s28 }
  0x18   : > { %1233 = vmatmul.msk.f32.vlgmr.msrb.gmra.mxu0 %vm301_vm0, %v1391_v11 }
  0x19   : > { %1239 = vmatmul.msk.f32.vlgmr.msrb.gmra.mxu3 %vm301_vm0, %v1399_v12  ;;  %617 = vmatpush.msrb.mxu0 %v1340_v1 }
  0x1a   : > { %711 = vrot.lane.b32.xlu2 %v1399_v12, %s1288_s28  ;;  %684 = vmatpush.msrb.mxu3 %v1236_v15 }
  0x1f   : > { %911 = vrot.lane.b32.xlu0 %v861_v13, %s1288_s28  ;;  %1103 = vrot.lane.b32.xlu1 %v1407_v14, %s1288_s28 }
  0x6c   : > { %v645_v21 = vpop.permute.xlu2 %644 }
  0x74   : > { %v712_v22 = vpop.permute.xlu2 %711 }
  0x81   : > { %v513_v17 = vpop.permute.xlu1 %512  ;;  %v351_v18 = vpop.permute.xlu0 %350 }
  0x82   : > { %1229 = vmatmul.msk.f32.vlgmr.msra.gmra.mxu2 %vm301_vm0, %v351_v18  ;;  %1241 = vmatmul.msk.f32.vlgmr.msra.gmra.mxu0 %vm301_vm0, %v513_v17 }
  0x83   : > { %572 = vmatpush.msra.mxu2 %v1352_v3  ;;  %705 = vmatpush.msra.mxu0 %v1362_v5 }
  0x89   : > { %v578_v19 = vpop.permute.xlu1 %577  ;;  %v432_v20 = vpop.permute.xlu0 %431 }
  0x8a   : > { %1235 = vmatmul.msk.f32.vlgmr.msrb.gmra.mxu1 %vm301_vm0, %v432_v20  ;;  %1237 = vmatmul.msk.f32.vlgmr.msrb.gmra.mxu2 %vm301_vm0, %v1377_v6 }
  0x8b   : > { %1244 = vmatmul.msk.f32.vlgmr.msra.gmra.mxu3 %vm301_vm0, %v578_v19  ;;  %1245 = vmatmul.msk.f32.vlgmr.msrb.gmra.mxu0 %vm301_vm0, %v1391_v11 }
  0x8c   : > { %663 = vmatpush.msrb.mxu2 %v1234_v16  ;;  %638 = vmatpush.msrb.mxu1 %v1345_v2 }
  0x8d   : > { %772 = vmatpush.msra.mxu3 %v1352_v3  ;;  %792 = vmatpush.msrb.mxu0 %v1357_v4  ;;  %v322_v25 = vpop.f32.mrf.mxu0  ;;  %v345_v28 = vpop.f32.mrf.mxu1 }
  0x8e   : > { %v346_v49 = vadd.f32 %v345_v28, %v322_v25 }
  0x91   : > { %v912_v23 = vpop.permute.xlu0 %911  ;;  %v1104_v24 = vpop.permute.xlu1 %1103 }
  0x92   : > { %1242 = vmatmul.msk.f32.vlgmr.msra.gmra.mxu1 %vm301_vm0, %v351_v18  ;;  %1243 = vmatmul.msk.f32.vlgmr.msra.gmra.mxu2 %vm301_vm0, %v298_v9 }
  0x93   : > { %1248 = vmatmul.msk.f32.vlgmr.msrb.gmra.mxu3 %vm301_vm0, %v1399_v12  ;;  %1249 = vmatmul.msk.f32.vlgmr.msra.gmra.mxu0 %vm301_vm0, %v513_v17 }
  0x94   : > { %752 = vmatpush.msra.mxu2 %v1335_v0  ;;  %730 = vmatpush.msra.mxu1 %v1388_v8  ;;  %v398_v26 = vpop.f32.mrf.mxu3 }
  0x95   : > { %855 = vmatpush.msrb.mxu3 %v1234_v16  ;;  %880 = vmatpush.msra.mxu0 %v1236_v15  ;;  %v425_v27 = vpop.f32.mrf.mxu0 }
  0x9a   : > { %1246 = vmatmul.msk.f32.vlgmr.msrb.gmra.mxu1 %vm301_vm0, %v432_v20  ;;  %1247 = vmatmul.msk.f32.vlgmr.msrb.gmra.mxu2 %vm301_vm0, %v645_v21 }
  0x9b   : > { %1252 = vmatmul.msk.f32.vlgmr.msra.gmra.mxu3 %vm301_vm0, %v375_v10  ;;  %1253 = vmatmul.msk.f32.vlgmr.msrb.gmra.mxu0 %vm301_vm0, %v432_v20 }
  0x9c   : > { %834 = vmatpush.msrb.mxu2 %v1345_v2  ;;  %813 = vmatpush.msrb.mxu1 %v1340_v1  ;;  %v506_v29 = vpop.f32.mrf.mxu3 }
  0x9d   : > { %952 = vmatpush.msra.mxu3 %v1335_v0  ;;  %972 = vmatpush.msrb.mxu0 %v1352_v3 }
  0xa2   : > { %1250 = vmatmul.msk.f32.vlgmr.msra.gmra.mxu1 %vm301_vm0, %v712_v22  ;;  %1251 = vmatmul.msk.f32.vlgmr.msra.gmra.mxu2 %vm301_vm0, %v1391_v11 }
  0xa3   : > { %1256 = vmatmul.msk.f32.vlgmr.msrb.gmra.mxu3 %vm301_vm0, %v513_v17  ;;  %1257 = vmatmul.msk.f32.vlgmr.msra.gmra.mxu0 %vm301_vm0, %v861_v13 }
  0xa4   : > { %930 = vmatpush.msra.mxu2 %v1388_v8  ;;  %905 = vmatpush.msra.mxu1 %v1362_v5 }
  0xa5   : > { %1034 = vmatpush.msrb.mxu3 %v1345_v2  ;;  %1055 = vmatpush.msra.mxu0 %v1234_v16 }
  0xaa   : > { %1254 = vmatmul.msk.f32.vlgmr.msrb.gmra.mxu1 %vm301_vm0, %v1377_v6  ;;  %1255 = vmatmul.msk.f32.vlgmr.msrb.gmra.mxu2 %vm301_vm0, %v1399_v12 }
  0xab   : > { %1260 = vmatmul.msk.f32.vlgmr.msra.gmra.mxu3 %vm301_vm0, %v432_v20  ;;  %1261 = vmatmul.msk.f32.vlgmr.msrb.gmra.mxu0 %vm301_vm0, %v1391_v11 }
  0xac   : > { %1013 = vmatpush.msrb.mxu2 %v1340_v1  ;;  %992 = vmatpush.msrb.mxu1 %v1357_v4 }
  0xad   : > { %1122 = vmatpush.msra.mxu3 %v1388_v8 }
  0xb2   : > { %1258 = vmatmul.msk.f32.vlgmr.msra.gmra.mxu1 %vm301_vm0, %v1407_v14  ;;  %1259 = vmatmul.msk.f32.vlgmr.msra.gmra.mxu2 %vm301_vm0, %v912_v23 }
  0xb3   : > { %1264 = vmatmul.msk.f32.vlgmr.msrb.gmra.mxu3 %vm301_vm0, %v513_v17  ;;  %1265 = vmatmul.msk.f32.vlgmr.msra.gmra.mxu0 %vm301_vm0, %v712_v22 }
  0xb4   : > { %1097 = vmatpush.msra.mxu2 %v1362_v5  ;;  %1076 = vmatpush.msra.mxu1 %v1236_v15 }
  0xba   : > { %1262 = vmatmul.msk.f32.vlgmr.msrb.gmra.mxu1 %vm301_vm0, %v645_v21  ;;  %1263 = vmatmul.msk.f32.vlgmr.msrb.gmra.mxu2 %vm301_vm0, %v1399_v12 }
  0xbb   : > { %1268 = vmatmul.msk.f32.vlgmr.msra.gmra.mxu3 %vm301_vm0, %v1104_v24 }
  0xc2   : > { %1267 = vmatmul.msk.f32.vlgmr.msra.gmra.mxu2 %vm301_vm0, %v912_v23  ;;  %1266 = vmatmul.msk.f32.vlgmr.msra.gmra.mxu1 %vm301_vm0, %v1407_v14 }
  0xff   : > { %v533_v30 = vpop.f32.mrf.mxu0 }
 0x105   : > { %v371_v31 = vpop.f32.mrf.mxu2 }
 0x106   : > { %v374_v52 = vadd.f32 %v371_v31, %v346_v49 }
 0x107   : > { %v452_v32 = vpop.f32.mrf.mxu1 }
 0x108   : > { %v619_v35 = vpop.f32.mrf.mxu0  ;;  %v401_v58 = vadd.f32 %v398_v26, %v374_v52 }
 0x10a   : > { %v428_v62 = vadd.f32 %v425_v27, %v401_v58 }
 0x10c   : > { %v455_v3 = vadd.f32 %v452_v32, %v428_v62 }
 0x10d   : > { %v479_v33 = vpop.f32.mrf.mxu2 }
 0x10e   : > { %v598_v34 = vpop.f32.mrf.mxu3  ;;  %v482_v8 = vadd.f32 %v479_v33, %v455_v3 }
 0x10f   : > { %v554_v36 = vpop.f32.mrf.mxu1 }
 0x110   : > { %v707_v40 = vpop.f32.mrf.mxu0  ;;  %v509_v15 = vadd.f32 %v506_v29, %v482_v8  ;;  %v1129_v29 = vld [vmem:[%s1491_s5] sm:$0x1] }
 0x112   : > { %v536_v22 = vadd.f32 %v533_v30, %v509_v15 }
 0x115   : > { %v574_v37 = vpop.f32.mrf.mxu2 }
 0x116   : > { %v686_v38 = vpop.f32.mrf.mxu3  ;;  %v575_v46 = vadd.f32 %v574_v37, %v554_v36 }
 0x117   : > { %v640_v39 = vpop.f32.mrf.mxu1 }
 0x118   : > { %v794_v44 = vpop.f32.mrf.mxu0  ;;  %v601_v50 = vadd.f32 %v598_v34, %v575_v46 }
 0x11a   : > { %v622_v55 = vadd.f32 %v619_v35, %v601_v50 }
 0x11c   : > { %v643_v59 = vadd.f32 %v640_v39, %v622_v55 }
 0x11d   : > { %v665_v41 = vpop.f32.mrf.mxu2 }
 0x11e   : > { %v774_v42 = vpop.f32.mrf.mxu3  ;;  %v668_v1 = vadd.f32 %v665_v41, %v643_v59 }
 0x11f   : > { %v732_v43 = vpop.f32.mrf.mxu1 }
 0x120   : > { %v882_v53 = vpop.f32.mrf.mxu0  ;;  %v689_v6 = vadd.f32 %v686_v38, %v668_v1 }
 0x122   : > { %v710_v13 = vadd.f32 %v707_v40, %v689_v6 }
 0x124   : > { %v735_v20 = vadd.f32 %v732_v43, %v710_v13 }
 0x125   : > { %v754_v45 = vpop.f32.mrf.mxu2 }
 0x126   : > { %v857_v48 = vpop.f32.mrf.mxu3  ;;  %v775_v51 = vadd.f32 %v774_v42, %v754_v45  ;;  %v736_v27 = vmax.f32 %v536_v22, %v735_v20 }
 0x127   : > { %v815_v47 = vpop.f32.mrf.mxu1 }
 0x128   : > { %v797_v56 = vadd.f32 %v794_v44, %v775_v51  ;;  %v974_v2 = vpop.f32.mrf.mxu0 }
 0x12a   : > { %v818_v60 = vadd.f32 %v815_v47, %v797_v56 }
 0x12d   : > { %v836_v54 = vpop.f32.mrf.mxu2 }
 0x12e   : > { %v954_v61 = vpop.f32.mrf.mxu3  ;;  %v839_v63 = vadd.f32 %v836_v54, %v818_v60 }
 0x12f   : > { %v907_v57 = vpop.f32.mrf.mxu1  ;;  %v975_v7 = vadd.f32 %v974_v2, %v954_v61 }
 0x130   : > { %v860_v4 = vadd.f32 %v857_v48, %v839_v63  ;;  %v1057_v18 = vpop.f32.mrf.mxu0 }
 0x132   : > { %v885_v9 = vadd.f32 %v882_v53, %v860_v4 }
 0x134   : > { %v910_v16 = vadd.f32 %v907_v57, %v885_v9 }
 0x135   : > { %v932_v0 = vpop.f32.mrf.mxu2 }
 0x136   : > { %v1036_v11 = vpop.f32.mrf.mxu3  ;;  %v935_v23 = vadd.f32 %v932_v0, %v910_v16 }
 0x137   : > { %v994_v5 = vpop.f32.mrf.mxu1 }
 0x138   : > { %v997_v10 = vadd.f32 %v994_v5, %v975_v7  ;;  %v936_v31 = vmax.f32 %v736_v27, %v935_v23 }
 0x13d   : > { %v1015_v12 = vpop.f32.mrf.mxu2 }
 0x13e   : > { %v1018_v14 = vadd.f32 %v1015_v12, %v997_v10  ;;  %v1124_v26 = vpop.f32.mrf.mxu3 }
 0x13f   : > { %v1078_v19 = vpop.f32.mrf.mxu1 }
 0x140   : > { %v1039_v17 = vadd.f32 %v1036_v11, %v1018_v14 }
 0x142   : > { %v1060_v21 = vadd.f32 %v1057_v18, %v1039_v17 }
 0x144   : > { %v1081_v24 = vadd.f32 %v1078_v19, %v1060_v21 }
 0x145   : > { %v1099_v25 = vpop.f32.mrf.mxu2 }
 0x146   : > { %v1102_v28 = vadd.f32 %v1099_v25, %v1081_v24 }
 0x148   : > { %v1127_v32 = vadd.f32 %v1124_v26, %v1102_v28 }
 0x14a   : > { %v1128_v33 = vmax.f32 %v936_v31, %v1127_v32 }
 0x14c   : > { %v1130_v34 = vadd.f32 %v1129_v29, %v1128_v33 }
 0x14e   : > { %1132 = vst.msk [vmem:[%s295_s13] sm:$0x1] %vm1131_vm1, %v1130_v34 }
 0x14f PF: > { %s16_s21 = sadd.s32 1, %s1286_s21  }
 0x150   : > { %p13_p4 = scmp.ge.s32.totalorder %s16_s21, 8  }
 0x152   :  { %15 = sbr.rel (!%p13_p4) target bundleno = 1 (0x1), region = 91 }

// kernel: gpr_gcn_forward.8
= control target key start
LH: loop header
LB: loop body
LE: loop exit
PB: predicated region body
PF: predicated region fallthrough
CT: control target
= control target key end

     0   :  { %vm66_vm0 = vcmask 130048   ;;  %vm193_vm9 = vcmask 64512   ;;  %s1588_s2 = inlined_call_operand.vmem [shape: f32[4,16,8], index: 2, kind: input, shape index: {}]   ;;  %s1589_s0 = inlined_call_operand.vmem [shape: f32[6,16], index: 0, kind: input, shape index: {}, may-alias: {0,1}]   ;;  %s1590_s3 = inlined_call_operand.vmem [shape: f32[4,1,8], index: 3, kind: input, shape index: {}]   ;;  %s1591_s5 = inlined_call_operand.vmem [shape: f32[4,1,8], index: 5, kind: input, shape index: {}]   ;;  %s1592_s4 = inlined_call_operand.vmem [shape: f32[4,8,8], index: 4, kind: input, shape index: {}]   ;;  %s1593_s7 = inlined_call_operand.vmem [shape: f32[4,1,8], index: 7, kind: input, shape index: {}]   ;;  %s1594_s6 = inlined_call_operand.vmem [shape: f32[4,8,8], index: 6, kind: input, shape index: {}]   ;;  %s1595_s11 = inlined_call_operand.vmem [shape: f32[4,1,8], index: 11, kind: input, shape index: {}]   ;;  %s1596_s10 = inlined_call_operand.vmem [shape: f32[4,16,8], index: 10, kind: input, shape index: {}]   ;;  %s1597_s1 = inlined_call_operand.vmem [shape: f32[6,16], index: 1, kind: input, shape index: {}, may-alias: {0,1}]   ;;  %s1598_s8 = inlined_call_operand.vmem [shape: f32[4,8,8], index: 8, kind: input, shape index: {}]   ;;  %s1599_s9 = inlined_call_operand.vmem [shape: f32[4,1,8], index: 9, kind: input, shape index: {}]   ;;  %s1600_s13 = inlined_call_operand.vmem [shape: f32[4,1,8], index: 13, kind: input, shape index: {}]   ;;  %s1601_s12 = inlined_call_operand.vmem [shape: f32[4,8,8], index: 12, kind: input, shape index: {}]   ;;  %s1602_s18 = inlined_call_operand.vmem [shape: f32[6,16], index: 18, kind: output, shape index: {}]   ;;  %s1603_s15 = inlined_call_operand.vmem [shape: f32[4,1,8], index: 15, kind: input, shape index: {}]   ;;  %s1604_s14 = inlined_call_operand.vmem [shape: f32[4,8,8], index: 14, kind: input, shape index: {}]   ;;  %s1605_s17 = inlined_call_operand.vmem [shape: f32[4,1,8], index: 17, kind: input, shape index: {}]   ;;  %s1606_s16 = inlined_call_operand.vmem [shape: f32[4,8,8], index: 16, kind: input, shape index: {}]  }
   0x1   :  { %1609 = sst [smem:[#allocation2_spill]] %s1588_s2  ;;  %v188_v13 = vld [vmem:[%s1592_s4] sm:$0xff]  ;;  %v1090_v14 = vld [vmem:[%s1592_s4 + $0x18] sm:$0xff]  ;;  %v1086_v17 = vld [vmem:[%s1592_s4 + $0x10] sm:$0xff] }
   0x2   :  { %1610 = sst [smem:[#allocation3_spill]] %s1589_s0  ;;  %212 = vmatpush.msra.mxu3 %v188_v13  ;;  %v1154_v49 = vld [vmem:[%s1591_s5] ss:$0 sm:$0xff]  ;;  %v1095_v51 = vld [vmem:[%s1594_s6 + $0x10] sm:$0xff]  ;;  %v1099_v52 = vld [vmem:[%s1594_s6 + $0x18] sm:$0xff] }
   0x3   :  { %1611 = sst [smem:[#allocation4_spill]] %s1590_s3  ;;  %v313_v50 = vld [vmem:[%s1594_s6] sm:$0xff] }
   0x4   :  { %s1612_s29 = sld [smem:[#allocation2_spill]]  ;;  %258 = vmatpush.msrb.mxu3 %v1086_v17  ;;  %v1155_v56 = vld [vmem:[%s1591_s5 + $0x2] ss:$0 sm:$0xff]  ;;  %v1153_v62 = vld [vmem:[%s1591_s5 + $0x3] ss:$0 sm:$0xff] }
   0x5   :  { %s1613_s23 = sld [smem:[#allocation3_spill]] }
   0x6   :  { %s1614_s2 = sld [smem:[#allocation4_spill]] }
   0xa   :  { %v61_v0 = vld [vmem:[%s1612_s29 + $0x8] sm:$0xff]  ;;  %v60_v2 = vld [vmem:[%s1612_s29] sm:$0xff]  ;;  %v1081_v5 = vld [vmem:[%s1612_s29 + $0x38] sm:$0xff] }
   0xb   :  { %v1076_v1 = vld [vmem:[%s1612_s29 + $0x28] sm:$0xff]  ;;  %84 = vmatpush.msra.mxu0 %v61_v0  ;;  %v1075_v3 = vld [vmem:[%s1612_s29 + $0x20] sm:$0xff]  ;;  %178 = vmatpush.msra.mxu2 %v1081_v5  ;;  %v1080_v6 = vld [vmem:[%s1612_s29 + $0x30] sm:$0xff] }
   0xc   :  { %131 = vmatpush.msra.mxu1 %v1076_v1  ;;  %v59_v4 = vld [vmem:[%s1613_s23] sm:$0x3f] }
   0xd   :  { %85 = vmatpush.msra.mxu0 %v60_v2  ;;  %179 = vmatpush.msra.mxu2 %v1080_v6  ;;  %v1150_v7 = vld [vmem:[%s1614_s2] ss:$0 sm:$0xff]  ;;  %v1151_v8 = vld [vmem:[%s1614_s2 + $0x2] ss:$0 sm:$0xff]  ;;  %v1152_v22 = vld [vmem:[%s1614_s2 + $0x3] ss:$0 sm:$0xff] }
   0xe   :  { %132 = vmatpush.msra.mxu1 %v1075_v3  ;;  %1073 = vmatmul.msk.f32.vlgmr.msra.gmra.mxu0 %vm66_vm0, %v59_v4 }
   0xf   :  { %1078 = vmatmul.msk.f32.vlgmr.msra.gmra.mxu1 %vm66_vm0, %v59_v4  ;;  %1083 = vmatmul.msk.f32.vlgmr.msra.gmra.mxu2 %vm66_vm0, %v59_v4 }
  0x10   :  { %304 = vmatpush.msrb.mxu0 %v1090_v14  ;;  %336 = vmatpush.msrb.mxu1 %v313_v50 }
  0x11   :  { %382 = vmatpush.msrb.mxu2 %v1095_v51 }
  0x8b   :  { %v87_v9 = vpop.f32.mrf.mxu0 }
  0x8c   :  { %v134_v10 = vpop.f32.mrf.mxu1  ;;  %v88_v11 = vadd.f32 %v1150_v7, %v87_v9 }
  0x8d   :  { %v135_v12 = vadd.f32 %v1151_v8, %v134_v10 }
  0x8e   :  { %v1074_v15 = vmul.f32 -1.442695, %v88_v11 }
  0x8f   :  { %v1079_v16 = vmul.f32 -1.442695, %v135_v12 }
  0x90   :  { %1174 = vpow2.f32 %v1074_v15 }
  0x91   :  { %1176 = vpow2.f32 %v1079_v16 }
  0x92   :  { %v181_v23 = vpop.f32.mrf.mxu2 }
  0x93   :  { %v182_v24 = vadd.f32 %v1152_v22, %v181_v23 }
  0x96   :  { %v1175_v18 = vpop.eup %1174 }
  0x97   :  { %v1177_v19 = vpop.eup %1176  ;;  %v93_v20 = vadd.f32 1.0, %v1175_v18 }
  0x98   :  { %v140_v21 = vadd.f32 1.0, %v1177_v19 }
  0x99   :  { %1178 = vrcp.f32 %v93_v20  ;;  %v105_v30 = vand.u32 2147483648, %v93_v20  ;;  %v103_v33 = vand.u32 2147483647, %v93_v20  ;;  %vm99_vm2 = vweird.f32 %v93_v20 }
  0x9a   :  { %1180 = vrcp.f32 %v140_v21  ;;  %vm146_vm5 = vweird.f32 %v140_v21  ;;  %v152_v42 = vand.u32 2147483648, %v140_v21  ;;  %v150_v43 = vand.u32 2147483647, %v140_v21 }
  0x9b   :  { %1182 = vtanh.f32 %v182_v24  ;;  %v106_v36 = vor.u32 1.1754944e-38, %v105_v30  ;;  %vm104_vm4 = vcmp.eq.f32.partialorder %v103_v33, 8.507059e+37  ;;  %v1156_v30 = vld [vmem:[%s1593_s7] ss:$0 sm:$0xff] }
  0x9c   :  { %v153_v45 = vor.u32 1.1754944e-38, %v152_v42  ;;  %vm151_vm8 = vcmp.eq.f32.partialorder %v150_v43, 8.507059e+37  ;;  %v437_v33 = vld [vmem:[%s1598_s8] sm:$0xff]  ;;  %v1114_v42 = vld [vmem:[%s1596_s10 + $0x28] sm:$0xff] }
  0x9d   :  { %460 = vmatpush.msra.mxu0 %v437_v33  ;;  %v1113_v43 = vld [vmem:[%s1596_s10 + $0x20] sm:$0xff] }
  0x9f   :  { %v1179_v25 = vpop.eup %1178 }
  0xa0   :  { %v1181_v26 = vpop.eup %1180  ;;  %v95_v27 = vmul.f32 %v1179_v25, %v93_v20  ;;  %vm100_vm1 = vweird.f32 %v1179_v25 }
  0xa1   :  { %v142_v28 = vmul.f32 %v1181_v26, %v140_v21  ;;  %v1183_v35 = vpop.eup %1182  ;;  %vm101_vm3 = vmor %vm99_vm2, %vm100_vm1  ;;  %vm147_vm6 = vweird.f32 %v1181_v26 }
  0xa2   :  { %v96_v29 = vsub.f32 1.0, %v95_v27  ;;  %vm148_vm7 = vmor %vm146_vm5, %vm147_vm6  ;;  %v563_v27 = vld [vmem:[%s1596_s10 + $0x8] sm:$0xff] }
  0xa3   :  { %v143_v31 = vsub.f32 1.0, %v142_v28  ;;  %v562_v28 = vld [vmem:[%s1596_s10] sm:$0xff] }
  0xa4   :  { %v97_v32 = vmul.f32 %v1179_v25, %v96_v29  ;;  %v1441_v29 = vld [vmem:[%s1597_s1] sm:$0x3f] }
  0xa5   :  { %v144_v37 = vmul.f32 %v1181_v26, %v143_v31 }
  0xa6   :  { %v98_v34 = vadd.f32 %v1179_v25, %v97_v32 }
  0xa7   :  { %v145_v41 = vadd.f32 %v1181_v26, %v144_v37  ;;  %v1157_v37 = vld [vmem:[%s1593_s7 + $0x2] ss:$0 sm:$0xff] }
  0xa8   :  { %v102_v38 = vsel %vm101_vm3, %v1179_v25, %v98_v34  ;;  %v1104_v34 = vld [vmem:[%s1598_s8 + $0x10] sm:$0xff] }
  0xa9   :  { %v107_v39 = vsel %vm104_vm4, %v106_v36, %v102_v38  ;;  %v149_v44 = vsel %vm148_vm7, %v1181_v26, %v145_v41  ;;  %506 = vmatpush.msra.mxu1 %v1104_v34 }
  0xaa   :  { %v185_v40 = vmul.f32 %v1183_v35, %v107_v39  ;;  %v154_v47 = vsel %vm151_vm8, %v153_v45, %v149_v44  ;;  %v1108_v35 = vld [vmem:[%s1598_s8 + $0x18] sm:$0xff] }
  0xab   :  { %552 = vmatpush.msra.mxu2 %v1108_v35  ;;  %v1119_v44 = vld [vmem:[%s1596_s10 + $0x38] sm:$0xff] }
  0xac   :  { %1184 = vtanh.f32 %v185_v40 }
  0xb2   :  { %v1185_v46 = vpop.eup %1184 }
  0xb3   :  { %v187_v48 = vmul.f32 %v1185_v46, %v154_v47  ;;  %v1118_v46 = vld [vmem:[%s1596_s10 + $0x30] sm:$0xff]  ;;  %v1158_v47 = vld [vmem:[%s1593_s7 + $0x3] ss:$0 sm:$0xff] }
  0xb5   :  { %1084 = vmatmul.msk.f32.vlgmr.msra.gmra.mxu3 %vm193_vm9, %v187_v48  ;;  %1092 = vmatmul.msk.f32.vlgmr.msrb.gmra.mxu0 %vm193_vm9, %v187_v48 }
  0xb6   :  { %428 = vmatpush.msra.mxu3 %v1099_v52  ;;  %632 = vmatpush.msrb.mxu0 %v1114_v42 }
  0xb8   :  { %633 = vmatpush.msrb.mxu0 %v1113_v43 }
  0xbd   :  { %1088 = vmatmul.msk.f32.vlgmr.msrb.gmra.mxu3 %vm193_vm9, %v187_v48 }
  0xbe   :  { %585 = vmatpush.msrb.mxu3 %v563_v27 }
  0xc0   :  { %586 = vmatpush.msrb.mxu3 %v562_v28 }
 0x132   :  { %v306_v63 = vpop.f32.mrf.mxu0 }
 0x133   :  { %v307_v2 = vadd.f32 %v1153_v62, %v306_v63 }
 0x138   :  { %v214_v53 = vpop.f32.mrf.mxu3 }
 0x139   :  { %v215_v54 = vadd.f32 %v1154_v49, %v214_v53 }
 0x13b   :  { %v1085_v55 = vmul.f32 -1.442695, %v215_v54 }
 0x13d   :  { %1186 = vpow2.f32 %v1085_v55 }
 0x140   :  { %v260_v57 = vpop.f32.mrf.mxu3 }
 0x141   :  { %v261_v58 = vadd.f32 %v1155_v56, %v260_v57 }
 0x143   :  { %v1187_v59 = vpop.eup %1186  ;;  %v1089_v60 = vmul.f32 -1.442695, %v261_v58 }
 0x144   :  { %v220_v61 = vadd.f32 1.0, %v1187_v59 }
 0x145   :  { %1188 = vpow2.f32 %v1089_v60 }
 0x146   :  { %1190 = vrcp.f32 %v220_v61  ;;  %v232_v6 = vand.u32 2147483648, %v220_v61  ;;  %v230_v8 = vand.u32 2147483647, %v220_v61  ;;  %vm226_vm11 = vweird.f32 %v220_v61 }
 0x148   :  { %v233_v11 = vor.u32 1.1754944e-38, %v232_v6  ;;  %vm231_vm13 = vcmp.eq.f32.partialorder %v230_v8, 8.507059e+37 }
 0x14b   :  { %v1189_v0 = vpop.eup %1188 }
 0x14c   :  { %v1191_v1 = vpop.eup %1190  ;;  %v266_v3 = vadd.f32 1.0, %v1189_v0 }
 0x14d   :  { %v222_v4 = vmul.f32 %v1191_v1, %v220_v61  ;;  %vm227_vm10 = vweird.f32 %v1191_v1 }
 0x14e   :  { %1192 = vrcp.f32 %v266_v3  ;;  %vm228_vm12 = vmor %vm226_vm11, %vm227_vm10  ;;  %v278_v18 = vand.u32 2147483648, %v266_v3  ;;  %v276_v20 = vand.u32 2147483647, %v266_v3  ;;  %vm272_vm15 = vweird.f32 %v266_v3 }
 0x14f   :  { %v223_v5 = vsub.f32 1.0, %v222_v4  ;;  %1194 = vtanh.f32 %v307_v2 }
 0x150   :  { %v279_v22 = vor.u32 1.1754944e-38, %v278_v18  ;;  %vm277_vm2 = vcmp.eq.f32.partialorder %v276_v20, 8.507059e+37  ;;  %v1160_v18 = vld [vmem:[%s1599_s9] ss:$0 sm:$0xff] }
 0x151   :  { %v224_v7 = vmul.f32 %v1191_v1, %v223_v5 }
 0x153   :  { %v225_v9 = vadd.f32 %v1191_v1, %v224_v7 }
 0x154   :  { %v1193_v10 = vpop.eup %1192 }
 0x155   :  { %v268_v12 = vmul.f32 %v1193_v10, %v266_v3  ;;  %v229_v13 = vsel %vm228_vm12, %v1191_v1, %v225_v9  ;;  %v1195_v14 = vpop.eup %1194  ;;  %vm273_vm14 = vweird.f32 %v1193_v10 }
 0x156   :  { %v234_v15 = vsel %vm231_vm13, %v233_v11, %v229_v13  ;;  %vm274_vm1 = vmor %vm272_vm15, %vm273_vm14 }
 0x157   :  { %v269_v16 = vsub.f32 1.0, %v268_v12  ;;  %v310_v17 = vmul.f32 %v1195_v14, %v234_v15  ;;  %v1159_v12 = vld [vmem:[%s1595_s11] ss:$0 sm:$0xff] }
 0x159   :  { %v270_v19 = vmul.f32 %v1193_v10, %v269_v16  ;;  %1196 = vtanh.f32 %v310_v17 }
 0x15b   :  { %v271_v21 = vadd.f32 %v1193_v10, %v270_v19  ;;  %v1161_v19 = vld [vmem:[%s1599_s9 + $0x2] ss:$0 sm:$0xff] }
 0x15d   :  { %v275_v23 = vsel %vm274_vm1, %v1193_v10, %v271_v21 }
 0x15e   :  { %v280_v24 = vsel %vm277_vm2, %v279_v22, %v275_v23 }
 0x15f   :  { %v1197_v25 = vpop.eup %1196 }
 0x160   :  { %v312_v26 = vmul.f32 %v1197_v25, %v280_v24  ;;  %v689_v24 = vld [vmem:[%s1601_s12] sm:$0xff]  ;;  %v1124_v25 = vld [vmem:[%s1601_s12 + $0x10] sm:$0xff] }
 0x162   :  { %1093 = vmatmul.msk.f32.vlgmr.msrb.gmra.mxu1 %vm193_vm9, %v312_v26  ;;  %1097 = vmatmul.msk.f32.vlgmr.msrb.gmra.mxu2 %vm193_vm9, %v312_v26 }
 0x163   :  { %1101 = vmatmul.msk.f32.vlgmr.msra.gmra.mxu3 %vm193_vm9, %v312_v26  ;;  %679 = vmatpush.msrb.mxu1 %v1119_v44  ;;  %v1128_v26 = vld [vmem:[%s1601_s12 + $0x18] sm:$0xff]  ;;  %v1162_v44 = vld [vmem:[%s1599_s9 + $0x3] ss:$0 sm:$0xff] }
 0x164   :  { %712 = vmatpush.msrb.mxu2 %v689_v24  ;;  %758 = vmatpush.msra.mxu3 %v1124_v25 }
 0x165   :  { %680 = vmatpush.msrb.mxu1 %v1118_v46 }
 0x16b   :  { %1111 = vmatmul.msk.f32.vlgmr.msrb.gmra.mxu3 %vm66_vm0, %v1441_v29 }
 0x1df   :  { %v338_v31 = vpop.f32.mrf.mxu1 }
 0x1e0   :  { %v339_v32 = vadd.f32 %v1156_v30, %v338_v31  ;;  %v1163_v30 = vld [vmem:[%s1595_s11 + $0x2] ss:$0 sm:$0xff] }
 0x1e2   :  { %v1094_v36 = vmul.f32 -1.442695, %v339_v32 }
 0x1e4   :  { %1198 = vpow2.f32 %v1094_v36 }
 0x1e5   :  { %v384_v38 = vpop.f32.mrf.mxu2 }
 0x1e6   :  { %v385_v39 = vadd.f32 %v1157_v37, %v384_v38  ;;  %v430_v49 = vpop.f32.mrf.mxu3  ;;  %v1164_v37 = vld [vmem:[%s1595_s11 + $0x3] ss:$0 sm:$0xff] }
 0x1e7   :  { %v431_v52 = vadd.f32 %v1158_v47, %v430_v49 }
 0x1e8   :  { %v1098_v40 = vmul.f32 -1.442695, %v385_v39 }
 0x1ea   :  { %v1199_v41 = vpop.eup %1198  ;;  %1200 = vpow2.f32 %v1098_v40 }
 0x1eb   :  { %v344_v45 = vadd.f32 1.0, %v1199_v41 }
 0x1ed   :  { %1202 = vrcp.f32 %v344_v45  ;;  %v356_v55 = vand.u32 2147483648, %v344_v45  ;;  %v354_v57 = vand.u32 2147483647, %v344_v45  ;;  %vm350_vm4 = vweird.f32 %v344_v45 }
 0x1ee   :  { %v588_v13 = vpop.f32.mrf.mxu3 }
 0x1ef   :  { %v357_v61 = vor.u32 1.1754944e-38, %v356_v55  ;;  %vm355_vm6 = vcmp.eq.f32.partialorder %v354_v57, 8.507059e+37  ;;  %v589_v14 = vadd.f32 %v1159_v12, %v588_v13 }
 0x1f0   :  { %v1201_v48 = vpop.eup %1200 }
 0x1f1   :  { %v390_v50 = vadd.f32 1.0, %v1201_v48  ;;  %v1112_v15 = vmul.f32 -1.442695, %v589_v14 }
 0x1f3   :  { %v1203_v51 = vpop.eup %1202  ;;  %1204 = vrcp.f32 %v390_v50  ;;  %v402_v4 = vand.u32 2147483648, %v390_v50  ;;  %vm396_vm8 = vweird.f32 %v390_v50  ;;  %v400_v6 = vand.u32 2147483647, %v390_v50 }
 0x1f4   :  { %v346_v53 = vmul.f32 %v1203_v51, %v344_v45  ;;  %1206 = vtanh.f32 %v431_v52  ;;  %vm351_vm3 = vweird.f32 %v1203_v51 }
 0x1f5   :  { %vm352_vm5 = vmor %vm350_vm4, %vm351_vm3  ;;  %v403_v8 = vor.u32 1.1754944e-38, %v402_v4  ;;  %vm401_vm11 = vcmp.eq.f32.partialorder %v400_v6, 8.507059e+37 }
 0x1f6   :  { %v347_v54 = vsub.f32 1.0, %v346_v53 }
 0x1f8   :  { %v348_v56 = vmul.f32 %v1203_v51, %v347_v54 }
 0x1f9   :  { %v1205_v58 = vpop.eup %1204 }
 0x1fa   :  { %v392_v59 = vmul.f32 %v1205_v58, %v390_v50  ;;  %v349_v60 = vadd.f32 %v1203_v51, %v348_v56  ;;  %v1207_v0 = vpop.eup %1206  ;;  %vm397_vm7 = vweird.f32 %v1205_v58 }
 0x1fb   :  { %vm398_vm10 = vmor %vm396_vm8, %vm397_vm7 }
 0x1fc   :  { %v393_v62 = vsub.f32 1.0, %v392_v59  ;;  %v353_v63 = vsel %vm352_vm5, %v1203_v51, %v349_v60 }
 0x1fd   :  { %v358_v1 = vsel %vm355_vm6, %v357_v61, %v353_v63 }
 0x1fe   :  { %v394_v2 = vmul.f32 %v1205_v58, %v393_v62  ;;  %v434_v3 = vmul.f32 %v1207_v0, %v358_v1 }
 0x200   :  { %1208 = vtanh.f32 %v434_v3  ;;  %v395_v5 = vadd.f32 %v1205_v58, %v394_v2 }
 0x201   :  { %1210 = vpow2.f32 %v1112_v15 }
 0x202   :  { %v399_v7 = vsel %vm398_vm10, %v1205_v58, %v395_v5 }
 0x203   :  { %v404_v10 = vsel %vm401_vm11, %v403_v8, %v399_v7 }
 0x206   :  { %v1209_v9 = vpop.eup %1208 }
 0x207   :  { %v436_v11 = vmul.f32 %v1209_v9, %v404_v10  ;;  %v1211_v16 = vpop.eup %1210 }
 0x208   :  { %v594_v17 = vadd.f32 1.0, %v1211_v16 }
 0x209   :  { %1102 = vmatmul.msk.f32.vlgmr.msra.gmra.mxu0 %vm193_vm9, %v436_v11  ;;  %1106 = vmatmul.msk.f32.vlgmr.msra.gmra.mxu1 %vm193_vm9, %v436_v11 }
 0x20a   :  { %1110 = vmatmul.msk.f32.vlgmr.msra.gmra.mxu2 %vm193_vm9, %v436_v11  ;;  %1212 = vrcp.f32 %v594_v17  ;;  %804 = vmatpush.msra.mxu0 %v1128_v26  ;;  %v606_v46 = vand.u32 2147483648, %v594_v17  ;;  %v604_v48 = vand.u32 2147483647, %v594_v17 }
 0x20c   :  { %v607_v56 = vor.u32 1.1754944e-38, %v606_v46  ;;  %vm605_vm14 = vcmp.eq.f32.partialorder %v604_v48, 8.507059e+37  ;;  %v1165_v46 = vld [vmem:[%s1600_s13 + $0x3] ss:$0 sm:$0xff] }
 0x210   :  { %v1213_v27 = vpop.eup %1212 }
 0x211   :  { %1116 = vmatmul.msk.f32.vlgmr.msrb.gmra.mxu0 %vm66_vm0, %v1441_v29  ;;  %1121 = vmatmul.msk.f32.vlgmr.msrb.gmra.mxu1 %vm66_vm0, %v1441_v29  ;;  %v596_v31 = vmul.f32 %v1213_v27, %v594_v17  ;;  %vm600_vm0 = vweird.f32 %v594_v17  ;;  %vm601_vm12 = vweird.f32 %v1213_v27 }
 0x212   :  { %vm1512_vm13 = vmor %vm600_vm0, %vm601_vm12  ;;  %vm1061_vm12 = vcmask 62464  }
 0x213   :  { %v597_v34 = vsub.f32 1.0, %v596_v31  ;;  %v1166_v31 = vld [vmem:[%s1600_s13] ss:$0 sm:$0xff] }
 0x215   :  { %v598_v42 = vmul.f32 %v1213_v27, %v597_v34  ;;  %v1133_v34 = vld [vmem:[%s1604_s14 + $0x10] sm:$0xff] }
 0x216   :  { %882 = vmatpush.msra.mxu2 %v1133_v34 }
 0x217   :  { %v599_v47 = vadd.f32 %v1213_v27, %v598_v42 }
 0x219   :  { %v603_v58 = vsel %vm1512_vm13, %v1213_v27, %v599_v47 }
 0x21a   :  { %v608_v1 = vsel %vm605_vm14, %v607_v56, %v603_v58 }
 0x286   :  { %v462_v20 = vpop.f32.mrf.mxu0  ;;  %v508_v21 = vpop.f32.mrf.mxu1 }
 0x287   :  { %v463_v22 = vadd.f32 %v1160_v18, %v462_v20  ;;  %v509_v23 = vadd.f32 %v1161_v19, %v508_v21 }
 0x289   :  { %v1103_v28 = vmul.f32 -1.442695, %v463_v22  ;;  %v1107_v29 = vmul.f32 -1.442695, %v509_v23 }
 0x28b   :  { %1214 = vpow2.f32 %v1103_v28 }
 0x28c   :  { %1216 = vpow2.f32 %v1107_v29 }
 0x28d   :  { %v554_v45 = vpop.f32.mrf.mxu2 }
 0x28e   :  { %v635_v32 = vpop.f32.mrf.mxu0  ;;  %v682_v40 = vpop.f32.mrf.mxu1  ;;  %v555_v52 = vadd.f32 %v1162_v44, %v554_v45 }
 0x28f   :  { %v636_v33 = vadd.f32 %v1163_v30, %v635_v32  ;;  %v683_v43 = vadd.f32 %v1164_v37, %v682_v40  ;;  %v1167_v32 = vld [vmem:[%s1600_s13 + $0x2] ss:$0 sm:$0xff] }
 0x291   :  { %v1215_v35 = vpop.eup %1214  ;;  %v1117_v36 = vmul.f32 -1.442695, %v636_v33  ;;  %v813_v33 = vld [vmem:[%s1604_s14] sm:$0xff] }
 0x292   :  { %v1217_v38 = vpop.eup %1216  ;;  %v468_v39 = vadd.f32 1.0, %v1215_v35  ;;  %v1137_v35 = vld [vmem:[%s1604_s14 + $0x18] sm:$0xff]  ;;  %836 = vmatpush.msra.mxu1 %v813_v33 }
 0x293   :  { %v1506_v41 = vadd.f32 1.0, %v1217_v38  ;;  %1218 = vpow2.f32 %v1117_v36  ;;  %928 = vmatpush.msrb.mxu3 %v1137_v35 }
 0x294   :  { %1220 = vrcp.f32 %v468_v39  ;;  %v480_v61 = vand.u32 2147483648, %v468_v39  ;;  %v478_v0 = vand.u32 2147483647, %v468_v39  ;;  %vm474_vm1 = vweird.f32 %v468_v39 }
 0x295   :  { %1222 = vrcp.f32 %v1506_v41  ;;  %v526_v11 = vand.u32 2147483648, %v1506_v41  ;;  %vm520_vm6 = vweird.f32 %v1506_v41  ;;  %v524_v18 = vand.u32 2147483647, %v1506_v41 }
 0x296   :  { %1224 = vtanh.f32 %v683_v43  ;;  %v481_v5 = vor.u32 1.1754944e-38, %v480_v61  ;;  %vm479_vm3 = vcmp.eq.f32.partialorder %v478_v0, 8.507059e+37 }
 0x297   :  { %v527_v23 = vor.u32 1.1754944e-38, %v526_v11  ;;  %vm525_vm0 = vcmp.eq.f32.partialorder %v524_v18, 8.507059e+37 }
 0x299   :  { %v1219_v49 = vpop.eup %1218 }
 0x29a   :  { %v1221_v51 = vpop.eup %1220  ;;  %v641_v53 = vadd.f32 1.0, %v1219_v49 }
 0x29b   :  { %v1223_v54 = vpop.eup %1222  ;;  %v470_v55 = vmul.f32 %v1221_v51, %v468_v39  ;;  %vm475_vm15 = vweird.f32 %v1221_v51 }
 0x29c   :  { %v516_v57 = vmul.f32 %v1223_v54, %v1506_v41  ;;  %1226 = vrcp.f32 %v641_v53  ;;  %v1225_v62 = vpop.eup %1224  ;;  %vm476_vm2 = vmor %vm474_vm1, %vm475_vm15  ;;  %vm521_vm4 = vweird.f32 %v1223_v54  ;;  %v653_v14 = vand.u32 2147483648, %v641_v53 }
 0x29d   :  { %v471_v59 = vsub.f32 1.0, %v470_v55  ;;  %1228 = vtanh.f32 %v555_v52  ;;  %v686_v6 = vmul.f32 %v1225_v62, %v608_v1  ;;  %v651_v17 = vand.u32 2147483647, %v641_v53  ;;  %vm1522_vm7 = vmor %vm520_vm6, %vm521_vm4 }
 0x29e   :  { %v517_v60 = vsub.f32 1.0, %v516_v57  ;;  %vm647_vm8 = vweird.f32 %v641_v53  ;;  %v654_v21 = vor.u32 1.1754944e-38, %v653_v14  ;;  %v1146_v14 = vld [vmem:[%s1606_s16 + $0x18] sm:$0xff] }
 0x29f   :  { %v472_v63 = vmul.f32 %v1221_v51, %v471_v59  ;;  %1230 = vtanh.f32 %v686_v6  ;;  %vm652_vm11 = vcmp.eq.f32.partialorder %v651_v17, 8.507059e+37 }
 0x2a0   :  { %v518_v4 = vmul.f32 %v1223_v54, %v517_v60 }
 0x2a1   :  { %v473_v2 = vadd.f32 %v1221_v51, %v472_v63 }
 0x2a2   :  { %v1227_v3 = vpop.eup %1226  ;;  %v519_v15 = vadd.f32 %v1223_v54, %v518_v4 }
 0x2a3   :  { %v477_v7 = vsel %vm476_vm2, %v1221_v51, %v473_v2  ;;  %v643_v8 = vmul.f32 %v1227_v3, %v641_v53  ;;  %v1229_v9 = vpop.eup %1228  ;;  %vm648_vm5 = vweird.f32 %v1227_v3 }
 0x2a4   :  { %v482_v10 = vsel %vm479_vm3, %v481_v5, %v477_v7  ;;  %vm649_vm10 = vmor %vm647_vm8, %vm648_vm5  ;;  %v523_v22 = vsel %vm1522_vm7, %v1223_v54, %v519_v15 }
 0x2a5   :  { %v558_v12 = vmul.f32 %v1229_v9, %v482_v10  ;;  %v644_v13 = vsub.f32 1.0, %v643_v8  ;;  %v1231_v25 = vpop.eup %1230  ;;  %v528_v29 = vsel %vm525_vm0, %v527_v23, %v523_v22  ;;  %v1168_v9 = vld [vmem:[%s1603_s15] ss:$0 sm:$0xff]  ;;  %v1170_v22 = vld [vmem:[%s1603_s15 + $0x3] ss:$0 sm:$0xff] }
 0x2a7   :  { %1232 = vtanh.f32 %v558_v12  ;;  %v645_v16 = vmul.f32 %v1227_v3, %v644_v13  ;;  %v937_v12 = vld [vmem:[%s1606_s16] sm:$0xff]  ;;  %v1142_v13 = vld [vmem:[%s1606_s16 + $0x10] sm:$0xff] }
 0x2a8   :  { %960 = vmatpush.msrb.mxu0 %v937_v12  ;;  %1006 = vmatpush.msrb.mxu1 %v1142_v13 }
 0x2a9   :  { %v646_v20 = vadd.f32 %v1227_v3, %v645_v16  ;;  %v1169_v16 = vld [vmem:[%s1603_s15 + $0x2] ss:$0 sm:$0xff] }
 0x2ab   :  { %v650_v24 = vsel %vm649_vm10, %v1227_v3, %v646_v20 }
 0x2ac   :  { %v655_v26 = vsel %vm652_vm11, %v654_v21, %v650_v24 }
 0x2ad   :  { %v1233_v27 = vpop.eup %1232  ;;  %v688_v28 = vmul.f32 %v1231_v25, %v655_v26 }
 0x2ae   :  { %v560_v30 = vmul.f32 %v1233_v27, %v528_v29 }
 0x2af   :  { %1122 = vmatmul.msk.f32.vlgmr.msrb.gmra.mxu2 %vm193_vm9, %v688_v28  ;;  %1126 = vmatmul.msk.f32.vlgmr.msra.gmra.mxu3 %vm193_vm9, %v688_v28 }
 0x2b0   :  { %1130 = vmatmul.msk.f32.vlgmr.msra.gmra.mxu0 %vm193_vm9, %v688_v28  ;;  %1062 = vst.msk [vmem:[%s1602_s18] sm:$0x3f] %vm1061_vm12, %v560_v30  ;;  %1052 = vmatpush.msrb.mxu2 %v1146_v14 }
 0x32d   :  { %v806_v47 = vpop.f32.mrf.mxu0 }
 0x32e   :  { %v807_v49 = vadd.f32 %v1165_v46, %v806_v47 }
 0x332   :  { %v714_v36 = vpop.f32.mrf.mxu2  ;;  %v760_v37 = vpop.f32.mrf.mxu3 }
 0x333   :  { %v715_v38 = vadd.f32 %v1166_v31, %v714_v36  ;;  %v761_v39 = vadd.f32 %v1167_v32, %v760_v37 }
 0x335   :  { %v1123_v40 = vmul.f32 -1.442695, %v715_v38  ;;  %v1127_v41 = vmul.f32 -1.442695, %v761_v39 }
 0x337   :  { %1234 = vpow2.f32 %v1123_v40 }
 0x338   :  { %1236 = vpow2.f32 %v1127_v41 }
 0x33d   :  { %v1235_v42 = vpop.eup %1234 }
 0x33e   :  { %v1237_v43 = vpop.eup %1236  ;;  %v720_v44 = vadd.f32 1.0, %v1235_v42 }
 0x33f   :  { %v766_v45 = vadd.f32 1.0, %v1237_v43 }
 0x340   :  { %1238 = vrcp.f32 %v720_v44  ;;  %v732_v54 = vand.u32 2147483648, %v720_v44  ;;  %v730_v57 = vand.u32 2147483647, %v720_v44  ;;  %vm726_vm14 = vweird.f32 %v720_v44 }
 0x341   :  { %1240 = vrcp.f32 %v766_v45  ;;  %v778_v2 = vand.u32 2147483648, %v766_v45  ;;  %vm772_vm3 = vweird.f32 %v766_v45  ;;  %v776_v3 = vand.u32 2147483647, %v766_v45 }
 0x342   :  { %1242 = vtanh.f32 %v807_v49  ;;  %v733_v59 = vor.u32 1.1754944e-38, %v732_v54  ;;  %vm731_vm1 = vcmp.eq.f32.partialorder %v730_v57, 8.507059e+37 }
 0x343   :  { %v779_v5 = vor.u32 1.1754944e-38, %v778_v2  ;;  %vm777_vm5 = vcmp.eq.f32.partialorder %v776_v3, 8.507059e+37 }
 0x346   :  { %v1239_v48 = vpop.eup %1238 }
 0x347   :  { %v1241_v50 = vpop.eup %1240  ;;  %v722_v51 = vmul.f32 %v1239_v48, %v720_v44  ;;  %vm727_vm13 = vweird.f32 %v1239_v48 }
 0x348   :  { %v768_v52 = vmul.f32 %v1241_v50, %v766_v45  ;;  %vm728_vm15 = vmor %vm726_vm14, %vm727_vm13  ;;  %v1243_v62 = vpop.eup %1242  ;;  %vm773_vm2 = vweird.f32 %v1241_v50 }
 0x349   :  { %v723_v53 = vsub.f32 1.0, %v722_v51  ;;  %vm774_vm4 = vmor %vm772_vm3, %vm773_vm2  ;;  %v1171_v51 = vld [vmem:[%s1605_s17] ss:$0 sm:$0xff] }
 0x34a   :  { %v769_v55 = vsub.f32 1.0, %v768_v52  ;;  %v1172_v52 = vld [vmem:[%s1605_s17 + $0x2] ss:$0 sm:$0xff] }
 0x34b   :  { %v724_v56 = vmul.f32 %v1239_v48, %v723_v53 }
 0x34c   :  { %v770_v60 = vmul.f32 %v1241_v50, %v769_v55 }
 0x34d   :  { %v725_v58 = vadd.f32 %v1239_v48, %v724_v56 }
 0x34e   :  { %v771_v1 = vadd.f32 %v1241_v50, %v770_v60 }
 0x34f   :  { %v729_v61 = vsel %vm728_vm15, %v1239_v48, %v725_v58 }
 0x350   :  { %v734_v63 = vsel %vm731_vm1, %v733_v59, %v729_v61  ;;  %v775_v4 = vsel %vm774_vm4, %v1241_v50, %v771_v1 }
 0x351   :  { %v810_v0 = vmul.f32 %v1243_v62, %v734_v63  ;;  %v780_v7 = vsel %vm777_vm5, %v779_v5, %v775_v4  ;;  %v1173_v63 = vld [vmem:[%s1605_s17 + $0x3] ss:$0 sm:$0xff]  ;;  %s1270_s17 = smov 8  }
 0x353   :  { %1244 = vtanh.f32 %v810_v0 }
 0x359   :  { %v1245_v6 = vpop.eup %1244 }
 0x35a   :  { %v812_v8 = vmul.f32 %v1245_v6, %v780_v7 }
 0x35c   :  { %1131 = vmatmul.msk.f32.vlgmr.msra.gmra.mxu1 %vm193_vm9, %v812_v8  ;;  %1135 = vmatmul.msk.f32.vlgmr.msra.gmra.mxu2 %vm193_vm9, %v812_v8 }
 0x35d   :  { %1139 = vmatmul.msk.f32.vlgmr.msrb.gmra.mxu3 %vm193_vm9, %v812_v8 }
 0x3d9   :  { %v838_v10 = vpop.f32.mrf.mxu1 }
 0x3da   :  { %v839_v11 = vadd.f32 %v1168_v9, %v838_v10 }
 0x3dc   :  { %v1132_v15 = vmul.f32 -1.442695, %v839_v11 }
 0x3de   :  { %1246 = vpow2.f32 %v1132_v15 }
 0x3df   :  { %v884_v17 = vpop.f32.mrf.mxu2 }
 0x3e0   :  { %v885_v18 = vadd.f32 %v1169_v16, %v884_v17  ;;  %v930_v24 = vpop.f32.mrf.mxu3 }
 0x3e1   :  { %v931_v27 = vadd.f32 %v1170_v22, %v930_v24 }
 0x3e2   :  { %v1136_v19 = vmul.f32 -1.442695, %v885_v18 }
 0x3e4   :  { %v1247_v20 = vpop.eup %1246  ;;  %1248 = vpow2.f32 %v1136_v19 }
 0x3e5   :  { %v844_v21 = vadd.f32 1.0, %v1247_v20 }
 0x3e7   :  { %1250 = vrcp.f32 %v844_v21  ;;  %v856_v30 = vand.u32 2147483648, %v844_v21  ;;  %v854_v32 = vand.u32 2147483647, %v844_v21  ;;  %vm850_vm7 = vweird.f32 %v844_v21 }
 0x3e9   :  { %v857_v36 = vor.u32 1.1754944e-38, %v856_v30  ;;  %vm855_vm10 = vcmp.eq.f32.partialorder %v854_v32, 8.507059e+37 }
 0x3ea   :  { %v1249_v23 = vpop.eup %1248 }
 0x3eb   :  { %v890_v25 = vadd.f32 1.0, %v1249_v23 }
 0x3ed   :  { %v1251_v26 = vpop.eup %1250  ;;  %1252 = vrcp.f32 %v890_v25  ;;  %v902_v43 = vand.u32 2147483648, %v890_v25  ;;  %vm896_vm0 = vweird.f32 %v890_v25  ;;  %v900_v45 = vand.u32 2147483647, %v890_v25 }
 0x3ee   :  { %v846_v28 = vmul.f32 %v1251_v26, %v844_v21  ;;  %1254 = vtanh.f32 %v931_v27  ;;  %vm851_vm6 = vweird.f32 %v1251_v26 }
 0x3ef   :  { %vm852_vm8 = vmor %vm850_vm7, %vm851_vm6  ;;  %v903_v47 = vor.u32 1.1754944e-38, %v902_v43  ;;  %vm901_vm13 = vcmp.eq.f32.partialorder %v900_v45, 8.507059e+37  ;;  %vm1067_vm6 = vcmask 128064  }
 0x3f0   :  { %v847_v29 = vsub.f32 1.0, %v846_v28 }
 0x3f2   :  { %v848_v31 = vmul.f32 %v1251_v26, %v847_v29 }
 0x3f3   :  { %v1253_v33 = vpop.eup %1252 }
 0x3f4   :  { %v892_v34 = vmul.f32 %v1253_v33, %v890_v25  ;;  %v849_v35 = vadd.f32 %v1251_v26, %v848_v31  ;;  %v1255_v39 = vpop.eup %1254  ;;  %vm897_vm11 = vweird.f32 %v1253_v33 }
 0x3f5   :  { %vm898_vm12 = vmor %vm896_vm0, %vm897_vm11 }
 0x3f6   :  { %v893_v37 = vsub.f32 1.0, %v892_v34  ;;  %v853_v38 = vsel %vm852_vm8, %v1251_v26, %v849_v35 }
 0x3f7   :  { %v858_v40 = vsel %vm855_vm10, %v857_v36, %v853_v38 }
 0x3f8   :  { %v894_v41 = vmul.f32 %v1253_v33, %v893_v37  ;;  %v934_v42 = vmul.f32 %v1255_v39, %v858_v40 }
 0x3fa   :  { %1256 = vtanh.f32 %v934_v42  ;;  %v895_v44 = vadd.f32 %v1253_v33, %v894_v41 }
 0x3fc   :  { %v899_v46 = vsel %vm898_vm12, %v1253_v33, %v895_v44 }
 0x3fd   :  { %v904_v49 = vsel %vm901_vm13, %v903_v47, %v899_v46 }
 0x400   :  { %v1257_v48 = vpop.eup %1256 }
 0x401   :  { %v936_v50 = vmul.f32 %v1257_v48, %v904_v49 }
 0x403   :  { %1140 = vmatmul.msk.f32.vlgmr.msrb.gmra.mxu0 %vm193_vm9, %v936_v50  ;;  %1144 = vmatmul.msk.f32.vlgmr.msrb.gmra.mxu1 %vm193_vm9, %v936_v50 }
 0x404   :  { %1148 = vmatmul.msk.f32.vlgmr.msrb.gmra.mxu2 %vm193_vm9, %v936_v50 }
 0x480   :  { %v962_v53 = vpop.f32.mrf.mxu0  ;;  %v1008_v54 = vpop.f32.mrf.mxu1 }
 0x481   :  { %v963_v55 = vadd.f32 %v1171_v51, %v962_v53  ;;  %v1009_v56 = vadd.f32 %v1172_v52, %v1008_v54 }
 0x483   :  { %v1141_v57 = vmul.f32 -1.442695, %v963_v55  ;;  %v1145_v58 = vmul.f32 -1.442695, %v1009_v56 }
 0x485   :  { %1258 = vpow2.f32 %v1141_v57 }
 0x486   :  { %1260 = vpow2.f32 %v1145_v58 }
 0x487   :  { %v1054_v0 = vpop.f32.mrf.mxu2 }
 0x488   :  { %v1055_v2 = vadd.f32 %v1173_v63, %v1054_v0 }
 0x48b   :  { %v1259_v59 = vpop.eup %1258 }
 0x48c   :  { %v1261_v60 = vpop.eup %1260  ;;  %v968_v61 = vadd.f32 1.0, %v1259_v59 }
 0x48d   :  { %v1014_v62 = vadd.f32 1.0, %v1261_v60 }
 0x48e   :  { %1262 = vrcp.f32 %v968_v61  ;;  %v980_v7 = vand.u32 2147483648, %v968_v61  ;;  %v978_v10 = vand.u32 2147483647, %v968_v61  ;;  %vm974_vm14 = vweird.f32 %v968_v61 }
 0x48f   :  { %1264 = vrcp.f32 %v1014_v62  ;;  %v1026_v19 = vand.u32 2147483648, %v1014_v62  ;;  %vm1020_vm3 = vweird.f32 %v1014_v62  ;;  %v1024_v20 = vand.u32 2147483647, %v1014_v62 }
 0x490   :  { %1266 = vtanh.f32 %v1055_v2  ;;  %v981_v12 = vor.u32 1.1754944e-38, %v980_v7  ;;  %vm979_vm1 = vcmp.eq.f32.partialorder %v978_v10, 8.507059e+37 }
 0x491   :  { %v1027_v22 = vor.u32 1.1754944e-38, %v1026_v19  ;;  %vm1025_vm5 = vcmp.eq.f32.partialorder %v1024_v20, 8.507059e+37 }
 0x494   :  { %v1263_v1 = vpop.eup %1262 }
 0x495   :  { %v1265_v3 = vpop.eup %1264  ;;  %v970_v4 = vmul.f32 %v1263_v1, %v968_v61  ;;  %vm975_vm9 = vweird.f32 %v1263_v1 }
 0x496   :  { %v1016_v5 = vmul.f32 %v1265_v3, %v1014_v62  ;;  %vm976_vm15 = vmor %vm974_vm14, %vm975_vm9  ;;  %v1267_v15 = vpop.eup %1266  ;;  %vm1021_vm2 = vweird.f32 %v1265_v3 }
 0x497   :  { %v971_v6 = vsub.f32 1.0, %v970_v4  ;;  %vm1022_vm4 = vmor %vm1020_vm3, %vm1021_vm2 }
 0x498   :  { %v1017_v8 = vsub.f32 1.0, %v1016_v5 }
 0x499   :  { %v972_v9 = vmul.f32 %v1263_v1, %v971_v6 }
 0x49a   :  { %v1018_v13 = vmul.f32 %v1265_v3, %v1017_v8 }
 0x49b   :  { %v973_v11 = vadd.f32 %v1263_v1, %v972_v9 }
 0x49c   :  { %v1019_v18 = vadd.f32 %v1265_v3, %v1018_v13 }
 0x49d   :  { %v977_v14 = vsel %vm976_vm15, %v1263_v1, %v973_v11 }
 0x49e   :  { %v982_v16 = vsel %vm979_vm1, %v981_v12, %v977_v14  ;;  %v1023_v21 = vsel %vm1022_vm4, %v1265_v3, %v1019_v18 }
 0x49f   :  { %v1058_v17 = vmul.f32 %v1267_v15, %v982_v16  ;;  %v1028_v24 = vsel %vm1025_vm5, %v1027_v22, %v1023_v21 }
 0x4a1   :  { %1268 = vtanh.f32 %v1058_v17 }
 0x4a7   :  { %v1269_v23 = vpop.eup %1268 }
 0x4a8   :  { %v1060_v25 = vmul.f32 %v1269_v23, %v1028_v24 }
 0x4aa   :  { %1064 = vrot.lane.b32.xlu0 %v1060_v25, %s1270_s17 }
 0x51c   :  { %v1065_v26 = vpop.permute.xlu0 %1064 }
 0x51d   :  { %1068 = vst.msk [vmem:[%s1602_s18] sm:$0x3f] %vm1067_vm6, %v1065_v26 }

// kernel: gpr_gcn_forward.9
= control target key start
LH: loop header
LB: loop body
LE: loop exit
PB: predicated region body
PF: predicated region fallthrough
CT: control target
= control target key end

     0   :  { %vm84_vm0 = vcmask 1043456   ;;  %vm80_vm1 = vcmask 31744   ;;  %vm117_vm2 = vcmask 261120   ;;  %vm148_vm3 = vcmask 130048   ;;  %s725_s3 = inlined_call_operand.vmem [shape: f32[4,32], index: 3, kind: input, shape index: {}]   ;;  %s726_s0 = inlined_call_operand.vmem [shape: f32[6,4], index: 0, kind: input, shape index: {}]   ;;  %s727_s5 = inlined_call_operand.vmem [shape: f32[32,16], index: 5, kind: input, shape index: {}]   ;;  %s728_s4 = inlined_call_operand.vmem [shape: f32[1,32], index: 4, kind: input, shape index: {}]   ;;  %s729_s6 = inlined_call_operand.vmem [shape: f32[1,16], index: 6, kind: input, shape index: {}]   ;;  %s730_s8 = inlined_call_operand.vmem [shape: f32[1,8], index: 8, kind: input, shape index: {}]   ;;  %s731_s7 = inlined_call_operand.vmem [shape: f32[16,8], index: 7, kind: input, shape index: {}]   ;;  %s732_s10 = inlined_call_operand.vmem [shape: f32[1,4], index: 10, kind: input, shape index: {}]   ;;  %s733_s9 = inlined_call_operand.vmem [shape: f32[8,4], index: 9, kind: input, shape index: {}]   ;;  %s734_s11 = inlined_call_operand.vmem [shape: f32[4,16], index: 11, kind: input, shape index: {}]   ;;  %s735_s12 = inlined_call_operand.vmem [shape: f32[16,16], index: 12, kind: input, shape index: {}]   ;;  %s736_s1 = inlined_call_operand.vmem [shape: f32[6,16], index: 1, kind: input, shape index: {}]   ;;  %s737_s13 = inlined_call_operand.vmem [shape: f32[1,16], index: 13, kind: input, shape index: {}]   ;;  %s738_s2 = inlined_call_operand.vmem [shape: f32[6,6], index: 2, kind: input, shape index: {}]   ;;  %s739_s15 = inlined_call_operand.vmem [shape: f32[1,4], index: 15, kind: input, shape index: {}]   ;;  %s740_s14 = inlined_call_operand.vmem [shape: f32[16,4], index: 14, kind: input, shape index: {}]   ;;  %s741_s16 = inlined_call_operand.vmem [shape: f32[4,16], index: 16, kind: input, shape index: {}]   ;;  %s742_s17 = inlined_call_operand.vmem [shape: f32[16,16], index: 17, kind: input, shape index: {}]   ;;  %s743_s18 = inlined_call_operand.vmem [shape: f32[1,16], index: 18, kind: input, shape index: {}]   ;;  %s744_s20 = inlined_call_operand.vmem [shape: f32[1,4], index: 20, kind: input, shape index: {}]   ;;  %s745_s19 = inlined_call_operand.vmem [shape: f32[16,4], index: 19, kind: input, shape index: {}]   ;;  %s746_s22 = inlined_call_operand.vmem [shape: f32[1,4], index: 22, kind: input, shape index: {}]   ;;  %s747_s21 = inlined_call_operand.vmem [shape: f32[4,4], index: 21, kind: input, shape index: {}]   ;;  %s748_s23 = inlined_call_operand.vmem [shape: f32[6,4], index: 23, kind: output, shape index: {}]  }
   0x1   :  { %751 = sst [smem:[#allocation2_spill]] %s725_s3  ;;  %v173_v16 = vld [vmem:[%s733_s9] sm:$0xff]  ;;  %vm178_vm4 = vcmask 64512   ;;  %v207_v22 = vld [vmem:[%s735_s12 + $0x8] sm:$0xff]  ;;  %vm265_vm5 = vcmask 1045504   ;;  %vm261_vm6 = vcmask 48128  }
   0x2   :  { %752 = sst [smem:[#allocation3_spill]] %s726_s0  ;;  %197 = vmatpush.msra.mxu3 %v173_v16  ;;  %v205_v21 = vld [vmem:[%s734_s11] sm:$0xf]  ;;  %v290_v33 = vld [vmem:[%s740_s14 + $0x8] sm:$0xff]  ;;  %vm458_vm7 = vcmask 29696  }
   0x3   :  { %753 = sst [smem:[#allocation4_spill]] %s727_s5  ;;  %v206_v23 = vld [vmem:[%s735_s12] sm:$0xff]  ;;  %v322_v39 = vld [vmem:[%s742_s17 + $0x8] sm:$0xff] }
   0x4   :  { %754 = sst [smem:[#allocation5_spill]] %s728_s4  ;;  %470 = vmatpush.msk.msrb.mxu3 %vm84_vm0, %v205_v21  ;;  %v203_v24 = vld [vmem:[%s736_s1] sm:$0x3f]  ;;  %v397_v49 = vld [vmem:[%s745_s19 + $0x8] sm:$0xff] }
   0x5   :  { %755 = sst [smem:[#allocation6_spill]] %s729_s6  ;;  %v204_v32 = vld [vmem:[%s738_s2] sm:$0x3f] }
   0x6   :  { %756 = sst [smem:[#allocation7_spill]] %s730_s8  ;;  %v289_v34 = vld [vmem:[%s740_s14] sm:$0xff] }
   0x7   :  { %757 = sst [smem:[#allocation8_spill]] %s731_s7  ;;  %v487_v35 = vld [vmem:[%s737_s13] ss:$0 sm:$0xff] }
   0x8   :  { %758 = sst [smem:[#allocation9_spill]] %s732_s10  ;;  %v320_v38 = vld [vmem:[%s741_s16] sm:$0xf] }
   0x9   :  { %s759_s24 = sld [smem:[#allocation2_spill]]  ;;  %v321_v40 = vld [vmem:[%s742_s17] sm:$0xff] }
   0xa   :  { %s760_s0 = sld [smem:[#allocation3_spill]]  ;;  %v488_v41 = vld [vmem:[%s739_s15] ss:$0 sm:$0xff] }
   0xb   :  { %s761_s7 = sld [smem:[#allocation4_spill]]  ;;  %v396_v50 = vld [vmem:[%s745_s19] sm:$0xff] }
   0xc   :  { %s764_s10 = sld [smem:[#allocation6_spill]]  ;;  %v489_v51 = vld [vmem:[%s743_s18] ss:$0 sm:$0xff] }
   0xd   :  { %s765_s6 = sld [smem:[#allocation7_spill]]  ;;  %v427_v54 = vld [vmem:[%s747_s21] sm:$0xf] }
   0xe   :  { %s766_s27 = sld [smem:[#allocation9_spill]]  ;;  %v490_v55 = vld [vmem:[%s744_s20] ss:$0 sm:$0xff] }
   0xf   :  { %v75_v0 = vld [vmem:[%s759_s24] sm:$0xf]  ;;  %s762_s24 = sld [smem:[#allocation5_spill]] }
  0x10   :  { %v74_v1 = vld [vmem:[%s760_s0] sm:$0x3f]  ;;  %464 = vmatpush.msk.msra.mxu0 %vm84_vm0, %v75_v0  ;;  %s763_s0 = sld [smem:[#allocation8_spill]] }
  0x11   :  { %v112_v2 = vld [vmem:[%s761_s7 + $0x18] sm:$0xff]  ;;  %465 = vmatmul.msk.f32.vlgmr.msra.gmra.mxu0 %vm80_vm1, %v74_v1  ;;  %v111_v3 = vld [vmem:[%s761_s7 + $0x10] sm:$0xff]  ;;  %v110_v4 = vld [vmem:[%s761_s7 + $0x8] sm:$0xff] }
  0x12   :  { %133 = vmatpush.msra.mxu1 %v112_v2  ;;  %v109_v5 = vld [vmem:[%s761_s7] sm:$0xff]  ;;  %225 = vmatpush.msrb.mxu0 %v207_v22 }
  0x13   :  { %v484_v12 = vld [vmem:[%s764_s10] ss:$0 sm:$0xff] }
  0x14   :  { %134 = vmatpush.msra.mxu1 %v111_v3  ;;  %v485_v17 = vld [vmem:[%s765_s6] ss:$0 sm:$0xff]  ;;  %226 = vmatpush.msrb.mxu0 %v206_v23 }
  0x15   :  { %v483_v6 = vld [vmem:[%s762_s24] ss:$0 sm:$0xff] }
  0x16   :  { %135 = vmatpush.msra.mxu1 %v110_v4  ;;  %v143_v10 = vld [vmem:[%s763_s0 + $0x8] sm:$0xff]  ;;  %v142_v11 = vld [vmem:[%s763_s0] sm:$0xff]  ;;  %337 = vmatpush.msra.mxu0 %v322_v39 }
  0x17   :  { %166 = vmatpush.msra.mxu2 %v143_v10  ;;  %v486_v25 = vld [vmem:[%s766_s27] ss:$0 sm:$0xff] }
  0x18   :  { %136 = vmatpush.msra.mxu1 %v109_v5  ;;  %338 = vmatpush.msra.mxu0 %v321_v40  ;;  %v491_v60 = vld [vmem:[%s746_s22] ss:$0 sm:$0xff] }
  0x19   :  { %167 = vmatpush.msra.mxu2 %v142_v11  ;;  %469 = vmatmul.msk.f32.vlgmr.msrb.gmra.mxu0 %vm148_vm3, %v203_v24 }
  0x1a   :  { %312 = vmatpush.msrb.mxu1 %v290_v33  ;;  %481 = vmatpush.msk.msrb.mxu0 %vm84_vm0, %v427_v54 }
  0x1c   :  { %313 = vmatpush.msrb.mxu1 %v289_v34 }
  0x21   :  { %475 = vmatmul.msk.f32.vlgmr.msra.gmra.mxu0 %vm148_vm3, %v203_v24 }
  0x8e   :  { %v105_v7 = vpop.f32.mrf.mxu0 }
  0x8f   :  { %v106_v8 = vadd.f32 %v483_v6, %v105_v7 }
  0x91   :  { %v108_v9 = vmax.f32 %v106_v8, 0.0 }
  0x93   :  { %466 = vmatmul.msk.f32.vlgmr.msra.gmra.mxu1 %vm117_vm2, %v108_v9 }
  0x94   :  { %419 = vmatpush.msra.mxu1 %v397_v49 }
  0x96   :  { %v228_v29 = vpop.f32.mrf.mxu0  ;;  %420 = vmatpush.msra.mxu1 %v396_v50 }
  0x9e   :  { %v340_v46 = vpop.f32.mrf.mxu0 }
 0x110   :  { %v138_v13 = vpop.f32.mrf.mxu1 }
 0x111   :  { %v139_v14 = vadd.f32 %v484_v12, %v138_v13 }
 0x113   :  { %v141_v15 = vmax.f32 %v139_v14, 0.0 }
 0x115   :  { %467 = vmatmul.msk.f32.vlgmr.msra.gmra.mxu2 %vm148_vm3, %v141_v15 }
 0x198   :  { %v169_v18 = vpop.f32.mrf.mxu2 }
 0x199   :  { %v170_v19 = vadd.f32 %v485_v17, %v169_v18 }
 0x19b   :  { %v172_v20 = vmax.f32 %v170_v19, 0.0 }
 0x19d   :  { %468 = vmatmul.msk.f32.vlgmr.msra.gmra.mxu3 %vm178_vm4, %v172_v20 }
 0x19e   :  { %476 = vmatpush.msk.msra.mxu3 %vm84_vm0, %v320_v38 }
 0x220   :  { %v199_v26 = vpop.f32.mrf.mxu3 }
 0x221   :  { %v200_v27 = vadd.f32 %v486_v25, %v199_v26 }
 0x223   :  { %v202_v28 = vmax.f32 %v200_v27, 0.0 }
 0x225   :  { %471 = vmatmul.msk.f32.vlgmr.msrb.gmra.mxu3 %vm80_vm1, %v202_v28 }
 0x2a8   :  { %v254_v30 = vpop.f32.mrf.mxu3 }
 0x2a9   :  { %v255_v31 = vadd.f32 %v254_v30, %v228_v29 }
 0x2ab   :  { %472 = vmatpush.msk.msrb.mxu2 %vm265_vm5, %v255_v31 }
 0x2ac   :  { %473 = vmatmul.msk.f32.vlgmr.msrb.gmra.mxu2 %vm261_vm6, %v204_v32 }
 0x32f   :  { %v286_v36 = vpop.f32.mrf.mxu2 }
 0x330   :  { %v287_v37 = vadd.f32 %v487_v35, %v286_v36 }
 0x332   :  { %474 = vmatmul.msk.f32.vlgmr.msrb.gmra.mxu1 %vm148_vm3, %v287_v37 }
 0x3af   :  { %v315_v42 = vpop.f32.mrf.mxu1 }
 0x3b0   :  { %v316_v43 = vadd.f32 %v488_v41, %v315_v42 }
 0x3b2   :  { %v318_v44 = vmax.f32 %v316_v43, 0.0 }
 0x3b4   :  { %v319_v45 = vadd.f32 %v318_v44, %v202_v28 }
 0x3b6   :  { %477 = vmatmul.msk.f32.vlgmr.msra.gmra.mxu3 %vm80_vm1, %v319_v45 }
 0x439   :  { %v366_v47 = vpop.f32.mrf.mxu3 }
 0x43a   :  { %v367_v48 = vadd.f32 %v366_v47, %v340_v46 }
 0x43c   :  { %478 = vmatpush.msk.msra.mxu2 %vm265_vm5, %v367_v48 }
 0x43d   :  { %479 = vmatmul.msk.f32.vlgmr.msra.gmra.mxu2 %vm261_vm6, %v204_v32 }
 0x4c0   :  { %v393_v52 = vpop.f32.mrf.mxu2 }
 0x4c1   :  { %v394_v53 = vadd.f32 %v489_v51, %v393_v52 }
 0x4c3   :  { %480 = vmatmul.msk.f32.vlgmr.msra.gmra.mxu1 %vm148_vm3, %v394_v53 }
 0x540   :  { %v422_v56 = vpop.f32.mrf.mxu1 }
 0x541   :  { %v423_v57 = vadd.f32 %v490_v55, %v422_v56 }
 0x543   :  { %v425_v58 = vmax.f32 %v423_v57, 0.0 }
 0x545   :  { %v426_v59 = vadd.f32 %v425_v58, %v319_v45 }
 0x547   :  { %482 = vmatmul.msk.f32.vlgmr.msrb.gmra.mxu0 %vm80_vm1, %v426_v59 }
 0x5c4   :  { %v455_v61 = vpop.f32.mrf.mxu0 }
 0x5c5   :  { %v456_v62 = vadd.f32 %v491_v60, %v455_v61 }
 0x5c7   :  { %459 = vst.msk [vmem:[%s748_s23] sm:$0x3f] %vm458_vm7, %v456_v62 }

</bundles_post_ra>
